<compile_context>
chip_gen: v6e
topology: v6e:2x2x1
jax: 0.10.0
libtpu: 0.0.40
codegen_flags: <defaults>
</compile_context>

<pallas_src>
import functools
import math

import jax
import jax.numpy as jnp
from jax.experimental import pallas as pl
from jax.experimental.pallas import tpu as pltpu


# ----------------------------------------------------------------------------
# In-kernel helpers.  All activations are lane-dense "slabs" of shape (H, W*C)
# with slab[h, w*C + c] = act[h, w, c].
# ----------------------------------------------------------------------------
def _conv3x3_slab(slabs, w_ref, b_ref):
    """3x3 'same' conv (zero padding) as ONE MXU matmul.

    slabs : list of (H, W*Cin_i) bf16 values (input-channel groups of the same
            image, e.g. [residual, upsampled]; their concat order must match
            the expanded weight's row order).
    w_ref : (sum_i 3*W*Cin_i, W*Cout) bf16 expanded weight — dx shifts, the
            zero W-boundary and the channel concat are all folded in.
    b_ref : (1, W*Cout) f32 bias (tiled over w).
    Returns fp32 (H, W*Cout).
    """
    pieces = []
    for y in slabs:
        h = y.shape[0]
        zrow = jnp.zeros((1, y.shape[1]), y.dtype)
        p = jnp.concatenate([zrow, y, zrow], axis=0)          # (H+2, W*Cin)
        pieces += [p[0:h, :], p[1:h + 1, :], p[2:h + 2, :]]   # dy = 0, 1, 2
    patch = jnp.concatenate(pieces, axis=1)                   # (H, sum 3*W*Cin)
    return jnp.dot(patch, w_ref[...],
                   preferred_element_type=jnp.float32) + b_ref[...]


def _maxpool2x2_slab(y, c):
    """2x2 / stride-2 max pool on a (H, W*c) slab -> (H/2, (W/2)*c)."""
    h, wc = y.shape
    w = wc // c
    cols = [jnp.maximum(y[:, (2 * j) * c:(2 * j + 1) * c],
                        y[:, (2 * j + 1) * c:(2 * j + 2) * c])
            for j in range(w // 2)]
    yw = jnp.concatenate(cols, axis=1)                        # pool over W
    rows = [jnp.maximum(yw[2 * i:2 * i + 1, :], yw[2 * i + 1:2 * i + 2, :])
            for i in range(h // 2)]
    return jnp.concatenate(rows, axis=0)                      # pool over H


def _conv_transpose_2x2_slab(y, wt_ref, bt_ref):
    """2x2 / stride-2 ConvTranspose as ONE matmul.

    y      : (H, W*Cin) bf16 slab.
    wt_ref : (W*Cin, 4*W*Ct) bf16 — columns are [dy=0 | dy=1] halves, each an
             interleaved (2w+dx)*Ct layout (built host-side with kron(eye, .)).
    bt_ref : (1, 4*W*Ct) f32 bias.
    Returns fp32 (2H, 2W*Ct).
    """
    h = y.shape[0]
    z = jnp.dot(y, wt_ref[...], preferred_element_type=jnp.float32) + bt_ref[...]
    half = z.shape[1] // 2
    rows = []
    for i in range(h):
        rows.append(z[i:i + 1, :half])      # output row 2i   (dy = 0)
        rows.append(z[i:i + 1, half:])      # output row 2i+1 (dy = 1)
    return jnp.concatenate(rows, axis=0)


# ----------------------------------------------------------------------------
# Fused whole-network kernel
# ----------------------------------------------------------------------------
def _unet_kernel(x_ref, *refs, depth, base):
    o_ref = refs[-1]
    it = iter(refs[:-1])
    bf16 = jnp.bfloat16

    def conv_block(slabs):
        w1, b1, w2, b2 = next(it), next(it), next(it), next(it)
        y = jnp.maximum(_conv3x3_slab(slabs, w1, b1), 0.0).astype(bf16)
        y = jnp.maximum(_conv3x3_slab([y], w2, b2), 0.0).astype(bf16)
        return y  # Dropout2d(p) == identity at inference.

    def conv_transpose(y):
        wt, bt = next(it), next(it)
        return _conv_transpose_2x2_slab(y, wt, bt).astype(bf16)

    # ---------------- encoder ----------------
    x = x_ref[0]                                   # (H, W*Cin) bf16
    residuals = []
    for d in range(depth):
        if d > 0:
            x = _maxpool2x2_slab(x, base * (2 ** (d - 1)))
        x = conv_block([x])
        residuals.append(x)
    residuals = residuals[::-1]

    # ---------------- bridge ----------------
    x = _maxpool2x2_slab(x, base * (2 ** (depth - 1)))
    x = conv_block([x])
    x = conv_transpose(x)

    # ---------------- decoder ----------------
    for d in range(depth):
        # _crop_and_concat: the crop is identity ('same' padding everywhere);
        # the channel concat (residual first) is folded into conv1's weight.
        x = conv_block([residuals[d], x])
        if d != depth - 1:
            x = conv_transpose(x)

    # ---------------- final 1x1 conv (fused) ----------------
    fw, fb = next(it), next(it)
    o_ref[0] = jnp.dot(x, fw[...], preferred_element_type=jnp.float32) + fb[...]


# ----------------------------------------------------------------------------
# Host-side parameter construction: PyTorch-shaped weights -> expanded
# block-banded slab weights (bf16) + tiled biases (f32).
# ----------------------------------------------------------------------------
def _rand_conv(key, cout, cin, ksz):
    kw, kb = jax.random.split(key)
    bound = 1.0 / math.sqrt(cin * ksz * ksz)
    w = jax.random.uniform(kw, (cout, cin, ksz, ksz), jnp.float32, -bound, bound)
    b = jax.random.uniform(kb, (cout,), jnp.float32, -bound, bound)
    return w, b


def _rand_convT(key, cin, cout):
    kw, kb = jax.random.split(key)
    bound = 1.0 / math.sqrt(cin * 4)
    w = jax.random.uniform(kw, (cin, cout, 2, 2), jnp.float32, -bound, bound)
    b = jax.random.uniform(kb, (cout,), jnp.float32, -bound, bound)
    return w, b


def _expand_conv3x3(w, b, wlev, groups=None):
    """(Cout, Cin, 3, 3) -> (sum_g 3*W*|g|, W*Cout) with dx shifts, the zero
    W-boundary and the input-channel-group order folded in."""
    cout, cin = w.shape[:2]
    kt = jnp.transpose(w, (2, 3, 1, 0))                       # (3, 3, Cin, Cout)
    if groups is None:
        groups = [(0, cin)]
    blocks = []
    for lo, hi in groups:
        for dy in range(3):
            e = sum(jnp.kron(jnp.eye(wlev, k=1 - dx), kt[dy, dx, lo:hi, :])
                    for dx in range(3))
            blocks.append(e)
    wexp = jnp.concatenate(blocks, axis=0).astype(jnp.bfloat16)
    bexp = jnp.tile(b, wlev).reshape(1, wlev * cout).astype(jnp.float32)
    return wexp, bexp


def _expand_convT(w, b, wlev):
    """(Cin, Cout, 2, 2) -> (W*Cin, 4*W*Cout): columns [dy=0 | dy=1], each with
    the (2w+dx)*Cout interleave built in."""
    cin, cout = w.shape[:2]
    eye = jnp.eye(wlev)
    halves = []
    for dy in range(2):
        m = jnp.concatenate([w[:, :, dy, 0], w[:, :, dy, 1]], axis=1)  # (Cin,2Cout)
        halves.append(jnp.kron(eye, m))                                # (WCin,2WCout)
    wexp = jnp.concatenate(halves, axis=1).astype(jnp.bfloat16)
    bexp = jnp.tile(b, 4 * wlev).reshape(1, 4 * wlev * cout).astype(jnp.float32)
    return wexp, bexp


def init_unet_params(key, depth, base, in_ch, out_ch, H, W):
    """Build the flat, kernel-ordered list of expanded weights/biases."""
    flat = []
    flops = 0
    keys = iter(jax.random.split(key, 5 * depth + 3))

    def add_conv3(k, cin, cout, hlev, wlev, groups=None):
        nonlocal flops
        w, b = _rand_conv(k, cout, cin, 3)
        we, be = _expand_conv3x3(w, b, wlev, groups)
        flat.extend((we, be))
        flops += 2 * hlev * we.shape[0] * we.shape[1]

    def add_convT(k, cin, cout, hlev, wlev):
        nonlocal flops
        w, b = _rand_convT(k, cin, cout)
        we, be = _expand_convT(w, b, wlev)
        flat.extend((we, be))
        flops += 2 * hlev * we.shape[0] * we.shape[1]

    # encoder
    ch = base
    add_conv3(next(keys), in_ch, base, H, W)
    add_conv3(next(keys), base, base, H, W)
    for d in range(1, depth):
        hl, wl = H >> d, W >> d
        add_conv3(next(keys), ch, 2 * ch, hl, wl)
        add_conv3(next(keys), 2 * ch, 2 * ch, hl, wl)
        ch *= 2
    # bridge
    hb, wb = H >> depth, W >> depth
    add_conv3(next(keys), ch, 2 * ch, hb, wb)
    add_conv3(next(keys), 2 * ch, 2 * ch, hb, wb)
    add_convT(next(keys), 2 * ch, ch, hb, wb)
    ch *= 2
    # decoder
    for d in range(depth):
        lev = depth - 1 - d
        hl, wl = H >> lev, W >> lev
        cin, cout = ch, ch // 2
        add_conv3(next(keys), cin, cout, hl, wl,
                  groups=[(0, cin // 2), (cin // 2, cin)])   # residual first
        add_conv3(next(keys), cout, cout, hl, wl)
        if d != depth - 1:
            add_convT(next(keys), cout, cout // 2, hl, wl)
        ch //= 2
    # final 1x1 conv
    w, b = _rand_conv(next(keys), out_ch, ch, 1)
    we = jnp.kron(jnp.eye(W), jnp.transpose(w[:, :, 0, 0])).astype(jnp.bfloat16)
    be = jnp.tile(b, W).reshape(1, W * out_ch).astype(jnp.float32)
    flat.extend((we, be))
    flops += 2 * H * we.shape[0] * we.shape[1]
    return flat, flops


# ----------------------------------------------------------------------------
# Public forward: NCHW fp32 in -> NCHW fp32 out (single fused pallas_call)
# ----------------------------------------------------------------------------
def unet_forward(x_nchw, weights, *, depth, base, out_channels,
                 flops_per_image=0):
    N, Cin, H, W = x_nchw.shape
    if H % (2 ** depth) != 0 or W % (2 ** depth) != 0:
        raise ValueError(f"Invalid image shape for U-Net: {(H, W)}")

    # NCHW -> lane-dense slab (N, H, W*Cin), bf16.
    x = jnp.transpose(x_nchw, (0, 2, 3, 1)).reshape(N, H, W * Cin)
    x = x.astype(jnp.bfloat16)

    out_shape = jax.ShapeDtypeStruct((N, H, W * out_channels), jnp.float32)
    rep_specs = [pl.BlockSpec(w.shape, lambda n: (0, 0)) for w in weights]
    bytes_accessed = (x.size * x.dtype.itemsize
                      + sum(w.size * w.dtype.itemsize for w in weights)
                      + N * H * W * out_channels * 4)

    y = pl.pallas_call(
        functools.partial(_unet_kernel, depth=depth, base=base),
        out_shape=out_shape,
        grid=(N,),
        in_specs=[pl.BlockSpec((1, H, W * Cin), lambda n: (n, 0, 0))] + rep_specs,
        out_specs=pl.BlockSpec((1, H, W * out_channels), lambda n: (n, 0, 0)),
        compiler_params=pltpu.CompilerParams(
            dimension_semantics=("parallel",),        # batch across TCs on v7x
            vmem_limit_bytes=32 * 1024 * 1024),
        cost_estimate=pl.CostEstimate(flops=N * flops_per_image,
                                      transcendentals=0,
                                      bytes_accessed=bytes_accessed),
    )(x, *weights)

    y = y.reshape(N, H, W, out_channels)              # free row-major view
    return jnp.transpose(y, (0, 3, 1, 2))             # -> NCHW fp32


# ----------------------------------------------------------------------------
if __name__ == "__main__":
    depth = 2
    base_channel_num = 8
    in_channels = 4
    out_channels = 3
    N, H, W = 2, 16, 16                               # H, W divisible by 2**depth

    key = jax.random.PRNGKey(0)
    k_x, k_p = jax.random.split(key)
    x = jax.random.normal(k_x, (N, in_channels, H, W), jnp.float32)
    weights, flops_per_image = init_unet_params(
        k_p, depth, base_channel_num, in_channels, out_channels, H, W)

    fwd = jax.jit(functools.partial(
        unet_forward, depth=depth, base=base_channel_num,
        out_channels=out_channels, flops_per_image=flops_per_image))
    out = jax.block_until_ready(fwd(x, weights))

    assert out.shape == (N, out_channels, H, W), out.shape
    assert bool(jnp.all(jnp.isfinite(out)))
    print("KERNEL_OK")
</pallas_src>

<mosaic_0001>
module attributes {stable_mosaic.version = 11 : i64} {
  func.func @_unet_kernel(%arg0: i32, %arg1: memref<1x16x64xbf16, #tpu.memory_space<vmem>>, %arg2: memref<192x128xbf16, #tpu.memory_space<vmem>>, %arg3: memref<1x128xf32, #tpu.memory_space<vmem>>, %arg4: memref<384x128xbf16, #tpu.memory_space<vmem>>, %arg5: memref<1x128xf32, #tpu.memory_space<vmem>>, %arg6: memref<192x128xbf16, #tpu.memory_space<vmem>>, %arg7: memref<1x128xf32, #tpu.memory_space<vmem>>, %arg8: memref<384x128xbf16, #tpu.memory_space<vmem>>, %arg9: memref<1x128xf32, #tpu.memory_space<vmem>>, %arg10: memref<192x128xbf16, #tpu.memory_space<vmem>>, %arg11: memref<1x128xf32, #tpu.memory_space<vmem>>, %arg12: memref<384x128xbf16, #tpu.memory_space<vmem>>, %arg13: memref<1x128xf32, #tpu.memory_space<vmem>>, %arg14: memref<128x256xbf16, #tpu.memory_space<vmem>>, %arg15: memref<1x256xf32, #tpu.memory_space<vmem>>, %arg16: memref<768x128xbf16, #tpu.memory_space<vmem>>, %arg17: memref<1x128xf32, #tpu.memory_space<vmem>>, %arg18: memref<384x128xbf16, #tpu.memory_space<vmem>>, %arg19: memref<1x128xf32, #tpu.memory_space<vmem>>, %arg20: memref<128x256xbf16, #tpu.memory_space<vmem>>, %arg21: memref<1x256xf32, #tpu.memory_space<vmem>>, %arg22: memref<768x128xbf16, #tpu.memory_space<vmem>>, %arg23: memref<1x128xf32, #tpu.memory_space<vmem>>, %arg24: memref<384x128xbf16, #tpu.memory_space<vmem>>, %arg25: memref<1x128xf32, #tpu.memory_space<vmem>>, %arg26: memref<128x48xbf16, #tpu.memory_space<vmem>>, %arg27: memref<1x48xf32, #tpu.memory_space<vmem>>, %arg28: memref<1x16x48xf32, #tpu.memory_space<vmem>>) attributes {dimension_semantics = [#tpu.dimension_semantics<parallel>], iteration_bounds = array<i64: 2>, scalar_prefetch = 0 : i64, scratch_operands = 0 : i64, tpu.core_type = #tpu.core_type<tc>, window_params = [{transform_indices = @transform_0, window_bounds = array<i64: 1, 16, 64>}, {pipeline_mode = #tpu.pipeline_mode<synchronous>, transform_indices = @transform_1, window_bounds = array<i64: 192, 128>}, {pipeline_mode = #tpu.pipeline_mode<synchronous>, transform_indices = @transform_2, window_bounds = array<i64: 1, 128>}, {pipeline_mode = #tpu.pipeline_mode<synchronous>, transform_indices = @transform_3, window_bounds = array<i64: 384, 128>}, {pipeline_mode = #tpu.pipeline_mode<synchronous>, transform_indices = @transform_4, window_bounds = array<i64: 1, 128>}, {pipeline_mode = #tpu.pipeline_mode<synchronous>, transform_indices = @transform_5, window_bounds = array<i64: 192, 128>}, {pipeline_mode = #tpu.pipeline_mode<synchronous>, transform_indices = @transform_6, window_bounds = array<i64: 1, 128>}, {pipeline_mode = #tpu.pipeline_mode<synchronous>, transform_indices = @transform_7, window_bounds = array<i64: 384, 128>}, {pipeline_mode = #tpu.pipeline_mode<synchronous>, transform_indices = @transform_8, window_bounds = array<i64: 1, 128>}, {pipeline_mode = #tpu.pipeline_mode<synchronous>, transform_indices = @transform_9, window_bounds = array<i64: 192, 128>}, {pipeline_mode = #tpu.pipeline_mode<synchronous>, transform_indices = @transform_10, window_bounds = array<i64: 1, 128>}, {pipeline_mode = #tpu.pipeline_mode<synchronous>, transform_indices = @transform_11, window_bounds = array<i64: 384, 128>}, {pipeline_mode = #tpu.pipeline_mode<synchronous>, transform_indices = @transform_12, window_bounds = array<i64: 1, 128>}, {pipeline_mode = #tpu.pipeline_mode<synchronous>, transform_indices = @transform_13, window_bounds = array<i64: 128, 256>}, {pipeline_mode = #tpu.pipeline_mode<synchronous>, transform_indices = @transform_14, window_bounds = array<i64: 1, 256>}, {pipeline_mode = #tpu.pipeline_mode<synchronous>, transform_indices = @transform_15, window_bounds = array<i64: 768, 128>}, {pipeline_mode = #tpu.pipeline_mode<synchronous>, transform_indices = @transform_16, window_bounds = array<i64: 1, 128>}, {pipeline_mode = #tpu.pipeline_mode<synchronous>, transform_indices = @transform_17, window_bounds = array<i64: 384, 128>}, {pipeline_mode = #tpu.pipeline_mode<synchronous>, transform_indices = @transform_18, window_bounds = array<i64: 1, 128>}, {pipeline_mode = #tpu.pipeline_mode<synchronous>, transform_indices = @transform_19, window_bounds = array<i64: 128, 256>}, {pipeline_mode = #tpu.pipeline_mode<synchronous>, transform_indices = @transform_20, window_bounds = array<i64: 1, 256>}, {pipeline_mode = #tpu.pipeline_mode<synchronous>, transform_indices = @transform_21, window_bounds = array<i64: 768, 128>}, {pipeline_mode = #tpu.pipeline_mode<synchronous>, transform_indices = @transform_22, window_bounds = array<i64: 1, 128>}, {pipeline_mode = #tpu.pipeline_mode<synchronous>, transform_indices = @transform_23, window_bounds = array<i64: 384, 128>}, {pipeline_mode = #tpu.pipeline_mode<synchronous>, transform_indices = @transform_24, window_bounds = array<i64: 1, 128>}, {pipeline_mode = #tpu.pipeline_mode<synchronous>, transform_indices = @transform_25, window_bounds = array<i64: 128, 48>}, {pipeline_mode = #tpu.pipeline_mode<synchronous>, transform_indices = @transform_26, window_bounds = array<i64: 1, 48>}, {transform_indices = @transform_27, window_bounds = array<i64: 1, 16, 48>}]} {
    %c0 = arith.constant 0 : index
    %c0_0 = arith.constant 0 : index
    %c0_1 = arith.constant 0 : index
    %0 = vector.load %arg1[%c0, %c0_0, %c0_1] : memref<1x16x64xbf16, #tpu.memory_space<vmem>>, vector<1x16x64xbf16>
    %1 = vector.shape_cast %0 : vector<1x16x64xbf16> to vector<16x64xbf16>
    %cst = arith.constant 0.000000e+00 : bf16
    %2 = vector.broadcast %cst : bf16 to vector<1x64xbf16>
    %3 = tpu.concatenate %2, %1, %2 in 0 : vector<1x64xbf16>, vector<16x64xbf16>, vector<1x64xbf16> -> vector<18x64xbf16>
    %4 = vector.extract_strided_slice %3 {offsets = [0, 0], sizes = [16, 64], strides = [1, 1]} : vector<18x64xbf16> to vector<16x64xbf16>
    %5 = vector.extract_strided_slice %3 {offsets = [1, 0], sizes = [16, 64], strides = [1, 1]} : vector<18x64xbf16> to vector<16x64xbf16>
    %6 = vector.extract_strided_slice %3 {offsets = [2, 0], sizes = [16, 64], strides = [1, 1]} : vector<18x64xbf16> to vector<16x64xbf16>
    %7 = tpu.concatenate %4, %5, %6 in 1 : vector<16x64xbf16>, vector<16x64xbf16>, vector<16x64xbf16> -> vector<16x192xbf16>
    %c0_2 = arith.constant 0 : index
    %c0_3 = arith.constant 0 : index
    %8 = vector.load %arg2[%c0_2, %c0_3] : memref<192x128xbf16, #tpu.memory_space<vmem>>, vector<192x128xbf16>
    %cst_4 = arith.constant dense<0.000000e+00> : vector<16x128xf32>
    %9 = tpu.matmul %7, %8, %cst_4 {dimension_numbers = #tpu.dot_dimension_numbers<[1], [0], [0], [1], [0, 0, 1, 1], [], []>} : vector<16x192xbf16>, vector<192x128xbf16>, vector<16x128xf32> -> vector<16x128xf32>
    %c0_5 = arith.constant 0 : index
    %c0_6 = arith.constant 0 : index
    %10 = vector.load %arg3[%c0_5, %c0_6] : memref<1x128xf32, #tpu.memory_space<vmem>>, vector<1x128xf32>
    %11 = vector.broadcast %10 : vector<1x128xf32> to vector<16x128xf32>
    %12 = arith.addf %9, %11 : vector<16x128xf32>
    %cst_7 = arith.constant 0.000000e+00 : f32
    %13 = vector.broadcast %cst_7 : f32 to vector<16x128xf32>
    %14 = arith.maximumf %12, %13 : vector<16x128xf32>
    %15 = arith.truncf %14 : vector<16x128xf32> to vector<16x128xbf16>
    %cst_8 = arith.constant 0.000000e+00 : bf16
    %16 = vector.broadcast %cst_8 : bf16 to vector<1x128xbf16>
    %17 = tpu.concatenate %16, %15, %16 in 0 : vector<1x128xbf16>, vector<16x128xbf16>, vector<1x128xbf16> -> vector<18x128xbf16>
    %18 = vector.extract_strided_slice %17 {offsets = [0, 0], sizes = [16, 128], strides = [1, 1]} : vector<18x128xbf16> to vector<16x128xbf16>
    %19 = vector.extract_strided_slice %17 {offsets = [1, 0], sizes = [16, 128], strides = [1, 1]} : vector<18x128xbf16> to vector<16x128xbf16>
    %20 = vector.extract_strided_slice %17 {offsets = [2, 0], sizes = [16, 128], strides = [1, 1]} : vector<18x128xbf16> to vector<16x128xbf16>
    %21 = tpu.concatenate %18, %19, %20 in 1 : vector<16x128xbf16>, vector<16x128xbf16>, vector<16x128xbf16> -> vector<16x384xbf16>
    %c0_9 = arith.constant 0 : index
    %c0_10 = arith.constant 0 : index
    %22 = vector.load %arg4[%c0_9, %c0_10] : memref<384x128xbf16, #tpu.memory_space<vmem>>, vector<384x128xbf16>
    %cst_11 = arith.constant dense<0.000000e+00> : vector<16x128xf32>
    %23 = tpu.matmul %21, %22, %cst_11 {dimension_numbers = #tpu.dot_dimension_numbers<[1], [0], [0], [1], [0, 0, 1, 1], [], []>} : vector<16x384xbf16>, vector<384x128xbf16>, vector<16x128xf32> -> vector<16x128xf32>
    %c0_12 = arith.constant 0 : index
    %c0_13 = arith.constant 0 : index
    %24 = vector.load %arg5[%c0_12, %c0_13] : memref<1x128xf32, #tpu.memory_space<vmem>>, vector<1x128xf32>
    %25 = vector.broadcast %24 : vector<1x128xf32> to vector<16x128xf32>
    %26 = arith.addf %23, %25 : vector<16x128xf32>
    %cst_14 = arith.constant 0.000000e+00 : f32
    %27 = vector.broadcast %cst_14 : f32 to vector<16x128xf32>
    %28 = arith.maximumf %26, %27 : vector<16x128xf32>
    %29 = arith.truncf %28 : vector<16x128xf32> to vector<16x128xbf16>
    %30 = vector.extract_strided_slice %29 {offsets = [0, 0], sizes = [16, 8], strides = [1, 1]} : vector<16x128xbf16> to vector<16x8xbf16>
    %31 = vector.extract_strided_slice %29 {offsets = [0, 8], sizes = [16, 8], strides = [1, 1]} : vector<16x128xbf16> to vector<16x8xbf16>
    %32 = arith.maximumf %30, %31 : vector<16x8xbf16>
    %33 = vector.extract_strided_slice %29 {offsets = [0, 16], sizes = [16, 8], strides = [1, 1]} : vector<16x128xbf16> to vector<16x8xbf16>
    %34 = vector.extract_strided_slice %29 {offsets = [0, 24], sizes = [16, 8], strides = [1, 1]} : vector<16x128xbf16> to vector<16x8xbf16>
    %35 = arith.maximumf %33, %34 : vector<16x8xbf16>
    %36 = vector.extract_strided_slice %29 {offsets = [0, 32], sizes = [16, 8], strides = [1, 1]} : vector<16x128xbf16> to vector<16x8xbf16>
    %37 = vector.extract_strided_slice %29 {offsets = [0, 40], sizes = [16, 8], strides = [1, 1]} : vector<16x128xbf16> to vector<16x8xbf16>
    %38 = arith.maximumf %36, %37 : vector<16x8xbf16>
    %39 = vector.extract_strided_slice %29 {offsets = [0, 48], sizes = [16, 8], strides = [1, 1]} : vector<16x128xbf16> to vector<16x8xbf16>
    %40 = vector.extract_strided_slice %29 {offsets = [0, 56], sizes = [16, 8], strides = [1, 1]} : vector<16x128xbf16> to vector<16x8xbf16>
    %41 = arith.maximumf %39, %40 : vector<16x8xbf16>
    %42 = vector.extract_strided_slice %29 {offsets = [0, 64], sizes = [16, 8], strides = [1, 1]} : vector<16x128xbf16> to vector<16x8xbf16>
    %43 = vector.extract_strided_slice %29 {offsets = [0, 72], sizes = [16, 8], strides = [1, 1]} : vector<16x128xbf16> to vector<16x8xbf16>
    %44 = arith.maximumf %42, %43 : vector<16x8xbf16>
    %45 = vector.extract_strided_slice %29 {offsets = [0, 80], sizes = [16, 8], strides = [1, 1]} : vector<16x128xbf16> to vector<16x8xbf16>
    %46 = vector.extract_strided_slice %29 {offsets = [0, 88], sizes = [16, 8], strides = [1, 1]} : vector<16x128xbf16> to vector<16x8xbf16>
    %47 = arith.maximumf %45, %46 : vector<16x8xbf16>
    %48 = vector.extract_strided_slice %29 {offsets = [0, 96], sizes = [16, 8], strides = [1, 1]} : vector<16x128xbf16> to vector<16x8xbf16>
    %49 = vector.extract_strided_slice %29 {offsets = [0, 104], sizes = [16, 8], strides = [1, 1]} : vector<16x128xbf16> to vector<16x8xbf16>
    %50 = arith.maximumf %48, %49 : vector<16x8xbf16>
    %51 = vector.extract_strided_slice %29 {offsets = [0, 112], sizes = [16, 8], strides = [1, 1]} : vector<16x128xbf16> to vector<16x8xbf16>
    %52 = vector.extract_strided_slice %29 {offsets = [0, 120], sizes = [16, 8], strides = [1, 1]} : vector<16x128xbf16> to vector<16x8xbf16>
    %53 = arith.maximumf %51, %52 : vector<16x8xbf16>
    %54 = tpu.concatenate %32, %35, %38, %41, %44, %47, %50, %53 in 1 : vector<16x8xbf16>, vector<16x8xbf16>, vector<16x8xbf16>, vector<16x8xbf16>, vector<16x8xbf16>, vector<16x8xbf16>, vector<16x8xbf16>, vector<16x8xbf16> -> vector<16x64xbf16>
    %55 = vector.extract_strided_slice %54 {offsets = [0, 0], sizes = [1, 64], strides = [1, 1]} : vector<16x64xbf16> to vector<1x64xbf16>
    %56 = vector.extract_strided_slice %54 {offsets = [1, 0], sizes = [1, 64], strides = [1, 1]} : vector<16x64xbf16> to vector<1x64xbf16>
    %57 = arith.maximumf %55, %56 : vector<1x64xbf16>
    %58 = vector.extract_strided_slice %54 {offsets = [2, 0], sizes = [1, 64], strides = [1, 1]} : vector<16x64xbf16> to vector<1x64xbf16>
    %59 = vector.extract_strided_slice %54 {offsets = [3, 0], sizes = [1, 64], strides = [1, 1]} : vector<16x64xbf16> to vector<1x64xbf16>
    %60 = arith.maximumf %58, %59 : vector<1x64xbf16>
    %61 = vector.extract_strided_slice %54 {offsets = [4, 0], sizes = [1, 64], strides = [1, 1]} : vector<16x64xbf16> to vector<1x64xbf16>
    %62 = vector.extract_strided_slice %54 {offsets = [5, 0], sizes = [1, 64], strides = [1, 1]} : vector<16x64xbf16> to vector<1x64xbf16>
    %63 = arith.maximumf %61, %62 : vector<1x64xbf16>
    %64 = vector.extract_strided_slice %54 {offsets = [6, 0], sizes = [1, 64], strides = [1, 1]} : vector<16x64xbf16> to vector<1x64xbf16>
    %65 = vector.extract_strided_slice %54 {offsets = [7, 0], sizes = [1, 64], strides = [1, 1]} : vector<16x64xbf16> to vector<1x64xbf16>
    %66 = arith.maximumf %64, %65 : vector<1x64xbf16>
    %67 = vector.extract_strided_slice %54 {offsets = [8, 0], sizes = [1, 64], strides = [1, 1]} : vector<16x64xbf16> to vector<1x64xbf16>
    %68 = vector.extract_strided_slice %54 {offsets = [9, 0], sizes = [1, 64], strides = [1, 1]} : vector<16x64xbf16> to vector<1x64xbf16>
    %69 = arith.maximumf %67, %68 : vector<1x64xbf16>
    %70 = vector.extract_strided_slice %54 {offsets = [10, 0], sizes = [1, 64], strides = [1, 1]} : vector<16x64xbf16> to vector<1x64xbf16>
    %71 = vector.extract_strided_slice %54 {offsets = [11, 0], sizes = [1, 64], strides = [1, 1]} : vector<16x64xbf16> to vector<1x64xbf16>
    %72 = arith.maximumf %70, %71 : vector<1x64xbf16>
    %73 = vector.extract_strided_slice %54 {offsets = [12, 0], sizes = [1, 64], strides = [1, 1]} : vector<16x64xbf16> to vector<1x64xbf16>
    %74 = vector.extract_strided_slice %54 {offsets = [13, 0], sizes = [1, 64], strides = [1, 1]} : vector<16x64xbf16> to vector<1x64xbf16>
    %75 = arith.maximumf %73, %74 : vector<1x64xbf16>
    %76 = vector.extract_strided_slice %54 {offsets = [14, 0], sizes = [1, 64], strides = [1, 1]} : vector<16x64xbf16> to vector<1x64xbf16>
    %77 = vector.extract_strided_slice %54 {offsets = [15, 0], sizes = [1, 64], strides = [1, 1]} : vector<16x64xbf16> to vector<1x64xbf16>
    %78 = arith.maximumf %76, %77 : vector<1x64xbf16>
    %79 = tpu.concatenate %57, %60, %63, %66, %69, %72, %75, %78 in 0 : vector<1x64xbf16>, vector<1x64xbf16>, vector<1x64xbf16>, vector<1x64xbf16>, vector<1x64xbf16>, vector<1x64xbf16>, vector<1x64xbf16>, vector<1x64xbf16> -> vector<8x64xbf16>
    %cst_15 = arith.constant 0.000000e+00 : bf16
    %80 = vector.broadcast %cst_15 : bf16 to vector<1x64xbf16>
    %81 = tpu.concatenate %80, %79, %80 in 0 : vector<1x64xbf16>, vector<8x64xbf16>, vector<1x64xbf16> -> vector<10x64xbf16>
    %82 = vector.extract_strided_slice %81 {offsets = [0, 0], sizes = [8, 64], strides = [1, 1]} : vector<10x64xbf16> to vector<8x64xbf16>
    %83 = vector.extract_strided_slice %81 {offsets = [1, 0], sizes = [8, 64], strides = [1, 1]} : vector<10x64xbf16> to vector<8x64xbf16>
    %84 = vector.extract_strided_slice %81 {offsets = [2, 0], sizes = [8, 64], strides = [1, 1]} : vector<10x64xbf16> to vector<8x64xbf16>
    %85 = tpu.concatenate %82, %83, %84 in 1 : vector<8x64xbf16>, vector<8x64xbf16>, vector<8x64xbf16> -> vector<8x192xbf16>
    %c0_16 = arith.constant 0 : index
    %c0_17 = arith.constant 0 : index
    %86 = vector.load %arg6[%c0_16, %c0_17] : memref<192x128xbf16, #tpu.memory_space<vmem>>, vector<192x128xbf16>
    %cst_18 = arith.constant dense<0.000000e+00> : vector<8x128xf32>
    %87 = tpu.matmul %85, %86, %cst_18 {dimension_numbers = #tpu.dot_dimension_numbers<[1], [0], [0], [1], [0, 0, 1, 1], [], []>} : vector<8x192xbf16>, vector<192x128xbf16>, vector<8x128xf32> -> vector<8x128xf32>
    %c0_19 = arith.constant 0 : index
    %c0_20 = arith.constant 0 : index
    %88 = vector.load %arg7[%c0_19, %c0_20] : memref<1x128xf32, #tpu.memory_space<vmem>>, vector<1x128xf32>
    %89 = vector.broadcast %88 : vector<1x128xf32> to vector<8x128xf32>
    %90 = arith.addf %87, %89 : vector<8x128xf32>
    %cst_21 = arith.constant 0.000000e+00 : f32
    %91 = vector.broadcast %cst_21 : f32 to vector<8x128xf32>
    %92 = arith.maximumf %90, %91 : vector<8x128xf32>
    %93 = arith.truncf %92 : vector<8x128xf32> to vector<8x128xbf16>
    %cst_22 = arith.constant 0.000000e+00 : bf16
    %94 = vector.broadcast %cst_22 : bf16 to vector<1x128xbf16>
    %95 = tpu.concatenate %94, %93, %94 in 0 : vector<1x128xbf16>, vector<8x128xbf16>, vector<1x128xbf16> -> vector<10x128xbf16>
    %96 = vector.extract_strided_slice %95 {offsets = [0, 0], sizes = [8, 128], strides = [1, 1]} : vector<10x128xbf16> to vector<8x128xbf16>
    %97 = vector.extract_strided_slice %95 {offsets = [1, 0], sizes = [8, 128], strides = [1, 1]} : vector<10x128xbf16> to vector<8x128xbf16>
    %98 = vector.extract_strided_slice %95 {offsets = [2, 0], sizes = [8, 128], strides = [1, 1]} : vector<10x128xbf16> to vector<8x128xbf16>
    %99 = tpu.concatenate %96, %97, %98 in 1 : vector<8x128xbf16>, vector<8x128xbf16>, vector<8x128xbf16> -> vector<8x384xbf16>
    %c0_23 = arith.constant 0 : index
    %c0_24 = arith.constant 0 : index
    %100 = vector.load %arg8[%c0_23, %c0_24] : memref<384x128xbf16, #tpu.memory_space<vmem>>, vector<384x128xbf16>
    %cst_25 = arith.constant dense<0.000000e+00> : vector<8x128xf32>
    %101 = tpu.matmul %99, %100, %cst_25 {dimension_numbers = #tpu.dot_dimension_numbers<[1], [0], [0], [1], [0, 0, 1, 1], [], []>} : vector<8x384xbf16>, vector<384x128xbf16>, vector<8x128xf32> -> vector<8x128xf32>
    %c0_26 = arith.constant 0 : index
    %c0_27 = arith.constant 0 : index
    %102 = vector.load %arg9[%c0_26, %c0_27] : memref<1x128xf32, #tpu.memory_space<vmem>>, vector<1x128xf32>
    %103 = vector.broadcast %102 : vector<1x128xf32> to vector<8x128xf32>
    %104 = arith.addf %101, %103 : vector<8x128xf32>
    %cst_28 = arith.constant 0.000000e+00 : f32
    %105 = vector.broadcast %cst_28 : f32 to vector<8x128xf32>
    %106 = arith.maximumf %104, %105 : vector<8x128xf32>
    %107 = arith.truncf %106 : vector<8x128xf32> to vector<8x128xbf16>
    %108 = vector.extract_strided_slice %107 {offsets = [0, 0], sizes = [8, 16], strides = [1, 1]} : vector<8x128xbf16> to vector<8x16xbf16>
    %109 = vector.extract_strided_slice %107 {offsets = [0, 16], sizes = [8, 16], strides = [1, 1]} : vector<8x128xbf16> to vector<8x16xbf16>
    %110 = arith.maximumf %108, %109 : vector<8x16xbf16>
    %111 = vector.extract_strided_slice %107 {offsets = [0, 32], sizes = [8, 16], strides = [1, 1]} : vector<8x128xbf16> to vector<8x16xbf16>
    %112 = vector.extract_strided_slice %107 {offsets = [0, 48], sizes = [8, 16], strides = [1, 1]} : vector<8x128xbf16> to vector<8x16xbf16>
    %113 = arith.maximumf %111, %112 : vector<8x16xbf16>
    %114 = vector.extract_strided_slice %107 {offsets = [0, 64], sizes = [8, 16], strides = [1, 1]} : vector<8x128xbf16> to vector<8x16xbf16>
    %115 = vector.extract_strided_slice %107 {offsets = [0, 80], sizes = [8, 16], strides = [1, 1]} : vector<8x128xbf16> to vector<8x16xbf16>
    %116 = arith.maximumf %114, %115 : vector<8x16xbf16>
    %117 = vector.extract_strided_slice %107 {offsets = [0, 96], sizes = [8, 16], strides = [1, 1]} : vector<8x128xbf16> to vector<8x16xbf16>
    %118 = vector.extract_strided_slice %107 {offsets = [0, 112], sizes = [8, 16], strides = [1, 1]} : vector<8x128xbf16> to vector<8x16xbf16>
    %119 = arith.maximumf %117, %118 : vector<8x16xbf16>
    %120 = tpu.concatenate %110, %113, %116, %119 in 1 : vector<8x16xbf16>, vector<8x16xbf16>, vector<8x16xbf16>, vector<8x16xbf16> -> vector<8x64xbf16>
    %121 = vector.extract_strided_slice %120 {offsets = [0, 0], sizes = [1, 64], strides = [1, 1]} : vector<8x64xbf16> to vector<1x64xbf16>
    %122 = vector.extract_strided_slice %120 {offsets = [1, 0], sizes = [1, 64], strides = [1, 1]} : vector<8x64xbf16> to vector<1x64xbf16>
    %123 = arith.maximumf %121, %122 : vector<1x64xbf16>
    %124 = vector.extract_strided_slice %120 {offsets = [2, 0], sizes = [1, 64], strides = [1, 1]} : vector<8x64xbf16> to vector<1x64xbf16>
    %125 = vector.extract_strided_slice %120 {offsets = [3, 0], sizes = [1, 64], strides = [1, 1]} : vector<8x64xbf16> to vector<1x64xbf16>
    %126 = arith.maximumf %124, %125 : vector<1x64xbf16>
    %127 = vector.extract_strided_slice %120 {offsets = [4, 0], sizes = [1, 64], strides = [1, 1]} : vector<8x64xbf16> to vector<1x64xbf16>
    %128 = vector.extract_strided_slice %120 {offsets = [5, 0], sizes = [1, 64], strides = [1, 1]} : vector<8x64xbf16> to vector<1x64xbf16>
    %129 = arith.maximumf %127, %128 : vector<1x64xbf16>
    %130 = vector.extract_strided_slice %120 {offsets = [6, 0], sizes = [1, 64], strides = [1, 1]} : vector<8x64xbf16> to vector<1x64xbf16>
    %131 = vector.extract_strided_slice %120 {offsets = [7, 0], sizes = [1, 64], strides = [1, 1]} : vector<8x64xbf16> to vector<1x64xbf16>
    %132 = arith.maximumf %130, %131 : vector<1x64xbf16>
    %133 = tpu.concatenate %123, %126, %129, %132 in 0 : vector<1x64xbf16>, vector<1x64xbf16>, vector<1x64xbf16>, vector<1x64xbf16> -> vector<4x64xbf16>
    %cst_29 = arith.constant 0.000000e+00 : bf16
    %134 = vector.broadcast %cst_29 : bf16 to vector<1x64xbf16>
    %135 = tpu.concatenate %134, %133, %134 in 0 : vector<1x64xbf16>, vector<4x64xbf16>, vector<1x64xbf16> -> vector<6x64xbf16>
    %136 = vector.extract_strided_slice %135 {offsets = [0, 0], sizes = [4, 64], strides = [1, 1]} : vector<6x64xbf16> to vector<4x64xbf16>
    %137 = vector.extract_strided_slice %135 {offsets = [1, 0], sizes = [4, 64], strides = [1, 1]} : vector<6x64xbf16> to vector<4x64xbf16>
    %138 = vector.extract_strided_slice %135 {offsets = [2, 0], sizes = [4, 64], strides = [1, 1]} : vector<6x64xbf16> to vector<4x64xbf16>
    %139 = tpu.concatenate %136, %137, %138 in 1 : vector<4x64xbf16>, vector<4x64xbf16>, vector<4x64xbf16> -> vector<4x192xbf16>
    %c0_30 = arith.constant 0 : index
    %c0_31 = arith.constant 0 : index
    %140 = vector.load %arg10[%c0_30, %c0_31] : memref<192x128xbf16, #tpu.memory_space<vmem>>, vector<192x128xbf16>
    %cst_32 = arith.constant dense<0.000000e+00> : vector<4x128xf32>
    %141 = tpu.matmul %139, %140, %cst_32 {dimension_numbers = #tpu.dot_dimension_numbers<[1], [0], [0], [1], [0, 0, 1, 1], [], []>} : vector<4x192xbf16>, vector<192x128xbf16>, vector<4x128xf32> -> vector<4x128xf32>
    %c0_33 = arith.constant 0 : index
    %c0_34 = arith.constant 0 : index
    %142 = vector.load %arg11[%c0_33, %c0_34] : memref<1x128xf32, #tpu.memory_space<vmem>>, vector<1x128xf32>
    %143 = vector.broadcast %142 : vector<1x128xf32> to vector<4x128xf32>
    %144 = arith.addf %141, %143 : vector<4x128xf32>
    %cst_35 = arith.constant 0.000000e+00 : f32
    %145 = vector.broadcast %cst_35 : f32 to vector<4x128xf32>
    %146 = arith.maximumf %144, %145 : vector<4x128xf32>
    %147 = arith.truncf %146 : vector<4x128xf32> to vector<4x128xbf16>
    %cst_36 = arith.constant 0.000000e+00 : bf16
    %148 = vector.broadcast %cst_36 : bf16 to vector<1x128xbf16>
    %149 = tpu.concatenate %148, %147, %148 in 0 : vector<1x128xbf16>, vector<4x128xbf16>, vector<1x128xbf16> -> vector<6x128xbf16>
    %150 = vector.extract_strided_slice %149 {offsets = [0, 0], sizes = [4, 128], strides = [1, 1]} : vector<6x128xbf16> to vector<4x128xbf16>
    %151 = vector.extract_strided_slice %149 {offsets = [1, 0], sizes = [4, 128], strides = [1, 1]} : vector<6x128xbf16> to vector<4x128xbf16>
    %152 = vector.extract_strided_slice %149 {offsets = [2, 0], sizes = [4, 128], strides = [1, 1]} : vector<6x128xbf16> to vector<4x128xbf16>
    %153 = tpu.concatenate %150, %151, %152 in 1 : vector<4x128xbf16>, vector<4x128xbf16>, vector<4x128xbf16> -> vector<4x384xbf16>
    %c0_37 = arith.constant 0 : index
    %c0_38 = arith.constant 0 : index
    %154 = vector.load %arg12[%c0_37, %c0_38] : memref<384x128xbf16, #tpu.memory_space<vmem>>, vector<384x128xbf16>
    %cst_39 = arith.constant dense<0.000000e+00> : vector<4x128xf32>
    %155 = tpu.matmul %153, %154, %cst_39 {dimension_numbers = #tpu.dot_dimension_numbers<[1], [0], [0], [1], [0, 0, 1, 1], [], []>} : vector<4x384xbf16>, vector<384x128xbf16>, vector<4x128xf32> -> vector<4x128xf32>
    %c0_40 = arith.constant 0 : index
    %c0_41 = arith.constant 0 : index
    %156 = vector.load %arg13[%c0_40, %c0_41] : memref<1x128xf32, #tpu.memory_space<vmem>>, vector<1x128xf32>
    %157 = vector.broadcast %156 : vector<1x128xf32> to vector<4x128xf32>
    %158 = arith.addf %155, %157 : vector<4x128xf32>
    %cst_42 = arith.constant 0.000000e+00 : f32
    %159 = vector.broadcast %cst_42 : f32 to vector<4x128xf32>
    %160 = arith.maximumf %158, %159 : vector<4x128xf32>
    %161 = arith.truncf %160 : vector<4x128xf32> to vector<4x128xbf16>
    %c0_43 = arith.constant 0 : index
    %c0_44 = arith.constant 0 : index
    %162 = vector.load %arg14[%c0_43, %c0_44] : memref<128x256xbf16, #tpu.memory_space<vmem>>, vector<128x256xbf16>
    %cst_45 = arith.constant dense<0.000000e+00> : vector<4x256xf32>
    %163 = tpu.matmul %161, %162, %cst_45 {dimension_numbers = #tpu.dot_dimension_numbers<[1], [0], [0], [1], [0, 0, 1, 1], [], []>} : vector<4x128xbf16>, vector<128x256xbf16>, vector<4x256xf32> -> vector<4x256xf32>
    %c0_46 = arith.constant 0 : index
    %c0_47 = arith.constant 0 : index
    %164 = vector.load %arg15[%c0_46, %c0_47] : memref<1x256xf32, #tpu.memory_space<vmem>>, vector<1x256xf32>
    %165 = vector.broadcast %164 : vector<1x256xf32> to vector<4x256xf32>
    %166 = arith.addf %163, %165 : vector<4x256xf32>
    %167 = vector.extract_strided_slice %166 {offsets = [0, 0], sizes = [1, 128], strides = [1, 1]} : vector<4x256xf32> to vector<1x128xf32>
    %168 = vector.extract_strided_slice %166 {offsets = [0, 128], sizes = [1, 128], strides = [1, 1]} : vector<4x256xf32> to vector<1x128xf32>
    %169 = vector.extract_strided_slice %166 {offsets = [1, 0], sizes = [1, 128], strides = [1, 1]} : vector<4x256xf32> to vector<1x128xf32>
    %170 = vector.extract_strided_slice %166 {offsets = [1, 128], sizes = [1, 128], strides = [1, 1]} : vector<4x256xf32> to vector<1x128xf32>
    %171 = vector.extract_strided_slice %166 {offsets = [2, 0], sizes = [1, 128], strides = [1, 1]} : vector<4x256xf32> to vector<1x128xf32>
    %172 = vector.extract_strided_slice %166 {offsets = [2, 128], sizes = [1, 128], strides = [1, 1]} : vector<4x256xf32> to vector<1x128xf32>
    %173 = vector.extract_strided_slice %166 {offsets = [3, 0], sizes = [1, 128], strides = [1, 1]} : vector<4x256xf32> to vector<1x128xf32>
    %174 = vector.extract_strided_slice %166 {offsets = [3, 128], sizes = [1, 128], strides = [1, 1]} : vector<4x256xf32> to vector<1x128xf32>
    %175 = tpu.concatenate %167, %168, %169, %170, %171, %172, %173, %174 in 0 : vector<1x128xf32>, vector<1x128xf32>, vector<1x128xf32>, vector<1x128xf32>, vector<1x128xf32>, vector<1x128xf32>, vector<1x128xf32>, vector<1x128xf32> -> vector<8x128xf32>
    %176 = arith.truncf %175 : vector<8x128xf32> to vector<8x128xbf16>
    %cst_48 = arith.constant 0.000000e+00 : bf16
    %177 = vector.broadcast %cst_48 : bf16 to vector<1x128xbf16>
    %178 = tpu.concatenate %177, %107, %177 in 0 : vector<1x128xbf16>, vector<8x128xbf16>, vector<1x128xbf16> -> vector<10x128xbf16>
    %179 = vector.extract_strided_slice %178 {offsets = [0, 0], sizes = [8, 128], strides = [1, 1]} : vector<10x128xbf16> to vector<8x128xbf16>
    %180 = vector.extract_strided_slice %178 {offsets = [1, 0], sizes = [8, 128], strides = [1, 1]} : vector<10x128xbf16> to vector<8x128xbf16>
    %181 = vector.extract_strided_slice %178 {offsets = [2, 0], sizes = [8, 128], strides = [1, 1]} : vector<10x128xbf16> to vector<8x128xbf16>
    %cst_49 = arith.constant 0.000000e+00 : bf16
    %182 = vector.broadcast %cst_49 : bf16 to vector<1x128xbf16>
    %183 = tpu.concatenate %182, %176, %182 in 0 : vector<1x128xbf16>, vector<8x128xbf16>, vector<1x128xbf16> -> vector<10x128xbf16>
    %184 = vector.extract_strided_slice %183 {offsets = [0, 0], sizes = [8, 128], strides = [1, 1]} : vector<10x128xbf16> to vector<8x128xbf16>
    %185 = vector.extract_strided_slice %183 {offsets = [1, 0], sizes = [8, 128], strides = [1, 1]} : vector<10x128xbf16> to vector<8x128xbf16>
    %186 = vector.extract_strided_slice %183 {offsets = [2, 0], sizes = [8, 128], strides = [1, 1]} : vector<10x128xbf16> to vector<8x128xbf16>
    %187 = tpu.concatenate %179, %180, %181, %184, %185, %186 in 1 : vector<8x128xbf16>, vector<8x128xbf16>, vector<8x128xbf16>, vector<8x128xbf16>, vector<8x128xbf16>, vector<8x128xbf16> -> vector<8x768xbf16>
    %c0_50 = arith.constant 0 : index
    %c0_51 = arith.constant 0 : index
    %188 = vector.load %arg16[%c0_50, %c0_51] : memref<768x128xbf16, #tpu.memory_space<vmem>>, vector<768x128xbf16>
    %cst_52 = arith.constant dense<0.000000e+00> : vector<8x128xf32>
    %189 = tpu.matmul %187, %188, %cst_52 {dimension_numbers = #tpu.dot_dimension_numbers<[1], [0], [0], [1], [0, 0, 1, 1], [], []>} : vector<8x768xbf16>, vector<768x128xbf16>, vector<8x128xf32> -> vector<8x128xf32>
    %c0_53 = arith.constant 0 : index
    %c0_54 = arith.constant 0 : index
    %190 = vector.load %arg17[%c0_53, %c0_54] : memref<1x128xf32, #tpu.memory_space<vmem>>, vector<1x128xf32>
    %191 = vector.broadcast %190 : vector<1x128xf32> to vector<8x128xf32>
    %192 = arith.addf %189, %191 : vector<8x128xf32>
    %cst_55 = arith.constant 0.000000e+00 : f32
    %193 = vector.broadcast %cst_55 : f32 to vector<8x128xf32>
    %194 = arith.maximumf %192, %193 : vector<8x128xf32>
    %195 = arith.truncf %194 : vector<8x128xf32> to vector<8x128xbf16>
    %cst_56 = arith.constant 0.000000e+00 : bf16
    %196 = vector.broadcast %cst_56 : bf16 to vector<1x128xbf16>
    %197 = tpu.concatenate %196, %195, %196 in 0 : vector<1x128xbf16>, vector<8x128xbf16>, vector<1x128xbf16> -> vector<10x128xbf16>
    %198 = vector.extract_strided_slice %197 {offsets = [0, 0], sizes = [8, 128], strides = [1, 1]} : vector<10x128xbf16> to vector<8x128xbf16>
    %199 = vector.extract_strided_slice %197 {offsets = [1, 0], sizes = [8, 128], strides = [1, 1]} : vector<10x128xbf16> to vector<8x128xbf16>
    %200 = vector.extract_strided_slice %197 {offsets = [2, 0], sizes = [8, 128], strides = [1, 1]} : vector<10x128xbf16> to vector<8x128xbf16>
    %201 = tpu.concatenate %198, %199, %200 in 1 : vector<8x128xbf16>, vector<8x128xbf16>, vector<8x128xbf16> -> vector<8x384xbf16>
    %c0_57 = arith.constant 0 : index
    %c0_58 = arith.constant 0 : index
    %202 = vector.load %arg18[%c0_57, %c0_58] : memref<384x128xbf16, #tpu.memory_space<vmem>>, vector<384x128xbf16>
    %cst_59 = arith.constant dense<0.000000e+00> : vector<8x128xf32>
    %203 = tpu.matmul %201, %202, %cst_59 {dimension_numbers = #tpu.dot_dimension_numbers<[1], [0], [0], [1], [0, 0, 1, 1], [], []>} : vector<8x384xbf16>, vector<384x128xbf16>, vector<8x128xf32> -> vector<8x128xf32>
    %c0_60 = arith.constant 0 : index
    %c0_61 = arith.constant 0 : index
    %204 = vector.load %arg19[%c0_60, %c0_61] : memref<1x128xf32, #tpu.memory_space<vmem>>, vector<1x128xf32>
    %205 = vector.broadcast %204 : vector<1x128xf32> to vector<8x128xf32>
    %206 = arith.addf %203, %205 : vector<8x128xf32>
    %cst_62 = arith.constant 0.000000e+00 : f32
    %207 = vector.broadcast %cst_62 : f32 to vector<8x128xf32>
    %208 = arith.maximumf %206, %207 : vector<8x128xf32>
    %209 = arith.truncf %208 : vector<8x128xf32> to vector<8x128xbf16>
    %c0_63 = arith.constant 0 : index
    %c0_64 = arith.constant 0 : index
    %210 = vector.load %arg20[%c0_63, %c0_64] : memref<128x256xbf16, #tpu.memory_space<vmem>>, vector<128x256xbf16>
    %cst_65 = arith.constant dense<0.000000e+00> : vector<8x256xf32>
    %211 = tpu.matmul %209, %210, %cst_65 {dimension_numbers = #tpu.dot_dimension_numbers<[1], [0], [0], [1], [0, 0, 1, 1], [], []>} : vector<8x128xbf16>, vector<128x256xbf16>, vector<8x256xf32> -> vector<8x256xf32>
    %c0_66 = arith.constant 0 : index
    %c0_67 = arith.constant 0 : index
    %212 = vector.load %arg21[%c0_66, %c0_67] : memref<1x256xf32, #tpu.memory_space<vmem>>, vector<1x256xf32>
    %213 = vector.broadcast %212 : vector<1x256xf32> to vector<8x256xf32>
    %214 = arith.addf %211, %213 : vector<8x256xf32>
    %215 = vector.extract_strided_slice %214 {offsets = [0, 0], sizes = [1, 128], strides = [1, 1]} : vector<8x256xf32> to vector<1x128xf32>
    %216 = vector.extract_strided_slice %214 {offsets = [0, 128], sizes = [1, 128], strides = [1, 1]} : vector<8x256xf32> to vector<1x128xf32>
    %217 = vector.extract_strided_slice %214 {offsets = [1, 0], sizes = [1, 128], strides = [1, 1]} : vector<8x256xf32> to vector<1x128xf32>
    %218 = vector.extract_strided_slice %214 {offsets = [1, 128], sizes = [1, 128], strides = [1, 1]} : vector<8x256xf32> to vector<1x128xf32>
    %219 = vector.extract_strided_slice %214 {offsets = [2, 0], sizes = [1, 128], strides = [1, 1]} : vector<8x256xf32> to vector<1x128xf32>
    %220 = vector.extract_strided_slice %214 {offsets = [2, 128], sizes = [1, 128], strides = [1, 1]} : vector<8x256xf32> to vector<1x128xf32>
    %221 = vector.extract_strided_slice %214 {offsets = [3, 0], sizes = [1, 128], strides = [1, 1]} : vector<8x256xf32> to vector<1x128xf32>
    %222 = vector.extract_strided_slice %214 {offsets = [3, 128], sizes = [1, 128], strides = [1, 1]} : vector<8x256xf32> to vector<1x128xf32>
    %223 = vector.extract_strided_slice %214 {offsets = [4, 0], sizes = [1, 128], strides = [1, 1]} : vector<8x256xf32> to vector<1x128xf32>
    %224 = vector.extract_strided_slice %214 {offsets = [4, 128], sizes = [1, 128], strides = [1, 1]} : vector<8x256xf32> to vector<1x128xf32>
    %225 = vector.extract_strided_slice %214 {offsets = [5, 0], sizes = [1, 128], strides = [1, 1]} : vector<8x256xf32> to vector<1x128xf32>
    %226 = vector.extract_strided_slice %214 {offsets = [5, 128], sizes = [1, 128], strides = [1, 1]} : vector<8x256xf32> to vector<1x128xf32>
    %227 = vector.extract_strided_slice %214 {offsets = [6, 0], sizes = [1, 128], strides = [1, 1]} : vector<8x256xf32> to vector<1x128xf32>
    %228 = vector.extract_strided_slice %214 {offsets = [6, 128], sizes = [1, 128], strides = [1, 1]} : vector<8x256xf32> to vector<1x128xf32>
    %229 = vector.extract_strided_slice %214 {offsets = [7, 0], sizes = [1, 128], strides = [1, 1]} : vector<8x256xf32> to vector<1x128xf32>
    %230 = vector.extract_strided_slice %214 {offsets = [7, 128], sizes = [1, 128], strides = [1, 1]} : vector<8x256xf32> to vector<1x128xf32>
    %231 = tpu.concatenate %215, %216, %217, %218, %219, %220, %221, %222, %223, %224, %225, %226, %227, %228, %229, %230 in 0 : vector<1x128xf32>, vector<1x128xf32>, vector<1x128xf32>, vector<1x128xf32>, vector<1x128xf32>, vector<1x128xf32>, vector<1x128xf32>, vector<1x128xf32>, vector<1x128xf32>, vector<1x128xf32>, vector<1x128xf32>, vector<1x128xf32>, vector<1x128xf32>, vector<1x128xf32>, vector<1x128xf32>, vector<1x128xf32> -> vector<16x128xf32>
    %232 = arith.truncf %231 : vector<16x128xf32> to vector<16x128xbf16>
    %cst_68 = arith.constant 0.000000e+00 : bf16
    %233 = vector.broadcast %cst_68 : bf16 to vector<1x128xbf16>
    %234 = tpu.concatenate %233, %29, %233 in 0 : vector<1x128xbf16>, vector<16x128xbf16>, vector<1x128xbf16> -> vector<18x128xbf16>
    %235 = vector.extract_strided_slice %234 {offsets = [0, 0], sizes = [16, 128], strides = [1, 1]} : vector<18x128xbf16> to vector<16x128xbf16>
    %236 = vector.extract_strided_slice %234 {offsets = [1, 0], sizes = [16, 128], strides = [1, 1]} : vector<18x128xbf16> to vector<16x128xbf16>
    %237 = vector.extract_strided_slice %234 {offsets = [2, 0], sizes = [16, 128], strides = [1, 1]} : vector<18x128xbf16> to vector<16x128xbf16>
    %cst_69 = arith.constant 0.000000e+00 : bf16
    %238 = vector.broadcast %cst_69 : bf16 to vector<1x128xbf16>
    %239 = tpu.concatenate %238, %232, %238 in 0 : vector<1x128xbf16>, vector<16x128xbf16>, vector<1x128xbf16> -> vector<18x128xbf16>
    %240 = vector.extract_strided_slice %239 {offsets = [0, 0], sizes = [16, 128], strides = [1, 1]} : vector<18x128xbf16> to vector<16x128xbf16>
    %241 = vector.extract_strided_slice %239 {offsets = [1, 0], sizes = [16, 128], strides = [1, 1]} : vector<18x128xbf16> to vector<16x128xbf16>
    %242 = vector.extract_strided_slice %239 {offsets = [2, 0], sizes = [16, 128], strides = [1, 1]} : vector<18x128xbf16> to vector<16x128xbf16>
    %243 = tpu.concatenate %235, %236, %237, %240, %241, %242 in 1 : vector<16x128xbf16>, vector<16x128xbf16>, vector<16x128xbf16>, vector<16x128xbf16>, vector<16x128xbf16>, vector<16x128xbf16> -> vector<16x768xbf16>
    %c0_70 = arith.constant 0 : index
    %c0_71 = arith.constant 0 : index
    %244 = vector.load %arg22[%c0_70, %c0_71] : memref<768x128xbf16, #tpu.memory_space<vmem>>, vector<768x128xbf16>
    %cst_72 = arith.constant dense<0.000000e+00> : vector<16x128xf32>
    %245 = tpu.matmul %243, %244, %cst_72 {dimension_numbers = #tpu.dot_dimension_numbers<[1], [0], [0], [1], [0, 0, 1, 1], [], []>} : vector<16x768xbf16>, vector<768x128xbf16>, vector<16x128xf32> -> vector<16x128xf32>
    %c0_73 = arith.constant 0 : index
    %c0_74 = arith.constant 0 : index
    %246 = vector.load %arg23[%c0_73, %c0_74] : memref<1x128xf32, #tpu.memory_space<vmem>>, vector<1x128xf32>
    %247 = vector.broadcast %246 : vector<1x128xf32> to vector<16x128xf32>
    %248 = arith.addf %245, %247 : vector<16x128xf32>
    %cst_75 = arith.constant 0.000000e+00 : f32
    %249 = vector.broadcast %cst_75 : f32 to vector<16x128xf32>
    %250 = arith.maximumf %248, %249 : vector<16x128xf32>
    %251 = arith.truncf %250 : vector<16x128xf32> to vector<16x128xbf16>
    %cst_76 = arith.constant 0.000000e+00 : bf16
    %252 = vector.broadcast %cst_76 : bf16 to vector<1x128xbf16>
    %253 = tpu.concatenate %252, %251, %252 in 0 : vector<1x128xbf16>, vector<16x128xbf16>, vector<1x128xbf16> -> vector<18x128xbf16>
    %254 = vector.extract_strided_slice %253 {offsets = [0, 0], sizes = [16, 128], strides = [1, 1]} : vector<18x128xbf16> to vector<16x128xbf16>
    %255 = vector.extract_strided_slice %253 {offsets = [1, 0], sizes = [16, 128], strides = [1, 1]} : vector<18x128xbf16> to vector<16x128xbf16>
    %256 = vector.extract_strided_slice %253 {offsets = [2, 0], sizes = [16, 128], strides = [1, 1]} : vector<18x128xbf16> to vector<16x128xbf16>
    %257 = tpu.concatenate %254, %255, %256 in 1 : vector<16x128xbf16>, vector<16x128xbf16>, vector<16x128xbf16> -> vector<16x384xbf16>
    %c0_77 = arith.constant 0 : index
    %c0_78 = arith.constant 0 : index
    %258 = vector.load %arg24[%c0_77, %c0_78] : memref<384x128xbf16, #tpu.memory_space<vmem>>, vector<384x128xbf16>
    %cst_79 = arith.constant dense<0.000000e+00> : vector<16x128xf32>
    %259 = tpu.matmul %257, %258, %cst_79 {dimension_numbers = #tpu.dot_dimension_numbers<[1], [0], [0], [1], [0, 0, 1, 1], [], []>} : vector<16x384xbf16>, vector<384x128xbf16>, vector<16x128xf32> -> vector<16x128xf32>
    %c0_80 = arith.constant 0 : index
    %c0_81 = arith.constant 0 : index
    %260 = vector.load %arg25[%c0_80, %c0_81] : memref<1x128xf32, #tpu.memory_space<vmem>>, vector<1x128xf32>
    %261 = vector.broadcast %260 : vector<1x128xf32> to vector<16x128xf32>
    %262 = arith.addf %259, %261 : vector<16x128xf32>
    %cst_82 = arith.constant 0.000000e+00 : f32
    %263 = vector.broadcast %cst_82 : f32 to vector<16x128xf32>
    %264 = arith.maximumf %262, %263 : vector<16x128xf32>
    %265 = arith.truncf %264 : vector<16x128xf32> to vector<16x128xbf16>
    %c0_83 = arith.constant 0 : index
    %c0_84 = arith.constant 0 : index
    %266 = vector.load %arg26[%c0_83, %c0_84] : memref<128x48xbf16, #tpu.memory_space<vmem>>, vector<128x48xbf16>
    %cst_85 = arith.constant dense<0.000000e+00> : vector<16x48xf32>
    %267 = tpu.matmul %265, %266, %cst_85 {dimension_numbers = #tpu.dot_dimension_numbers<[1], [0], [0], [1], [0, 0, 1, 1], [], []>} : vector<16x128xbf16>, vector<128x48xbf16>, vector<16x48xf32> -> vector<16x48xf32>
    %c0_86 = arith.constant 0 : index
    %c0_87 = arith.constant 0 : index
    %268 = vector.load %arg27[%c0_86, %c0_87] : memref<1x48xf32, #tpu.memory_space<vmem>>, vector<1x48xf32>
    %269 = vector.broadcast %268 : vector<1x48xf32> to vector<16x48xf32>
    %270 = arith.addf %267, %269 : vector<16x48xf32>
    %c0_88 = arith.constant 0 : index
    %c0_89 = arith.constant 0 : index
    %c0_90 = arith.constant 0 : index
    %271 = vector.load %arg28[%c0_88, %c0_89, %c0_90] : memref<1x16x48xf32, #tpu.memory_space<vmem>>, vector<1x16x48xf32>
    %272 = vector.shape_cast %271 : vector<1x16x48xf32> to vector<16x48xf32>
    %273 = vector.shape_cast %270 : vector<16x48xf32> to vector<1x16x48xf32>
    tpu.vector_store %arg28[%c0_88, %c0_89, %c0_90], %273 {strides = array<i32>} : memref<1x16x48xf32, #tpu.memory_space<vmem>>, vector<1x16x48xf32>,
    return
  }
  func.func @transform_0(%arg0: i32) -> (i32, i32, i32) {
    %c0_i32 = arith.constant 0 : i32
    %c0_i32_0 = arith.constant 0 : i32
    %c0_i32_1 = arith.constant 0 : i32
    return %arg0, %c0_i32, %c0_i32_0 : i32, i32, i32
  }
  func.func @transform_1(%arg0: i32) -> (i32, i32) {
    %c0_i32 = arith.constant 0 : i32
    %c0_i32_0 = arith.constant 0 : i32
    %c0_i32_1 = arith.constant 0 : i32
    return %c0_i32, %c0_i32_0 : i32, i32
  }
  func.func @transform_2(%arg0: i32) -> (i32, i32) {
    %c0_i32 = arith.constant 0 : i32
    %c0_i32_0 = arith.constant 0 : i32
    %c0_i32_1 = arith.constant 0 : i32
    return %c0_i32, %c0_i32_0 : i32, i32
  }
  func.func @transform_3(%arg0: i32) -> (i32, i32) {
    %c0_i32 = arith.constant 0 : i32
    %c0_i32_0 = arith.constant 0 : i32
    %c0_i32_1 = arith.constant 0 : i32
    return %c0_i32, %c0_i32_0 : i32, i32
  }
  func.func @transform_4(%arg0: i32) -> (i32, i32) {
    %c0_i32 = arith.constant 0 : i32
    %c0_i32_0 = arith.constant 0 : i32
    %c0_i32_1 = arith.constant 0 : i32
    return %c0_i32, %c0_i32_0 : i32, i32
  }
  func.func @transform_5(%arg0: i32) -> (i32, i32) {
    %c0_i32 = arith.constant 0 : i32
    %c0_i32_0 = arith.constant 0 : i32
    %c0_i32_1 = arith.constant 0 : i32
    return %c0_i32, %c0_i32_0 : i32, i32
  }
  func.func @transform_6(%arg0: i32) -> (i32, i32) {
    %c0_i32 = arith.constant 0 : i32
    %c0_i32_0 = arith.constant 0 : i32
    %c0_i32_1 = arith.constant 0 : i32
    return %c0_i32, %c0_i32_0 : i32, i32
  }
  func.func @transform_7(%arg0: i32) -> (i32, i32) {
    %c0_i32 = arith.constant 0 : i32
    %c0_i32_0 = arith.constant 0 : i32
    %c0_i32_1 = arith.constant 0 : i32
    return %c0_i32, %c0_i32_0 : i32, i32
  }
  func.func @transform_8(%arg0: i32) -> (i32, i32) {
    %c0_i32 = arith.constant 0 : i32
    %c0_i32_0 = arith.constant 0 : i32
    %c0_i32_1 = arith.constant 0 : i32
    return %c0_i32, %c0_i32_0 : i32, i32
  }
  func.func @transform_9(%arg0: i32) -> (i32, i32) {
    %c0_i32 = arith.constant 0 : i32
    %c0_i32_0 = arith.constant 0 : i32
    %c0_i32_1 = arith.constant 0 : i32
    return %c0_i32, %c0_i32_0 : i32, i32
  }
  func.func @transform_10(%arg0: i32) -> (i32, i32) {
    %c0_i32 = arith.constant 0 : i32
    %c0_i32_0 = arith.constant 0 : i32
    %c0_i32_1 = arith.constant 0 : i32
    return %c0_i32, %c0_i32_0 : i32, i32
  }
  func.func @transform_11(%arg0: i32) -> (i32, i32) {
    %c0_i32 = arith.constant 0 : i32
    %c0_i32_0 = arith.constant 0 : i32
    %c0_i32_1 = arith.constant 0 : i32
    return %c0_i32, %c0_i32_0 : i32, i32
  }
  func.func @transform_12(%arg0: i32) -> (i32, i32) {
    %c0_i32 = arith.constant 0 : i32
    %c0_i32_0 = arith.constant 0 : i32
    %c0_i32_1 = arith.constant 0 : i32
    return %c0_i32, %c0_i32_0 : i32, i32
  }
  func.func @transform_13(%arg0: i32) -> (i32, i32) {
    %c0_i32 = arith.constant 0 : i32
    %c0_i32_0 = arith.constant 0 : i32
    %c0_i32_1 = arith.constant 0 : i32
    return %c0_i32, %c0_i32_0 : i32, i32
  }
  func.func @transform_14(%arg0: i32) -> (i32, i32) {
    %c0_i32 = arith.constant 0 : i32
    %c0_i32_0 = arith.constant 0 : i32
    %c0_i32_1 = arith.constant 0 : i32
    return %c0_i32, %c0_i32_0 : i32, i32
  }
  func.func @transform_15(%arg0: i32) -> (i32, i32) {
    %c0_i32 = arith.constant 0 : i32
    %c0_i32_0 = arith.constant 0 : i32
    %c0_i32_1 = arith.constant 0 : i32
    return %c0_i32, %c0_i32_0 : i32, i32
  }
  func.func @transform_16(%arg0: i32) -> (i32, i32) {
    %c0_i32 = arith.constant 0 : i32
    %c0_i32_0 = arith.constant 0 : i32
    %c0_i32_1 = arith.constant 0 : i32
    return %c0_i32, %c0_i32_0 : i32, i32
  }
  func.func @transform_17(%arg0: i32) -> (i32, i32) {
    %c0_i32 = arith.constant 0 : i32
    %c0_i32_0 = arith.constant 0 : i32
    %c0_i32_1 = arith.constant 0 : i32
    return %c0_i32, %c0_i32_0 : i32, i32
  }
  func.func @transform_18(%arg0: i32) -> (i32, i32) {
    %c0_i32 = arith.constant 0 : i32
    %c0_i32_0 = arith.constant 0 : i32
    %c0_i32_1 = arith.constant 0 : i32
    return %c0_i32, %c0_i32_0 : i32, i32
  }
  func.func @transform_19(%arg0: i32) -> (i32, i32) {
    %c0_i32 = arith.constant 0 : i32
    %c0_i32_0 = arith.constant 0 : i32
    %c0_i32_1 = arith.constant 0 : i32
    return %c0_i32, %c0_i32_0 : i32, i32
  }
  func.func @transform_20(%arg0: i32) -> (i32, i32) {
    %c0_i32 = arith.constant 0 : i32
    %c0_i32_0 = arith.constant 0 : i32
    %c0_i32_1 = arith.constant 0 : i32
    return %c0_i32, %c0_i32_0 : i32, i32
  }
  func.func @transform_21(%arg0: i32) -> (i32, i32) {
    %c0_i32 = arith.constant 0 : i32
    %c0_i32_0 = arith.constant 0 : i32
    %c0_i32_1 = arith.constant 0 : i32
    return %c0_i32, %c0_i32_0 : i32, i32
  }
  func.func @transform_22(%arg0: i32) -> (i32, i32) {
    %c0_i32 = arith.constant 0 : i32
    %c0_i32_0 = arith.constant 0 : i32
    %c0_i32_1 = arith.constant 0 : i32
    return %c0_i32, %c0_i32_0 : i32, i32
  }
  func.func @transform_23(%arg0: i32) -> (i32, i32) {
    %c0_i32 = arith.constant 0 : i32
    %c0_i32_0 = arith.constant 0 : i32
    %c0_i32_1 = arith.constant 0 : i32
    return %c0_i32, %c0_i32_0 : i32, i32
  }
  func.func @transform_24(%arg0: i32) -> (i32, i32) {
    %c0_i32 = arith.constant 0 : i32
    %c0_i32_0 = arith.constant 0 : i32
    %c0_i32_1 = arith.constant 0 : i32
    return %c0_i32, %c0_i32_0 : i32, i32
  }
  func.func @transform_25(%arg0: i32) -> (i32, i32) {
    %c0_i32 = arith.constant 0 : i32
    %c0_i32_0 = arith.constant 0 : i32
    %c0_i32_1 = arith.constant 0 : i32
    return %c0_i32, %c0_i32_0 : i32, i32
  }
  func.func @transform_26(%arg0: i32) -> (i32, i32) {
    %c0_i32 = arith.constant 0 : i32
    %c0_i32_0 = arith.constant 0 : i32
    %c0_i32_1 = arith.constant 0 : i32
    return %c0_i32, %c0_i32_0 : i32, i32
  }
  func.func @transform_27(%arg0: i32) -> (i32, i32, i32) {
    %c0_i32 = arith.constant 0 : i32
    %c0_i32_0 = arith.constant 0 : i32
    %c0_i32_1 = arith.constant 0 : i32
    return %arg0, %c0_i32, %c0_i32_0 : i32, i32, i32
  }
}

</mosaic_0001>

<bundles_post_ra>
// kernel: unet_forward.1
= control target key start
LH: loop header
LB: loop body
LE: loop exit
PB: predicated region body
PF: predicated region fallthrough
CT: control target
= control target key end

     0   :  { %s7720_s0 = inlined_call_operand.vmem [shape: bf16[2,16,64], index: 0, kind: input, shape index: {}]   ;;  %s7721_s1 = inlined_call_operand.hbm [shape: bf16[192,128], index: 1, kind: input, shape index: {}]   ;;  %s7722_s2 = inlined_call_operand.vmem [shape: f32[1,128], index: 2, kind: input, shape index: {}]   ;;  %s7723_s3 = inlined_call_operand.hbm [shape: bf16[384,128], index: 3, kind: input, shape index: {}]   ;;  %s7724_s4 = inlined_call_operand.hbm [shape: f32[1,128], index: 4, kind: input, shape index: {}]   ;;  %s7725_s5 = inlined_call_operand.hbm [shape: bf16[192,128], index: 5, kind: input, shape index: {}]   ;;  %s7726_s6 = inlined_call_operand.hbm [shape: f32[1,128], index: 6, kind: input, shape index: {}]   ;;  %s7727_s7 = inlined_call_operand.hbm [shape: bf16[384,128], index: 7, kind: input, shape index: {}]   ;;  %s7728_s8 = inlined_call_operand.hbm [shape: f32[1,128], index: 8, kind: input, shape index: {}]   ;;  %s7729_s9 = inlined_call_operand.hbm [shape: bf16[192,128], index: 9, kind: input, shape index: {}]   ;;  %s7730_s10 = inlined_call_operand.hbm [shape: f32[1,128], index: 10, kind: input, shape index: {}]   ;;  %s7731_s11 = inlined_call_operand.hbm [shape: bf16[384,128], index: 11, kind: input, shape index: {}]   ;;  %s7732_s12 = inlined_call_operand.hbm [shape: f32[1,128], index: 12, kind: input, shape index: {}]   ;;  %s7733_s13 = inlined_call_operand.vmem [shape: bf16[128,256], index: 13, kind: input, shape index: {}]   ;;  %s7734_s14 = inlined_call_operand.vmem [shape: f32[1,256], index: 14, kind: input, shape index: {}]   ;;  %s7735_s15 = inlined_call_operand.vmem [shape: bf16[768,128], index: 15, kind: input, shape index: {}]   ;;  %s7736_s16 = inlined_call_operand.hbm [shape: f32[1,128], index: 16, kind: input, shape index: {}]   ;;  %s7737_s17 = inlined_call_operand.hbm [shape: bf16[384,128], index: 17, kind: input, shape index: {}]   ;;  %s7738_s18 = inlined_call_operand.vmem [shape: f32[1,128], index: 18, kind: input, shape index: {}]   ;;  %s7739_s19 = inlined_call_operand.hbm [shape: bf16[128,256], index: 19, kind: input, shape index: {}]   ;;  %s7740_s20 = inlined_call_operand.vmem [shape: f32[1,256], index: 20, kind: input, shape index: {}]   ;;  %s7741_s21 = inlined_call_operand.hbm [shape: bf16[768,128], index: 21, kind: input, shape index: {}]   ;;  %s7742_s22 = inlined_call_operand.vmem [shape: f32[1,128], index: 22, kind: input, shape index: {}]   ;;  %s7743_s23 = inlined_call_operand.hbm [shape: bf16[384,128], index: 23, kind: input, shape index: {}]   ;;  %s7744_s24 = inlined_call_operand.vmem [shape: f32[1,128], index: 24, kind: input, shape index: {}]   ;;  %s7745_s25 = inlined_call_operand.vmem [shape: bf16[128,48], index: 25, kind: input, shape index: {}]   ;;  %s7746_s26 = inlined_call_operand.vmem [shape: f32[1,48], index: 26, kind: input, shape index: {}]   ;;  %s7747_s27 = inlined_call_operand.vmem [shape: f32[2,16,48], index: 27, kind: output, shape index: {}]  }
   0x1   :  { %7758 = sst [smem:[#allocation37_spill]] %s7720_s0 }
   0x2   :  { %7759 = sst [smem:[#allocation38_spill]] %s7721_s1 }
   0x3   :  { %7760 = sst [smem:[#allocation39_spill]] %s7722_s2 }
   0x4   :  { %7761 = sst [smem:[#allocation40_spill]] %s7723_s3 }
   0x5   :  { %7762 = sst [smem:[#allocation41_spill]] %s7724_s4 }
   0x6   :  { %7763 = sst [smem:[#allocation42_spill]] %s7725_s5 }
   0x7   :  { %7764 = sst [smem:[#allocation43_spill]] %s7726_s6 }
   0x8   :  { %7765 = sst [smem:[#allocation44_spill]] %s7727_s7 }
   0x9   :  { %7766 = sst [smem:[#allocation45_spill]] %s7728_s8 }
   0xa   :  { %7767 = sst [smem:[#allocation46_spill]] %s7729_s9 }
   0xb   :  { %7768 = sst [smem:[#allocation47_spill]] %s7730_s10 }
   0xc   :  { %7769 = sst [smem:[#allocation48_spill]] %s7731_s11 }
   0xd   :  { %7770 = sst [smem:[#allocation49_spill]] %s7747_s27 }
   0xe   :  { %32 = vsyncpa [#allocation3], 0 }
   0xf   :  { %33 = vsyncpa [#allocation5], 0 }
  0x10   :  { %34 = vsyncpa [#allocation8], 0 }
  0x11   :  { %35 = vsyncpa [#allocation11], 0 }
  0x12   :  { %36 = vsyncpa [#allocation14], 0 }
  0x13   :  { %37 = vsyncpa [#allocation17], 0 }
  0x14   :  { %38 = vsyncpa [#allocation20], 0 }
  0x15   :  { %39 = vsyncpa [#allocation23], 0 }
  0x16   :  { %40 = vsyncpa [#allocation26], 0  ;;  %s6966_s7 = smov 0  }
  0x17 LB: > { %7771 = sst [smem:[#allocation36_spill]] %s6793_s7  ;;  %s6972_s4 = sadd.s32 4294967295, %s6793_s7   ;;  %s6793_s7 = sphi %s6966_s7, %s46_s7  }
  0x18   : > { %p5076_p0 = scmp.ge.s32.totalorder %s6793_s7, 1  ;;  %p649_p1 = scmp.lt.s32.totalorder %s6793_s7, 3 }
  0x19   : > { %p7753_p2 = scmp.eq.s32.totalorder %s6972_s4, 0  ;;  %s6795_s30 = smov [#allocation4]  }
  0x1a   : > { %p6977_p3 = pnand %p5076_p0, %p649_p1  ;;  %s677_s9 = sshll.u32 %s6795_s30, 4  ;;  %s678_s9 = int_to_ptr.vmem [resolvable:$true] %s677_s9 }
  0x1b   : > { %s6796_s5 = smov [#allocation7]   ;;  %s6797_s10 = smov [#allocation10]  }
  0x1c   : > { %s7772_s8 = scalar_select %p6977_p3, 1, 0 }
  0x1d   : > { %p5906_p4 = pneg %p6977_p3  ;;  %s701_s28 = sshll.u32 %s6796_s5, 4  ;;  %s6983_s28 = int_to_ptr.vmem [resolvable:$true] %s701_s28 }
  0x1e   : > { %s725_s29 = sshll.u32 %s6797_s10, 4  ;;  %s6798_s1 = smov [#allocation13]   ;;  %s6991_s29 = int_to_ptr.vmem [resolvable:$true] %s725_s29 }
  0x1f   : > { %p6987_p5 = pnand %p7753_p2, %p5906_p4  ;;  %s6993_s6 = sshll.u32 %s6798_s1, 4  ;;  %s750_s6 = int_to_ptr.vmem [resolvable:$true] %s6993_s6 }
  0x20   : > { %s6346_s2 = scalar_lea.vmem %s678_s9, 3072  ;;  %p6354_p10 = scmp.lt.s32.totalorder %s678_s9, %s678_s9 }
  0x21   : > { %p6997_p6 = pneg %p6987_p5  ;;  %p6347_p7 = scmp.ne.s32.totalorder %s678_s9, %s6346_s2 }
  0x22   : > { %p6355_p11 = scmp.lt.s32.totalorder %s6346_s2, %s6346_s2 }
  0x23   : > { %p6349_p8 = pnand %p6347_p7, %p6997_p6 }
  0x24   : > { %p6356_p12 = por %p6355_p11, %p6354_p10 }
  0x25   : > { %p6350_p9 = pneg %p6349_p8 }
  0x27   : > { %p6357_p13 = pnand %p6356_p12, %p6350_p9 }
  0x29   : > { %6360 = shalt.err (!%p6357_p13)
}
  0x2a   : > { %s7749_s3 = smov 64   ;;  %s7751_s30 = smov 4  }
  0x2b   : > { %s7775_s1 = sld [smem:[#allocation40_spill]]  ;;  %s6372_s7 = scalar_lea.vmem %s6983_s28, 1536 }
  0x2c   : > { %p6373_p0 = scmp.ne.s32.totalorder %s6983_s28, %s6372_s7  ;;  %p6380_p7 = scmp.lt.s32.totalorder %s6983_s28, %s6983_s28 }
  0x2d   : > { %p6381_p8 = scmp.lt.s32.totalorder %s6372_s7, %s6372_s7 }
  0x2e   : > { %p6375_p1 = pnand %p6373_p0, %p6997_p6 }
  0x2f   : > { %p6382_p9 = por %p6381_p8, %p6380_p7 }
  0x30   : > { %p6376_p4 = pneg %p6375_p1 }
  0x31   : > { %5912 = dma.hbm_to_vmem [thread:$0]  (!%p6987_p5), %s7775_s1, 3072, %s678_s9, [#allocation5], %s7749_s3, %s7749_s3, %s7751_s30  }
  0x32   : > { %p6383_p10 = pnand %p6382_p9, %p6376_p4 }
  0x34   : > { %6386 = shalt.err (!%p6383_p10)
}
  0x35   : > { %s7776_s9 = sld [smem:[#allocation42_spill]]  ;;  %s6398_s10 = scalar_lea.vmem %s6991_s29, 3072 }
  0x36   : > { %p6399_p11 = scmp.ne.s32.totalorder %s6991_s29, %s6398_s10  ;;  %p6406_p0 = scmp.lt.s32.totalorder %s6991_s29, %s6991_s29 }
  0x37   : > { %p6407_p1 = scmp.lt.s32.totalorder %s6398_s10, %s6398_s10 }
  0x38   : > { %p6401_p12 = pnand %p6399_p11, %p6997_p6 }
  0x39   : > { %p6408_p4 = por %p6407_p1, %p6406_p0 }
  0x3a   : > { %p6402_p13 = pneg %p6401_p12 }
  0x3b   : > { %5918 = dma.hbm_to_vmem [thread:$0]  (!%p6987_p5), %s7776_s9, 1536, %s6983_s28, [#allocation8], %s7749_s3, %s7749_s3, %s7751_s30  }
  0x3c   : > { %p6409_p7 = pnand %p6408_p4, %p6402_p13 }
  0x3e   : > { %6412 = shalt.err (!%p6409_p7)
}
  0x3f   : > { %s7777_s28 = sld [smem:[#allocation44_spill]]  ;;  %s6424_s2 = scalar_lea.vmem %s750_s6, 1536 }
  0x40   : > { %p6425_p8 = scmp.ne.s32.totalorder %s750_s6, %s6424_s2  ;;  %p6432_p11 = scmp.lt.s32.totalorder %s750_s6, %s750_s6 }
  0x41   : > { %p6433_p12 = scmp.lt.s32.totalorder %s6424_s2, %s6424_s2 }
  0x42   : > { %p6427_p9 = pnand %p6425_p8, %p6997_p6 }
  0x43   : > { %p6434_p13 = por %p6433_p12, %p6432_p11 }
  0x44   : > { %p6428_p10 = pneg %p6427_p9 }
  0x45   : > { %5924 = dma.hbm_to_vmem [thread:$0]  (!%p6987_p5), %s7777_s28, 3072, %s6991_s29, [#allocation11], %s7749_s3, %s7749_s3, %s7751_s30  }
  0x46   : > { %p6435_p0 = pnand %p6434_p13, %p6428_p10 }
  0x48   : > { %6438 = shalt.err (!%p6435_p0)
}
  0x49   : > { %s7778_s10 = sld [smem:[#allocation46_spill]]  ;;  %s6801_s29 = smov [#allocation16]  }
  0x4a   : > { %s773_s7 = sshll.u32 %s6801_s29, 4  ;;  %s6802_s1 = smov [#allocation19]   ;;  %s774_s7 = int_to_ptr.vmem [resolvable:$true] %s773_s7 }
  0x4b   : > { %s807_s28 = sshll.u32 %s6802_s1, 4  ;;  %s6450_s27 = scalar_lea.vmem %s774_s7, 3072  ;;  %s808_s28 = int_to_ptr.vmem [resolvable:$true] %s807_s28 }
  0x4c   : > { %p6451_p1 = scmp.ne.s32.totalorder %s774_s7, %s6450_s27  ;;  %p6458_p8 = scmp.lt.s32.totalorder %s774_s7, %s774_s7 }
  0x4d   : > { %p6459_p9 = scmp.lt.s32.totalorder %s6450_s27, %s6450_s27 }
  0x4e   : > { %p6453_p4 = pnand %p6451_p1, %p6997_p6 }
  0x4f   : > { %5930 = dma.hbm_to_vmem [thread:$0]  (!%p6987_p5), %s7778_s10, 1536, %s750_s6, [#allocation14], %s7749_s3, %s7749_s3, %s7751_s30  }
  0x50   : > { %p6454_p7 = pneg %p6453_p4  ;;  %p6460_p10 = por %p6459_p9, %p6458_p8 }
  0x52   : > { %p6461_p11 = pnand %p6460_p10, %p6454_p7 }
  0x54   : > { %6464 = shalt.err (!%p6461_p11)
}
  0x55   : > { %s7779_s5 = sld [smem:[#allocation48_spill]]  ;;  %s6476_s9 = scalar_lea.vmem %s808_s28, 16 }
  0x56   : > { %p6477_p12 = scmp.ne.s32.totalorder %s808_s28, %s6476_s9  ;;  %s6483_s27 = scalar_lea.vmem %s808_s28, 32 }
  0x57   : > { %p6484_p1 = scmp.lt.s32.totalorder %s808_s28, %s808_s28  ;;  %p6485_p4 = scmp.lt.s32.totalorder %s6483_s27, %s6476_s9 }
  0x58   : > { %p6479_p13 = pnand %p6477_p12, %p6997_p6 }
  0x59   : > { %p6486_p7 = por %p6485_p4, %p6484_p1 }
  0x5a   : > { %p6480_p0 = pneg %p6479_p13 }
  0x5b   : > { %5936 = dma.hbm_to_vmem [thread:$0]  (!%p6987_p5), %s7779_s5, 3072, %s774_s7, [#allocation17], %s7749_s3, %s7749_s3, %s7751_s30  }
  0x5c   : > { %p6487_p8 = pnand %p6486_p7, %p6480_p0 }
  0x5e   : > { %6490 = shalt.err (!%p6487_p8)
}
  0x5f   : > { %5942 = dma.hbm_to_vmem [thread:$0]  (!%p6987_p5), %s7736_s16, 16, %s808_s28, [#allocation20]  }
  0x60   : > { %s6803_s7 = smov [#allocation22]  }
  0x61   : > { %s833_s1 = sshll.u32 %s6803_s7, 4  ;;  %s834_s1 = int_to_ptr.vmem [resolvable:$true] %s833_s1 }
  0x62   : > { %s6502_s6 = scalar_lea.vmem %s834_s1, 2048  ;;  %p6510_p12 = scmp.lt.s32.totalorder %s834_s1, %s834_s1 }
  0x63   : > { %p6503_p9 = scmp.ne.s32.totalorder %s834_s1, %s6502_s6  ;;  %p6511_p13 = scmp.lt.s32.totalorder %s6502_s6, %s6502_s6 }
  0x65   : > { %p6505_p10 = pnand %p6503_p9, %p6997_p6  ;;  %p6512_p1 = por %p6511_p13, %p6510_p12 }
  0x67   : > { %p6506_p11 = pneg %p6505_p10 }
  0x69   : > { %p6513_p0 = pnand %p6512_p1, %p6506_p11 }
  0x6b   : > { %6516 = shalt.err (!%p6513_p0)
}
  0x6c   : > { %s6804_s2 = smov 128   ;;  %s6805_s5 = smov 8  }
  0x6d   : > { %5948 = dma.hbm_to_vmem [thread:$0]  (!%p6987_p5), %s7739_s19, 2048, %s834_s1, [#allocation23], %s6804_s2, %s6804_s2, %s6805_s5  }
  0x6e   : > { %s6806_s27 = smov [#allocation2]   ;;  %s6807_s29 = smov [#allocation6]  }
  0x6f   : > { %s661_s10 = sshll.u32 %s6806_s27, 4  ;;  %s691_s7 = sshll.u32 %s6807_s29, 4  ;;  %s662_s10 = int_to_ptr.vmem [resolvable:$true] %s661_s10  ;;  %s692_s7 = int_to_ptr.vmem [resolvable:$true] %s691_s7 }
  0x70   : > { %s6528_s3 = scalar_lea.vmem %s662_s10, 1536  ;;  %p6536_p9 = scmp.lt.s32.totalorder %s662_s10, %s662_s10 }
  0x71   : > { %p6529_p4 = scmp.ne.s32.totalorder %s662_s10, %s6528_s3  ;;  %p6537_p10 = scmp.lt.s32.totalorder %s6528_s3, %s6528_s3 }
  0x73   : > { %p6531_p7 = pnand %p6529_p4, %p6997_p6  ;;  %p6538_p11 = por %p6537_p10, %p6536_p9 }
  0x75   : > { %p6532_p8 = pneg %p6531_p7 }
  0x77   : > { %p6539_p12 = pnand %p6538_p11, %p6532_p8 }
  0x79   : > { %6542 = shalt.err (!%p6539_p12)
}
  0x7a   : > { %s7780_s1 = smov 64   ;;  %s7781_s5 = sld [smem:[#allocation38_spill]] }
  0x7b   : > { %s6554_s9 = scalar_lea.vmem %s692_s7, 16  ;;  %s6561_s28 = scalar_lea.vmem %s692_s7, 32 }
  0x7c   : > { %p6555_p13 = scmp.ne.s32.totalorder %s692_s7, %s6554_s9  ;;  %p6562_p4 = scmp.lt.s32.totalorder %s692_s7, %s692_s7 }
  0x7d   : > { %p6563_p7 = scmp.lt.s32.totalorder %s6561_s28, %s6554_s9 }
  0x7e   : > { %p6557_p1 = pnand %p6555_p13, %p6997_p6 }
  0x7f   : > { %p6564_p8 = por %p6563_p7, %p6562_p4 }
  0x80   : > { %5909 = dma.hbm_to_vmem [thread:$0]  (!%p6987_p5), %s7781_s5, 1536, %s662_s10, [#allocation3], %s7780_s1, %s7780_s1, %s7751_s30  }
  0x81   : > { %p6558_p0 = pneg %p6557_p1 }
  0x83   : > { %p6565_p9 = pnand %p6564_p8, %p6558_p0 }
  0x85   : > { %6568 = shalt.err (!%p6565_p9)
}
  0x86   : > { %s7782_s29 = sld [smem:[#allocation41_spill]]  ;;  %s6808_s6 = smov [#allocation9]  }
  0x87   : > { %s715_s10 = sshll.u32 %s6808_s6, 4  ;;  %s6809_s2 = smov [#allocation12]   ;;  %s716_s10 = int_to_ptr.vmem [resolvable:$true] %s715_s10 }
  0x88   : > { %s739_s5 = sshll.u32 %s6809_s2, 4  ;;  %s6580_s30 = scalar_lea.vmem %s716_s10, 16  ;;  %s740_s5 = int_to_ptr.vmem [resolvable:$true] %s739_s5 }
  0x89   : > { %p6581_p10 = scmp.ne.s32.totalorder %s716_s10, %s6580_s30  ;;  %s6587_s9 = scalar_lea.vmem %s716_s10, 32 }
  0x8a   : > { %p6588_p13 = scmp.lt.s32.totalorder %s716_s10, %s716_s10  ;;  %p6589_p1 = scmp.lt.s32.totalorder %s6587_s9, %s6580_s30 }
  0x8b   : > { %p6583_p11 = pnand %p6581_p10, %p6997_p6 }
  0x8c   : > { %5915 = dma.hbm_to_vmem [thread:$0]  (!%p6987_p5), %s7782_s29, 16, %s692_s7, [#allocation5]  }
  0x8d   : > { %p6584_p12 = pneg %p6583_p11  ;;  %p6590_p0 = por %p6589_p1, %p6588_p13 }
  0x8f   : > { %p6591_p4 = pnand %p6590_p0, %p6584_p12 }
  0x91   : > { %6594 = shalt.err (!%p6591_p4)
}
  0x92   : > { %s7783_s3 = sld [smem:[#allocation43_spill]]  ;;  %s6606_s27 = scalar_lea.vmem %s740_s5, 16 }
  0x93   : > { %p6607_p7 = scmp.ne.s32.totalorder %s740_s5, %s6606_s27  ;;  %s6613_s29 = scalar_lea.vmem %s740_s5, 32 }
  0x94   : > { %p6614_p10 = scmp.lt.s32.totalorder %s740_s5, %s740_s5  ;;  %p6615_p11 = scmp.lt.s32.totalorder %s6613_s29, %s6606_s27 }
  0x95   : > { %p6609_p8 = pnand %p6607_p7, %p6997_p6 }
  0x96   : > { %p6616_p2 = por %p6615_p11, %p6614_p10 }
  0x97   : > { %p6610_p9 = pneg %p6609_p8 }
  0x98   : > { %5921 = dma.hbm_to_vmem [thread:$0]  (!%p6987_p5), %s7783_s3, 16, %s716_s10, [#allocation8]  }
  0x99   : > { %p6617_p3 = pnand %p6616_p2, %p6610_p9 }
  0x9b   : > { %6620 = shalt.err (!%p6617_p3)
}
  0x9c   : > { %s7784_s2 = sld [smem:[#allocation45_spill]]  ;;  %s6810_s9 = smov [#allocation15]  }
  0x9d   : > { %s763_s10 = sshll.u32 %s6810_s9, 4  ;;  %s6811_s7 = smov [#allocation18]   ;;  %s764_s10 = int_to_ptr.vmem [resolvable:$true] %s763_s10 }
  0x9e   : > { %s787_s28 = sshll.u32 %s6811_s7, 4  ;;  %s6632_s3 = scalar_lea.vmem %s764_s10, 16  ;;  %s788_s28 = int_to_ptr.vmem [resolvable:$true] %s787_s28 }
  0x9f   : > { %p6633_p12 = scmp.ne.s32.totalorder %s764_s10, %s6632_s3  ;;  %s6639_s27 = scalar_lea.vmem %s764_s10, 32 }
  0xa0   : > { %p6640_p2 = scmp.lt.s32.totalorder %s764_s10, %s764_s10  ;;  %p6641_p3 = scmp.lt.s32.totalorder %s6639_s27, %s6632_s3 }
  0xa1   : > { %p6635_p13 = pnand %p6633_p12, %p6997_p6 }
  0xa2   : > { %5927 = dma.hbm_to_vmem [thread:$0]  (!%p6987_p5), %s7784_s2, 16, %s740_s5, [#allocation11]  }
  0xa3   : > { %p6636_p1 = pneg %p6635_p13  ;;  %p6642_p0 = por %p6641_p3, %p6640_p2 }
  0xa5   : > { %p6643_p4 = pnand %p6642_p0, %p6636_p1 }
  0xa7   : > { %6646 = shalt.err (!%p6643_p4)
}
  0xa8   : > { %s7785_s30 = sld [smem:[#allocation47_spill]]  ;;  %s6658_s6 = scalar_lea.vmem %s788_s28, 16 }
  0xa9   : > { %p6659_p7 = scmp.ne.s32.totalorder %s788_s28, %s6658_s6  ;;  %s6665_s2 = scalar_lea.vmem %s788_s28, 32 }
  0xaa   : > { %p6666_p10 = scmp.lt.s32.totalorder %s788_s28, %s788_s28  ;;  %p6667_p11 = scmp.lt.s32.totalorder %s6665_s2, %s6658_s6 }
  0xab   : > { %p6661_p8 = pnand %p6659_p7, %p6997_p6 }
  0xac   : > { %p6668_p12 = por %p6667_p11, %p6666_p10 }
  0xad   : > { %p6662_p9 = pneg %p6661_p8 }
  0xae   : > { %5933 = dma.hbm_to_vmem [thread:$0]  (!%p6987_p5), %s7785_s30, 16, %s764_s10, [#allocation14]  }
  0xaf   : > { %p6669_p13 = pnand %p6668_p12, %p6662_p9 }
  0xb1   : > { %6672 = shalt.err (!%p6669_p13)
}
  0xb2   : > { %5939 = dma.hbm_to_vmem [thread:$0]  (!%p6987_p5), %s7732_s12, 16, %s788_s28, [#allocation17]  }
  0xb3   : > { %s6812_s3 = smov [#allocation21]   ;;  %s6813_s27 = smov [#allocation24]  }
  0xb4   : > { %s817_s10 = sshll.u32 %s6812_s3, 4  ;;  %s849_s5 = sshll.u32 %s6813_s27, 4  ;;  %s818_s10 = int_to_ptr.vmem [resolvable:$true] %s817_s10  ;;  %s850_s5 = int_to_ptr.vmem [resolvable:$true] %s849_s5 }
  0xb5   : > { %s6684_s29 = scalar_lea.vmem %s818_s10, 3072  ;;  %p6692_p0 = scmp.lt.s32.totalorder %s818_s10, %s818_s10 }
  0xb6   : > { %p6685_p1 = scmp.ne.s32.totalorder %s818_s10, %s6684_s29  ;;  %p6693_p4 = scmp.lt.s32.totalorder %s6684_s29, %s6684_s29 }
  0xb8   : > { %p6687_p2 = pnand %p6685_p1, %p6997_p6  ;;  %p6694_p7 = por %p6693_p4, %p6692_p0 }
  0xba   : > { %p6688_p3 = pneg %p6687_p2 }
  0xbc   : > { %p6695_p8 = pnand %p6694_p7, %p6688_p3 }
  0xbe   : > { %6698 = shalt.err (!%p6695_p8)
}
  0xbf   : > { %s7786_s30 = smov 4   ;;  %s6710_s2 = scalar_lea.vmem %s850_s5, 6144 }
  0xc0   : > { %5945 = dma.hbm_to_vmem [thread:$0]  (!%p6987_p5), %s7737_s17, 3072, %s818_s10, [#allocation20], %s7780_s1, %s7780_s1, %s7786_s30  }
  0xc1   : > { %p6711_p9 = scmp.ne.s32.totalorder %s850_s5, %s6710_s2  ;;  %p6718_p12 = scmp.lt.s32.totalorder %s850_s5, %s850_s5 }
  0xc2   : > { %p6719_p13 = scmp.lt.s32.totalorder %s6710_s2, %s6710_s2 }
  0xc3   : > { %p6713_p10 = pnand %p6711_p9, %p6997_p6 }
  0xc4   : > { %p6720_p1 = por %p6719_p13, %p6718_p12 }
  0xc5   : > { %p6714_p11 = pneg %p6713_p10 }
  0xc7   : > { %p6721_p2 = pnand %p6720_p1, %p6714_p11 }
  0xc9   : > { %6724 = shalt.err (!%p6721_p2)
}
  0xca   : > { %5951 = dma.hbm_to_vmem [thread:$0]  (!%p6987_p5), %s7741_s21, 6144, %s850_s5, [#allocation23], %s7780_s1, %s7780_s1, %s7786_s30  }
  0xcb   : > { %s6814_s3 = smov [#allocation25]  }
  0xcc   : > { %s865_s10 = sshll.u32 %s6814_s3, 4  ;;  %s866_s10 = int_to_ptr.vmem [resolvable:$true] %s865_s10 }
  0xcd   : > { %s6736_s27 = scalar_lea.vmem %s866_s10, 3072  ;;  %p6744_p7 = scmp.lt.s32.totalorder %s866_s10, %s866_s10 }
  0xce   : > { %p6737_p3 = scmp.ne.s32.totalorder %s866_s10, %s6736_s27  ;;  %p6745_p8 = scmp.lt.s32.totalorder %s6736_s27, %s6736_s27 }
  0xd0   : > { %p6739_p0 = pnand %p6737_p3, %p6997_p6  ;;  %p6746_p9 = por %p6745_p8, %p6744_p7 }
  0xd2   : > { %p6740_p4 = pneg %p6739_p0 }
  0xd4   : > { %p6747_p10 = pnand %p6746_p9, %p6740_p4 }
  0xd6   : > { %6750 = shalt.err (!%p6747_p10)
}
  0xd7   : > { %5954 = dma.hbm_to_vmem [thread:$0]  (!%p6987_p5), %s7743_s23, 3072, %s866_s10, [#allocation26], %s7780_s1, %s7780_s1, %s7786_s30  }
  0xd8   : > { %p7787_p11 = scmp.ne.s32.totalorder %s7772_s8, 0 }
  0xd9   : > { %p7788_p6 = scmp.eq.s32.totalorder (!%p7787_p11), %s6972_s4, 0 }
  0xda   : > { %898 = sbr.rel (%p7787_p11) target bundleno = 3945 (0xf69), region = 128 }
  0xdf   : > { %6756 = dma.done.wait (%p7788_p6), [#allocation3], 1536   ;;  %p7789_p12 = pmov %p7788_p6 }
  0xe0   : > { %p7790_p13 = pmov %p7788_p6 }
  0xe1   : > { %6758 = vsyncadd (%p7789_p12), [#allocation3], 4294965760 }
  0xe2   : > { %6760 = dma.done.wait (%p7790_p13), [#allocation5], 3088   ;;  %p7791_p1 = pmov %p7788_p6 }
  0xe4   : > { %6762 = vsyncadd (%p7791_p1), [#allocation5], 4294964208  ;;  %p7792_p2 = pmov %p7791_p1 }
  0xe5   : > { %p7793_p5 = pmov %p7791_p1 }
  0xe6   : > { %6764 = dma.done.wait (%p7792_p2), [#allocation8], 1552  }
  0xe7   : > { %6766 = vsyncadd (%p7793_p5), [#allocation8], 4294965744  ;;  %p7794_p3 = pmov %p7791_p1 }
  0xe8   : > { %p7795_p0 = pmov %p7791_p1 }
  0xe9   : > { %6768 = dma.done.wait (%p7794_p3), [#allocation11], 3088  }
  0xea   : > { %6770 = vsyncadd (%p7795_p0), [#allocation11], 4294964208  ;;  %p7796_p4 = pmov %p7795_p0 }
  0xeb   : > { %p7797_p7 = pmov %p7795_p0 }
  0xec   : > { %6772 = dma.done.wait (%p7796_p4), [#allocation14], 1552  }
  0xed   : > { %6774 = vsyncadd (%p7797_p7), [#allocation14], 4294965744  ;;  %p7798_p8 = pmov %p7795_p0 }
  0xee   : > { %p7799_p9 = pmov %p7795_p0 }
  0xef   : > { %6776 = dma.done.wait (%p7798_p8), [#allocation17], 3088  }
  0xf0   : > { %6778 = vsyncadd (%p7799_p9), [#allocation17], 4294964208  ;;  %p7800_p10 = pmov %p7795_p0 }
  0xf1   : > { %p7801_p11 = pmov %p7795_p0 }
  0xf2   : > { %6780 = dma.done.wait (%p7800_p10), [#allocation20], 3088  }
  0xf3   : > { %6782 = vsyncadd (%p7801_p11), [#allocation20], 4294964208  ;;  %p7802_p6 = pmov %p7795_p0 }
  0xf4   : > { %p7803_p12 = pmov %p7795_p0 }
  0xf5   : > { %6784 = dma.done.wait (%p7802_p6), [#allocation23], 8192  }
  0xf6   : > { %6786 = vsyncadd (%p7803_p12), [#allocation23], 4294959104  ;;  %p7804_p13 = pmov %p7795_p0 }
  0xf7   : > { %p7805_p1 = pmov %p7795_p0 }
  0xf8   : > { %6788 = dma.done.wait (%p7804_p13), [#allocation26], 3072  }
  0xf9   : > { %6790 = vsyncadd (%p7805_p1), [#allocation26], 4294964224  ;;  %p1030_p2 = scmp.lt.s32.totalorder %s6972_s4, 1  ;;  %v6815_v0 = vmov 0   ;;  %s7806_s1 = sld [smem:[#allocation37_spill]]  ;;  %vm7757_vm1 = vcmask 1040384  }
  0xfa   : > { %1193 = vmatprep.subr.bf16.mxu0 %v6815_v0  ;;  %vm1058_vm0 = vsmask.f32 256  ;;  %v6027_v2 = vld [vmem:[#allocation2 + $0x38] sm:$0xff]   ;;  %v6028_v5 = vld [vmem:[#allocation2 + $0x30] sm:$0xff]   ;;  %vm7755_vm3 = vsmask.f32 7424 }
  0xfb   : > { %s7832_s4 = smov (!%p1030_p2, %s6972_s4), 1  ;;  %1194 = vmatpush1.bf16.msra.mxu0 %v6027_v2  ;;  %vm7200_vm2 = vmand %vm7757_vm1, %vm1058_vm0  ;;  %v6029_v11 = vld [vmem:[#allocation2 + $0x28] sm:$0xff]   ;;  %vm7756_vm4 = vcmask 1046528   ;;  %v6030_v15 = vld [vmem:[#allocation2 + $0x20] sm:$0xff]   ;;  %vm1083_vm5 = vcmask 523264   ;;  %s6816_s28 = smov 64  }
  0xfc   : > { %s5424_s8 = sshll.u32 %s7832_s4, 3  ;;  %1195 = vmatprep.subr.bf16.mxu0 %v6815_v0  ;;  %v6031_v21 = vld [vmem:[#allocation2 + $0x18] sm:$0xff]   ;;  %v6041_v26 = vld [vmem:[#allocation4 + $0x70] sm:$0xff]   ;;  %v6033_v29 = vld [vmem:[#allocation2 + $0x8] sm:$0xff]   ;;  %v6817_v49 = vmov 0.0   ;;  %s7809_s9 = sld [smem:[#allocation39_spill]] }
  0xfd   : > { %v6039_v23 = vld [vmem:[#allocation4 + $0x78] sm:$0xff]   ;;  %v6032_v27 = vld [vmem:[#allocation2 + $0x10] sm:$0xff]   ;;  %v6034_v30 = vld [vmem:[#allocation2] sm:$0xff]   ;;  %vm6818_vm6 = vmmov 0   ;;  %s6819_s7 = smov 120   ;;  %s6820_s3 = smov 104  }
  0xfe   : > { %v6040_v25 = vld [vmem:[#allocation4 + $0x38] sm:$0xff]   ;;  %5426 = vmatprep.subr.bf16.mxu1 %v6039_v23  ;;  %v6042_v28 = vld [vmem:[#allocation4 + $0x30] sm:$0xff]   ;;  %v6037_v33 = vld [vmem:[#allocation2 + $0x48] sm:$0xff]   ;;  %s6821_s10 = smov 88   ;;  %s6822_s27 = smov 112   ;;  %vm1571_vm7 = vcmask 64512  }
  0xff   : > { %s1034_s30 = scalar_lea.vmem %s7806_s1, %s5424_s8  ;;  %1196 = vmatpush1.bf16.msra.mxu0 %v6028_v5  ;;  %5427 = vmatpush3.bf16.msra.mxu1 %v6040_v25  ;;  %v6035_v31 = vld [vmem:[#allocation2 + $0x58] sm:$0xff]   ;;  %v6036_v32 = vld [vmem:[#allocation2 + $0x50] sm:$0xff]   ;;  %v6038_v34 = vld [vmem:[#allocation2 + $0x40] sm:$0xff]   ;;  %s6823_s29 = smov 72   ;;  %vm1575_vm8 = vcmask 130048   ;;  %vm1578_vm9 = vcmask 195584  }
 0x100   : > { %v6026_v1 = vld [vmem:[%s1034_s30] sm:$0xff]   ;;  %1197 = vmatprep.subr.bf16.mxu0 %v6815_v0  ;;  %5428 = vmatprep.subr.bf16.mxu1 %v6041_v26  ;;  %v6043_v37 = vld [vmem:[#allocation4 + $0x68] sm:$0xff]   ;;  %v6047_v41 = vld [vmem:[#allocation4 + $0x58] sm:$0xff]   ;;  %s6824_s5 = smov 96   ;;  %s6825_s8 = smov 80   ;;  %vm1581_vm10 = vcmask 261120  }
 0x101   : > { %v1049_v3 = vshrl.u32 %v6026_v1, 16  ;;  %v1052_v4 = vshll.u32 %v6026_v1, 16  ;;  %v6044_v38 = vld [vmem:[#allocation4 + $0x28] sm:$0xff]   ;;  %v6045_v39 = vld [vmem:[#allocation4 + $0x60] sm:$0xff]   ;;  %v6048_v42 = vld [vmem:[#allocation4 + $0x18] sm:$0xff]   ;;  %vm1584_vm11 = vcmask 326656  }
 0x102   : > { %v6046_v40 = vld [vmem:[#allocation4 + $0x20] sm:$0xff]   ;;  %v6049_v43 = vld [vmem:[#allocation4 + $0x50] sm:$0xff]   ;;  %v6051_v45 = vld [vmem:[#allocation4 + $0x48] sm:$0xff]   ;;  %vm1587_vm12 = vcmask 392192   ;;  %vm1590_vm13 = vcmask 457728   ;;  %vm1619_vm14 = vcmask 1041408  }
 0x103   : > { %v1051_v6 = vrot.slane %v1049_v3, 7  ;;  %1198 = vmatpush1.bf16.msra.mxu0 %v6029_v11  ;;  %5429 = vmatpush3.bf16.msra.mxu1 %v6042_v28  ;;  %v6050_v44 = vld [vmem:[#allocation4 + $0x10] sm:$0xff]   ;;  %v6052_v46 = vld [vmem:[#allocation4 + $0x8] sm:$0xff]   ;;  %v6053_v47 = vld [vmem:[#allocation4 + $0x40] sm:$0xff]   ;;  %vm1620_vm15 = vsmask.f32 1280 }
 0x104   : > { %1199 = vmatprep.subr.bf16.mxu0 %v6815_v0  ;;  %5430 = vmatprep.subr.bf16.mxu1 %v6043_v37  ;;  %v6054_v48 = vld [vmem:[#allocation4] sm:$0xff]   ;;  %vm1628_vm0 = vcmask 1042432   ;;  %v6328_v7 = vld [vmem:[%s7745_s25 + $0x30] sm:$0xff]  }
 0x105   : > { %v1054_v8 = vor.u32 %v1052_v4, %v1051_v6  ;;  %v1061_v9 = vsel %vm7200_vm2, %v1051_v6, 0  ;;  %v5116_v50 = vld [vmem:[%s7809_s9] ss:$0 sm:$0xff] }
 0x106   : > { %v1071_v10 = vshll.u32 %v1061_v9, 16  ;;  %v1081_v19 = vrot.slane %v1061_v9, 1 }
 0x107   : > { %v1060_v12 = vsel %vm7200_vm2, 0, %v1054_v8  ;;  %1200 = vmatpush1.bf16.msra.mxu0 %v6030_v15  ;;  %5431 = vmatpush3.bf16.msra.mxu1 %v6044_v38  ;;  %v6059_v15 = vld [vmem:[#allocation4 + $0x98] sm:$0xff]  }
 0x108   : > { %v1064_v13 = vshrl.u32 %v1060_v12, 16  ;;  %v1066_v14 = vshll.u32 %v1060_v12, 16  ;;  %v1080_v16 = vrot.slane %v1060_v12, 1  ;;  %v1073_v18 = vrot.slane %v1071_v10, 1  ;;  %1201 = vmatprep.subr.bf16.mxu0 %v6815_v0  ;;  %5432 = vmatprep.subr.bf16.mxu1 %v6045_v39  ;;  %v6055_v10 = vld [vmem:[#allocation4 + $0xb8] sm:$0xff]  }
 0x10a   : > { %v1068_v17 = vrot.slane %v1066_v14, 1  ;;  %v1082_v22 = vsel %vm7756_vm4, %v1080_v16, %v1081_v19  ;;  %v6058_v14 = vld [vmem:[#allocation4 + $0xa0] sm:$0xff]   ;;  %v6060_v16 = vld [vmem:[#allocation4 + $0x90] sm:$0xff]  }
 0x10b   : > { %5129 = vmatprep.mubr.msk.bf16.mxu0 %vm1083_vm5, %v1082_v22  ;;  %1202 = vmatpush1.bf16.msra.mxu0 %v6031_v21 }
 0x10c   : > { %v1069_v20 = vor.u32 %v1068_v17, %v1064_v13  ;;  %1203 = vmatprep.subr.bf16.mxu0 %v6815_v0  ;;  %5433 = vmatpush3.bf16.msra.mxu1 %v6046_v40  ;;  %v6057_v13 = vld [vmem:[#allocation4 + $0xa8] sm:$0xff]  }
 0x10d   : > { %5434 = vmatprep.subr.bf16.mxu1 %v6047_v41  ;;  %v6061_v17 = vld [vmem:[#allocation4 + $0x88] sm:$0xff]  }
 0x10e   : > { %v1074_v24 = vsel %vm7755_vm3, %v1069_v20, %v1073_v18  ;;  %v6062_v18 = vld [vmem:[#allocation4 + $0x80] sm:$0xff]  }
 0x10f   : > { %1075 = vrot.lane.b32.xlu0 %v1074_v24, %s6816_s28  ;;  %1204 = vmatpush1.bf16.msra.mxu0 %v6032_v27  ;;  %v5130_v27 = vld [vmem:[#allocation6] ss:$0 sm:$0xff] }
 0x110   : > { %1205 = vmatprep.subr.bf16.mxu0 %v6815_v0  ;;  %5435 = vmatpush3.bf16.msra.mxu1 %v6048_v42  ;;  %v6063_v42 = vld [vmem:[#allocation7 + $0x38] sm:$0xff]  }
 0x111   : > { %5436 = vmatprep.subr.bf16.mxu1 %v6049_v43  ;;  %v6064_v43 = vld [vmem:[#allocation7 + $0x30] sm:$0xff]  }
 0x113   : > { %1206 = vmatpush1.bf16.msra.mxu0 %v6033_v29 }
 0x114   : > { %1207 = vmatprep.subr.bf16.mxu0 %v6815_v0  ;;  %5437 = vmatpush3.bf16.msra.mxu1 %v6050_v44  ;;  %v6065_v44 = vld [vmem:[#allocation7 + $0x28] sm:$0xff]  }
 0x115   : > { %5438 = vmatprep.subr.bf16.mxu1 %v6051_v45  ;;  %v6066_v45 = vld [vmem:[#allocation7 + $0x20] sm:$0xff]  }
 0x117   : > { %1208 = vmatpush1.bf16.msra.mxu0 %v6034_v30 }
 0x118   : > { %1217 = vmatprep.subr.bf16.mxu0 %v6815_v0  ;;  %5439 = vmatpush3.bf16.msra.mxu1 %v6052_v46  ;;  %v6067_v46 = vld [vmem:[#allocation7 + $0x18] sm:$0xff]  }
 0x119   : > { %5440 = vmatprep.subr.bf16.mxu1 %v6053_v47  ;;  %v6068_v47 = vld [vmem:[#allocation7 + $0x10] sm:$0xff]  }
 0x11b   : > { %1218 = vmatpush2.bf16.msra.mxu0 %v6035_v31 }
 0x11c   : > { %1219 = vmatprep.subr.bf16.mxu0 %v6815_v0  ;;  %5441 = vmatpush3.bf16.msra.mxu1 %v6054_v48  ;;  %v6069_v48 = vld [vmem:[#allocation7 + $0x8] sm:$0xff]  }
 0x11d   : > { %5722 = vmatprep.subr.bf16.mxu1 %v6817_v49 }
 0x11f   : > { %1220 = vmatpush2.bf16.msra.mxu0 %v6036_v32 }
 0x120   : > { %1221 = vmatprep.subr.bf16.mxu0 %v6815_v0 }
 0x123   : > { %1222 = vmatpush2.bf16.msra.mxu0 %v6037_v33 }
 0x124   : > { %1223 = vmatprep.subr.bf16.mxu0 %v6815_v0 }
 0x127   : > { %1224 = vmatpush2.bf16.msra.mxu0 %v6038_v34 }
 0x128   : > { %1774 = vmatprep.subr.bf16.mxu0 %v6815_v0 }
 0x181   : > { %v1076_v35 = vpop.permute.xlu0 %1075 }
 0x182   : > { %v1085_v36 = vsel %vm1083_vm5, %v1060_v12, %v1076_v35  ;;  %v6056_v12 = vld [vmem:[#allocation4 + $0xb0] sm:$0xff]  }
 0x183   : > { %1226 = vmatmul.mubr.bf16.vlgmr.msra.gmra.mxu0 %v1085_v36 }
 0x184   : > { %1775 = vmatpush1.bf16.msra.mxu0 %v6063_v42 }
 0x185   : > { %1776 = vmatprep.subr.bf16.mxu0 %v6815_v0 }
 0x188   : > { %1777 = vmatpush1.bf16.msra.mxu0 %v6064_v43  ;;  %v6082_v43 = vld [vmem:[#allocation10 + $0x68] sm:$0xff]  }
 0x189   : > { %1778 = vmatprep.subr.bf16.mxu0 %v6815_v0 }
 0x18c   : > { %1779 = vmatpush1.bf16.msra.mxu0 %v6065_v44  ;;  %v6084_v44 = vld [vmem:[#allocation10 + $0x28] sm:$0xff]  }
 0x18d   : > { %1780 = vmatprep.subr.bf16.mxu0 %v6815_v0 }
 0x190   : > { %1781 = vmatpush1.bf16.msra.mxu0 %v6066_v45  ;;  %v6075_v45 = vld [vmem:[#allocation10 + $0xb8] sm:$0xff]  }
 0x191   : > { %1782 = vmatprep.subr.bf16.mxu0 %v6815_v0 }
 0x194   : > { %1783 = vmatpush1.bf16.msra.mxu0 %v6067_v46 }
 0x195   : > { %1784 = vmatprep.subr.bf16.mxu0 %v6815_v0 }
 0x198   : > { %1785 = vmatpush1.bf16.msra.mxu0 %v6068_v47 }
 0x199   : > { %1786 = vmatprep.subr.bf16.mxu0 %v6815_v0 }
 0x19c   : > { %1787 = vmatpush1.bf16.msra.mxu0 %v6069_v48  ;;  %v6077_v48 = vld [vmem:[#allocation10 + $0xb0] sm:$0xff]  }
 0x19d   : > { %1788 = vmatprep.subr.bf16.mxu0 %v6815_v0 }
 0x243   : > { %v1227_v51 = vpop.f32.mrf.mxu0 }
 0x244   : > { %v1228_v53 = vadd.f32 %v5116_v50, %v1227_v51  ;;  %v6071_v51 = vld [vmem:[#allocation7 + $0x58] sm:$0xff]  }
 0x245   : > { %v1229_v52 = vpop.f32.mrf.mxu0 }
 0x246   : > { %v1234_v57 = vmax.f32 %v1228_v53, 0.0  ;;  %v6072_v52 = vld [vmem:[#allocation7 + $0x50] sm:$0xff]   ;;  %v6073_v53 = vld [vmem:[#allocation7 + $0x48] sm:$0xff]  }
 0x247   : > { %v1230_v54 = vpop.f32.mrf.mxu0 }
 0x248   : > { %v1231_v55 = vadd.f32 %v5116_v50, %v1230_v54  ;;  %v6070_v50 = vld [vmem:[#allocation7] sm:$0xff]  }
 0x249   : > { %v1232_v56 = vpop.f32.mrf.mxu0  ;;  %1789 = vmatpush1.bf16.msra.mxu0 %v6070_v50  ;;  %v6074_v54 = vld [vmem:[#allocation7 + $0x40] sm:$0xff]   ;;  %v6080_v50 = vld [vmem:[#allocation10 + $0xa8] sm:$0xff]  }
 0x24a   : > { %v1235_v58 = vmax.f32 %v1231_v55, 0.0  ;;  %1798 = vmatprep.subr.bf16.mxu0 %v6815_v0 }
 0x24c   : > { %v1236_v59 = vpack.c.bf16 %v1235_v58, %v1234_v57 }
 0x24d   : > { %1799 = vmatpush2.bf16.msra.mxu0 %v6071_v51  ;;  %v6083_v51 = vld [vmem:[#allocation10 + $0xa0] sm:$0xff]  }
 0x24e   : > { %v1238_v60 = vshrl.u32 %v1236_v59, 16  ;;  %v1241_v62 = vshll.u32 %v1236_v59, 16  ;;  %1800 = vmatprep.subr.bf16.mxu0 %v6815_v0 }
 0x250   : > { %v1240_v61 = vrot.slane %v1238_v60, 7 }
 0x251   : > { %1801 = vmatpush2.bf16.msra.mxu0 %v6072_v52  ;;  %v6085_v52 = vld [vmem:[#allocation10 + $0x60] sm:$0xff]  }
 0x252   : > { %v1243_v63 = vor.u32 %v1241_v62, %v1240_v61  ;;  %v1247_v1 = vsel %vm7200_vm2, %v1240_v61, 0  ;;  %1802 = vmatprep.subr.bf16.mxu0 %v6815_v0 }
 0x253   : > { %v1256_v4 = vshll.u32 %v1247_v1, 16  ;;  %v1264_v20 = vrot.slane %v1247_v1, 1 }
 0x254   : > { %v1246_v2 = vsel %vm7200_vm2, 0, %v1243_v63 }
 0x255   : > { %v1251_v3 = vshll.u32 %v1246_v2, 16  ;;  %v1249_v5 = vshrl.u32 %v1246_v2, 16  ;;  %v1258_v9 = vrot.slane %v1256_v4, 1  ;;  %v1263_v19 = vrot.slane %v1246_v2, 1  ;;  %1803 = vmatpush2.bf16.msra.mxu0 %v6073_v53  ;;  %v6086_v53 = vld [vmem:[#allocation10 + $0x98] sm:$0xff]  }
 0x256   : > { %1804 = vmatprep.subr.bf16.mxu0 %v6815_v0 }
 0x257   : > { %v1253_v6 = vrot.slane %v1251_v3, 1  ;;  %v1265_v21 = vsel %vm7756_vm4, %v1263_v19, %v1264_v20  ;;  %vm1651_vm4 = vsmask.f32 4352 }
 0x259   : > { %v1254_v8 = vor.u32 %v1253_v6, %v1249_v5  ;;  %1805 = vmatpush2.bf16.msra.mxu0 %v6074_v54  ;;  %v6087_v54 = vld [vmem:[#allocation10 + $0x20] sm:$0xff]  }
 0x25a   : > { %5742 = vmatprep.subr.bf16.mxu0 %v6817_v49 }
 0x25b   : > { %v1259_v11 = vsel %vm7755_vm3, %v1254_v8, %v1258_v9 }
 0x25c   : > { %1498 = vmatprep.mubr.bf16.mxu1 %v1259_v11 }
 0x25d   : > { %1499 = vmatmul.mubr.bf16.vlgmr.msra.gmra.mxu1 %v1246_v2 }
 0x25e   : > { %5723 = vmatpush3.bf16.msra.mxu1 %v6055_v10  ;;  %5738 = vmatprep.mubr.msk.bf16.mxu1 %vm6818_vm6, %v6817_v49 }
 0x25f   : > { %5724 = vmatprep.subr.bf16.mxu1 %v6817_v49 }
 0x262   : > { %5725 = vmatpush3.bf16.msra.mxu1 %v6056_v12 }
 0x263   : > { %5726 = vmatprep.subr.bf16.mxu1 %v6817_v49 }
 0x266   : > { %5727 = vmatpush3.bf16.msra.mxu1 %v6057_v13 }
 0x267   : > { %5728 = vmatprep.subr.bf16.mxu1 %v6817_v49 }
 0x26a   : > { %5729 = vmatpush3.bf16.msra.mxu1 %v6058_v14 }
 0x26b   : > { %5730 = vmatprep.subr.bf16.mxu1 %v6817_v49 }
 0x26e   : > { %5731 = vmatpush3.bf16.msra.mxu1 %v6059_v15 }
 0x26f   : > { %5732 = vmatprep.subr.bf16.mxu1 %v6817_v49 }
 0x272   : > { %5733 = vmatpush3.bf16.msra.mxu1 %v6060_v16 }
 0x273   : > { %5734 = vmatprep.subr.bf16.mxu1 %v6817_v49 }
 0x276   : > { %5735 = vmatpush3.bf16.msra.mxu1 %v6061_v17  ;;  %v6138_v17 = vld [vmem:[%s7735_s15 + $0x30] sm:$0xff]  }
 0x277   : > { %5736 = vmatprep.subr.bf16.mxu1 %v6817_v49 }
 0x27a   : > { %5737 = vmatpush3.bf16.msra.mxu1 %v6062_v18 }
 0x27d   : > { %5739 = vmatmul.mubr.bf16.vlgmr.msra.gmra.mxu1 %v1265_v21 }
 0x31d   : > { %v5442_v22 = vpop.f32.mrf.mxu1 }
 0x31f   : > { %v5443_v23 = vpop.f32.mrf.mxu1 }
 0x320   : > { %v5444_v26 = vadd.f32 %v5443_v23, %v5442_v22 }
 0x321   : > { %v5445_v24 = vpop.f32.mrf.mxu1 }
 0x322   : > { %v1501_v30 = vadd.f32 %v5444_v26, %v5130_v27 }
 0x323   : > { %v5446_v25 = vpop.f32.mrf.mxu1 }
 0x324   : > { %v5447_v28 = vadd.f32 %v5446_v25, %v5445_v24 }
 0x326   : > { %v1504_v33 = vadd.f32 %v5447_v28, %v5130_v27 }
 0x33d   : > { %v1541_v29 = vpop.f32.mrf.mxu1 }
 0x33e   : > { %v1542_v32 = vadd.f32 %v1541_v29, %v1501_v30  ;;  %v6236_v30 = vld [vmem:[#allocation24 + $0x28] sm:$0xff]  }
 0x33f   : > { %v5740_v31 = vpop.f32.mrf.mxu1 }
 0x340   : > { %v1548_v37 = vmax.f32 %v1542_v32, 0.0  ;;  %v6076_v31 = vld [vmem:[#allocation10 + $0x78] sm:$0xff]  }
 0x341   : > { %v1544_v34 = vpop.f32.mrf.mxu1  ;;  %5457 = vmatprep.subr.bf16.mxu1 %v6076_v31  ;;  %v5169_v31 = vld [vmem:[#allocation12] ss:$0 sm:$0xff] }
 0x342   : > { %v1545_v35 = vadd.f32 %v1544_v34, %v1504_v33  ;;  %v6078_v34 = vld [vmem:[#allocation10 + $0x38] sm:$0xff]  }
 0x343   : > { %v5741_v36 = vpop.f32.mrf.mxu1  ;;  %5458 = vmatpush3.bf16.msra.mxu1 %v6078_v34 }
 0x344   : > { %v1549_v38 = vmax.f32 %v1545_v35, 0.0 }
 0x346   : > { %v7243_v39 = vpack.c.bf16 %v1549_v38, %v1548_v37  ;;  %v6079_v37 = vld [vmem:[#allocation10 + $0x70] sm:$0xff]  }
 0x347   : > { %5459 = vmatprep.subr.bf16.mxu1 %v6079_v37 }
 0x348   : > { %1552 = vrot.lane.b32.xlu0 %v7243_v39, %s6819_s7 }
 0x3ba   : > { %v1553_v40 = vpop.permute.xlu0 %1552 }
 0x3bb   : > { %v1555_v41 = vmax.bf16 %v1553_v40, %v7243_v39 }
 0x3bd   : > { %1561 = vrot.lane.b32.xlu0 %v1555_v41, %s6820_s3  ;;  %1557 = vrot.lane.b32.xlu1 %v1555_v41, %s6819_s7  ;;  %s7829_s3 = sld [smem:[#allocation49_spill]] }
 0x3c1   : > { %1565 = vrot.lane.b32.xlu0 %v1555_v41, %s6821_s10  ;;  %1559 = vrot.lane.b32.xlu1 %v1555_v41, %s6822_s27 }
 0x3c5   : > { %1569 = vrot.lane.b32.xlu0 %v1555_v41, %s6823_s29  ;;  %1563 = vrot.lane.b32.xlu1 %v1555_v41, %s6824_s5 }
 0x3c9   : > { %1567 = vrot.lane.b32.xlu1 %v1555_v41, %s6825_s8 }
 0x42f   : > { %v1558_v55 = vpop.permute.xlu1 %1557  ;;  %v1562_v56 = vpop.permute.xlu0 %1561 }
 0x430   : > { %v1574_v57 = vsel %vm1571_vm7, %v1555_v41, %v1558_v55  ;;  %vm1629_vm7 = vsmask.f32 2304  ;;  %v6081_v41 = vld [vmem:[#allocation10 + $0x30] sm:$0xff]   ;;  %v6088_v55 = vld [vmem:[#allocation10 + $0x58] sm:$0xff]  }
 0x431   : > { %vm7274_vm3 = vmand %vm1628_vm0, %vm1629_vm7  ;;  %vm1650_vm7 = vcmask 1044480   ;;  %5460 = vmatpush3.bf16.msra.mxu1 %v6081_v41 }
 0x432   : > { %5461 = vmatprep.subr.bf16.mxu1 %v6082_v43  ;;  %v6099_v43 = vld [vmem:[#allocation13 + $0x38] sm:$0xff]  }
 0x433   : > { %v1560_v58 = vpop.permute.xlu1 %1559  ;;  %v1566_v60 = vpop.permute.xlu0 %1565 }
 0x434   : > { %v1577_v59 = vsel %vm1575_vm8, %v1574_v57, %v1560_v58  ;;  %v6090_v57 = vld [vmem:[#allocation10 + $0x18] sm:$0xff]   ;;  %v6091_v58 = vld [vmem:[#allocation10 + $0x50] sm:$0xff]  }
 0x435   : > { %v1580_v61 = vsel %vm1578_vm9, %v1577_v59, %v1562_v56  ;;  %vm7266_vm9 = vmand %vm1619_vm14, %vm1620_vm15  ;;  %5462 = vmatpush3.bf16.msra.mxu1 %v6084_v44  ;;  %v6089_v56 = vld [vmem:[#allocation10 + $0x90] sm:$0xff]   ;;  %v6092_v59 = vld [vmem:[#allocation10 + $0x88] sm:$0xff]  }
 0x436   : > { %5463 = vmatprep.subr.bf16.mxu1 %v6085_v52  ;;  %v6100_v44 = vld [vmem:[#allocation13 + $0x30] sm:$0xff]   ;;  %v6107_v52 = vld [vmem:[#allocation13 + $0x58] sm:$0xff]  }
 0x437   : > { %v1564_v62 = vpop.permute.xlu1 %1563  ;;  %v1570_v3 = vpop.permute.xlu0 %1569 }
 0x438   : > { %v1583_v63 = vsel %vm1581_vm10, %v1580_v61, %v1564_v62  ;;  %v6094_v61 = vld [vmem:[#allocation10 + $0x48] sm:$0xff]   ;;  %v6095_v62 = vld [vmem:[#allocation10 + $0x80] sm:$0xff]  }
 0x439   : > { %v1586_v1 = vsel %vm1584_vm11, %v1583_v63, %v1566_v60  ;;  %vm1637_vm11 = vcmask 1043456   ;;  %5464 = vmatpush3.bf16.msra.mxu1 %v6087_v54  ;;  %v6093_v60 = vld [vmem:[#allocation10 + $0x10] sm:$0xff]   ;;  %v6096_v63 = vld [vmem:[#allocation10 + $0x8] sm:$0xff]  }
 0x43a   : > { %5465 = vmatprep.subr.bf16.mxu1 %v6088_v55  ;;  %v6109_v54 = vld [vmem:[#allocation13 + $0x48] sm:$0xff]   ;;  %v6110_v55 = vld [vmem:[#allocation13 + $0x40] sm:$0xff]  }
 0x43b   : > { %v1568_v2 = vpop.permute.xlu1 %1567 }
 0x43c   : > { %v1589_v4 = vsel %vm1587_vm12, %v1586_v1, %v1568_v2  ;;  %v6097_v1 = vld [vmem:[#allocation10 + $0x40] sm:$0xff]  }
 0x43d   : > { %v1592_v5 = vsel %vm1590_vm13, %v1589_v4, %v1570_v3  ;;  %vm1638_vm13 = vsmask.f32 3328  ;;  %5466 = vmatpush3.bf16.msra.mxu1 %v6090_v57  ;;  %v6098_v2 = vld [vmem:[#allocation10] sm:$0xff]   ;;  %v5155_v3 = vld [vmem:[#allocation9] ss:$0 sm:$0xff] }
 0x43e   : > { %v1594_v6 = vshrl.u32 %v1592_v5, 16  ;;  %vm1639_vm15 = vmand %vm1637_vm11, %vm1638_vm13  ;;  %5467 = vmatprep.subr.bf16.mxu1 %v6091_v58 }
 0x440   : > { %v1597_v8 = vmax.bf16 %v1594_v6, %v1592_v5 }
 0x441   : > { %5468 = vmatpush3.bf16.msra.mxu1 %v6093_v60 }
 0x442   : > { %v1599_v9 = vshll.u32 %v1597_v8, 16  ;;  %v1604_v12 = vrot.slane %v1597_v8, 1  ;;  %v1607_v15 = vrot.slane %v1597_v8, 2  ;;  %v1610_v20 = vrot.slane %v1597_v8, 3  ;;  %5469 = vmatprep.subr.bf16.mxu1 %v6094_v61 }
 0x444   : > { %v1601_v10 = vrot.slane %v1599_v9, 1  ;;  %v1605_v13 = vrot.slane %v1599_v9, 2  ;;  %v1608_v18 = vrot.slane %v1599_v9, 3  ;;  %v1611_v22 = vrot.slane %v1599_v9, 4 }
 0x445   : > { %5470 = vmatpush3.bf16.msra.mxu1 %v6096_v63 }
 0x446   : > { %v1613_v14 = vsel %vm7200_vm2, %v1597_v8, %v1601_v10  ;;  %5471 = vmatprep.subr.bf16.mxu1 %v6097_v1 }
 0x447   : > { %v1617_v16 = vsel %vm7757_vm1, %v1613_v14, %v1604_v12  ;;  %vm7286_vm1 = vmand %vm1650_vm7, %vm1651_vm4  ;;  %vm7816_vm4 = vcmask 1040384  }
 0x448   : > { %v1622_v19 = vsel %vm7266_vm9, %v1617_v16, %v1605_v13 }
 0x449   : > { %v1626_v21 = vsel %vm1619_vm14, %v1622_v19, %v1607_v15  ;;  %5472 = vmatpush3.bf16.msra.mxu1 %v6098_v2 }
 0x44a   : > { %v1631_v23 = vsel %vm7274_vm3, %v1626_v21, %v1608_v18  ;;  %2287 = vmatprep.subr.bf16.mxu1 %v6815_v0 }
 0x44b   : > { %v1635_v24 = vsel %vm1628_vm0, %v1631_v23, %v1610_v20 }
 0x44c   : > { %v1640_v25 = vsel %vm1639_vm15, %v1635_v24, %v1611_v22 }
 0x44d   : > { %v1642_v26 = vshrl.u32 %v1640_v25, 16  ;;  %v1645_v28 = vshll.u32 %v1640_v25, 16 }
 0x44f   : > { %v1644_v27 = vrot.slane %v1642_v26, 7 }
 0x451   : > { %v1647_v29 = vor.u32 %v1645_v28, %v1644_v27 }
 0x453   : > { %v1649_v32 = vsel %vm7200_vm2, 0, %v1647_v29 }
 0x454   : > { %v1653_v33 = vsel %vm7286_vm1, %v1649_v32, 0 }
 0x455   : > { %v1664_v35 = vrot.slane %v1653_v33, 1  ;;  %v1657_v36 = vshll.u32 %v1653_v33, 16  ;;  %v1655_v38 = vshrl.u32 %v1653_v33, 16 }
 0x457   : > { %5168 = vmatprep.mubr.msk.bf16.mxu0 %vm1083_vm5, %v1664_v35  ;;  %v1659_v40 = vrot.slane %v1657_v36, 1 }
 0x459   : > { %v1660_v42 = vor.u32 %v1659_v40, %v1655_v38 }
 0x45b   : > { %1661 = vrot.lane.b32.xlu1 %v1660_v42, %s6816_s28 }
 0x4cd   : > { %v1662_v46 = vpop.permute.xlu1 %1661 }
 0x4ce   : > { %v1666_v47 = vsel %vm1083_vm5, %v1653_v33, %v1662_v46  ;;  %v6102_v46 = vld [vmem:[#allocation13 + $0x20] sm:$0xff]  }
 0x4cf   : > { %1807 = vmatmul.mubr.bf16.vlgmr.msra.gmra.mxu0 %v1666_v47  ;;  %v6103_v47 = vld [vmem:[#allocation13 + $0x18] sm:$0xff]  }
 0x4d0   : > { %5743 = vmatpush3.bf16.msra.mxu0 %v6075_v45  ;;  %5758 = vmatprep.mubr.msk.bf16.mxu0 %vm6818_vm6, %v6817_v49  ;;  %v6101_v45 = vld [vmem:[#allocation13 + $0x28] sm:$0xff]  }
 0x4d1   : > { %5744 = vmatprep.subr.bf16.mxu0 %v6817_v49 }
 0x4d4   : > { %5745 = vmatpush3.bf16.msra.mxu0 %v6077_v48  ;;  %v6104_v48 = vld [vmem:[#allocation13 + $0x10] sm:$0xff]  }
 0x4d5   : > { %5746 = vmatprep.subr.bf16.mxu0 %v6817_v49 }
 0x4d8   : > { %5747 = vmatpush3.bf16.msra.mxu0 %v6080_v50  ;;  %v6105_v50 = vld [vmem:[#allocation13 + $0x8] sm:$0xff]  }
 0x4d9   : > { %5748 = vmatprep.subr.bf16.mxu0 %v6817_v49 }
 0x4dc   : > { %5749 = vmatpush3.bf16.msra.mxu0 %v6083_v51  ;;  %v6106_v51 = vld [vmem:[#allocation13] sm:$0xff]  }
 0x4dd   : > { %5750 = vmatprep.subr.bf16.mxu0 %v6817_v49 }
 0x4e0   : > { %5751 = vmatpush3.bf16.msra.mxu0 %v6086_v53  ;;  %v6108_v53 = vld [vmem:[#allocation13 + $0x50] sm:$0xff]  }
 0x4e1   : > { %5752 = vmatprep.subr.bf16.mxu0 %v6817_v49 }
 0x4e4   : > { %5753 = vmatpush3.bf16.msra.mxu0 %v6089_v56 }
 0x4e5   : > { %5754 = vmatprep.subr.bf16.mxu0 %v6817_v49 }
 0x4e8   : > { %5755 = vmatpush3.bf16.msra.mxu0 %v6092_v59 }
 0x4e9   : > { %5756 = vmatprep.subr.bf16.mxu0 %v6817_v49 }
 0x4ec   : > { %5757 = vmatpush3.bf16.msra.mxu0 %v6095_v62 }
 0x58f   : > { %v1808_v4 = vpop.f32.mrf.mxu0 }
 0x590   : > { %v1809_v5 = vadd.f32 %v5155_v3, %v1808_v4 }
 0x591   : > { %v1810_v6 = vpop.f32.mrf.mxu0 }
 0x592   : > { %v1814_v8 = vmax.f32 %v1809_v5, 0.0 }
 0x593   : > { %v1811_v9 = vpop.f32.mrf.mxu0 }
 0x594   : > { %v1815_v10 = vpack.c.bf16 %v1814_v8, %v1814_v8 }
 0x595   : > { %v1812_v12 = vpop.f32.mrf.mxu0 }
 0x596   : > { %v1817_v13 = vshrl.u32 %v1815_v10, 16  ;;  %v1820_v15 = vshll.u32 %v1815_v10, 16 }
 0x598   : > { %v1819_v14 = vrot.slane %v1817_v13, 7 }
 0x59a   : > { %v1822_v16 = vor.u32 %v1820_v15, %v1819_v14 }
 0x59c   : > { %v1824_v18 = vsel %vm7200_vm2, 0, %v1822_v16  ;;  %v6113_v16 = vld [vmem:[#allocation16 + $0x78] sm:$0xff]  }
 0x59d   : > { %v1825_v19 = vsel %vm7286_vm1, %v1824_v18, 0  ;;  %v6114_v18 = vld [vmem:[#allocation16 + $0x38] sm:$0xff]   ;;  %5488 = vmatprep.subr.bf16.mxu0 %v6113_v16  ;;  %v6137_v16 = vld [vmem:[%s7735_s15 + $0x70] sm:$0xff]  }
 0x59e   : > { %v1835_v20 = vrot.slane %v1825_v19, 1  ;;  %v1829_v21 = vshll.u32 %v1825_v19, 16  ;;  %v1827_v22 = vshrl.u32 %v1825_v19, 16 }
 0x5a0   : > { %5759 = vmatmul.mubr.bf16.vlgmr.msra.gmra.mxu0 %v1835_v20  ;;  %v1831_v23 = vrot.slane %v1829_v21, 1 }
 0x5a1   : > { %5489 = vmatpush3.bf16.msra.mxu0 %v6114_v18 }
 0x5a2   : > { %v1832_v24 = vor.u32 %v1831_v23, %v1827_v22  ;;  %v6116_v22 = vld [vmem:[#allocation16 + $0x70] sm:$0xff]  }
 0x5a3   : > { %v6117_v23 = vld [vmem:[#allocation16 + $0x30] sm:$0xff]   ;;  %5490 = vmatprep.subr.bf16.mxu0 %v6116_v22  ;;  %v6139_v22 = vld [vmem:[%s7735_s15 + $0x68] sm:$0xff]  }
 0x5a4   : > { %2068 = vmatprep.mubr.bf16.mxu1 %v1832_v24 }
 0x5a5   : > { %2069 = vmatmul.mubr.bf16.vlgmr.msra.gmra.mxu1 %v1825_v19  ;;  %5491 = vmatpush3.bf16.msra.mxu0 %v6117_v23  ;;  %v6151_v23 = vld [vmem:[%s7733_s13 + $0x70] ss:$8 sps:$4 sm:$0xff]  }
 0x5a6   : > { %2288 = vmatpush1.bf16.msra.mxu1 %v6099_v43  ;;  %v6128_v43 = vld [vmem:[#allocation16 + $0x50] sm:$0xff]  }
 0x5a7   : > { %2289 = vmatprep.subr.bf16.mxu1 %v6815_v0 }
 0x5aa   : > { %2290 = vmatpush1.bf16.msra.mxu1 %v6100_v44  ;;  %v6129_v44 = vld [vmem:[#allocation16 + $0x10] sm:$0xff]  }
 0x5ab   : > { %2291 = vmatprep.subr.bf16.mxu1 %v6815_v0 }
 0x5ae   : > { %2292 = vmatpush1.bf16.msra.mxu1 %v6101_v45  ;;  %v6130_v45 = vld [vmem:[#allocation16 + $0x80] sm:$0xff]  }
 0x5af   : > { %2293 = vmatprep.subr.bf16.mxu1 %v6815_v0 }
 0x5b2   : > { %2294 = vmatpush1.bf16.msra.mxu1 %v6102_v46  ;;  %v6131_v46 = vld [vmem:[#allocation16 + $0x48] sm:$0xff]  }
 0x5b3   : > { %2295 = vmatprep.subr.bf16.mxu1 %v6815_v0 }
 0x5b6   : > { %2296 = vmatpush1.bf16.msra.mxu1 %v6103_v47  ;;  %v6132_v47 = vld [vmem:[#allocation16 + $0x8] sm:$0xff]  }
 0x5b7   : > { %2297 = vmatprep.subr.bf16.mxu1 %v6815_v0 }
 0x5ba   : > { %2298 = vmatpush1.bf16.msra.mxu1 %v6104_v48  ;;  %v6133_v48 = vld [vmem:[%s7735_s15 + $0x78] sm:$0xff]  }
 0x5bb   : > { %2299 = vmatprep.subr.bf16.mxu1 %v6815_v0 }
 0x5be   : > { %2300 = vmatpush1.bf16.msra.mxu1 %v6105_v50  ;;  %v6135_v50 = vld [vmem:[#allocation16 + $0x40] sm:$0xff]  }
 0x5bf   : > { %2301 = vmatprep.subr.bf16.mxu1 %v6815_v0 }
 0x5c2   : > { %2302 = vmatpush1.bf16.msra.mxu1 %v6106_v51  ;;  %v6136_v51 = vld [vmem:[#allocation16] sm:$0xff]  }
 0x5c3   : > { %2311 = vmatprep.subr.bf16.mxu1 %v6815_v0 }
 0x5c6   : > { %2312 = vmatpush2.bf16.msra.mxu1 %v6107_v52  ;;  %v6153_v52 = vld [vmem:[%s7733_s13 + $0x74] ss:$8 sps:$4 sm:$0xff]  }
 0x5c7   : > { %2313 = vmatprep.subr.bf16.mxu1 %v6815_v0 }
 0x5ca   : > { %2314 = vmatpush2.bf16.msra.mxu1 %v6108_v53 }
 0x5cb   : > { %2315 = vmatprep.subr.bf16.mxu1 %v6815_v0 }
 0x5ce   : > { %2316 = vmatpush2.bf16.msra.mxu1 %v6109_v54 }
 0x5cf   : > { %2317 = vmatprep.subr.bf16.mxu1 %v6815_v0 }
 0x5d2   : > { %2318 = vmatpush2.bf16.msra.mxu1 %v6110_v55 }
 0x5d3   : > { %5762 = vmatprep.subr.bf16.mxu1 %v6817_v49 }
 0x660   : > { %v2110_v25 = vpop.f32.mrf.mxu0 }
 0x662   : > { %v5760_v26 = vpop.f32.mrf.mxu0 }
 0x663   : > { %v6120_v26 = vld [vmem:[#allocation16 + $0x28] sm:$0xff]  }
 0x664   : > { %v2113_v27 = vpop.f32.mrf.mxu0 }
 0x665   : > { %v5473_v28 = vpop.f32.mrf.mxu1  ;;  %v6111_v27 = vld [vmem:[#allocation16 + $0xb8] sm:$0xff]  }
 0x666   : > { %v5761_v29 = vpop.f32.mrf.mxu0 }
 0x667   : > { %v5474_v32 = vpop.f32.mrf.mxu1 }
 0x668   : > { %v5475_v33 = vadd.f32 %v5474_v32, %v5473_v28  ;;  %v6115_v32 = vld [vmem:[#allocation16 + $0xa8] sm:$0xff]  }
 0x669   : > { %v5476_v34 = vpop.f32.mrf.mxu1 }
 0x66a   : > { %v2071_v35 = vadd.f32 %v5475_v33, %v5169_v31  ;;  %v6112_v31 = vld [vmem:[#allocation16 + $0xb0] sm:$0xff]   ;;  %v6118_v33 = vld [vmem:[#allocation16 + $0xa0] sm:$0xff]   ;;  %v6121_v34 = vld [vmem:[#allocation16 + $0x98] sm:$0xff]  }
 0x66b   : > { %v5477_v36 = vpop.f32.mrf.mxu1 }
 0x66c   : > { %v2111_v37 = vadd.f32 %v2110_v25, %v2071_v35  ;;  %v6119_v25 = vld [vmem:[#allocation16 + $0x68] sm:$0xff]   ;;  %v6122_v35 = vld [vmem:[#allocation16 + $0x60] sm:$0xff]  }
 0x66d   : > { %5492 = vmatprep.subr.bf16.mxu0 %v6119_v25  ;;  %v6123_v36 = vld [vmem:[#allocation16 + $0x20] sm:$0xff]  }
 0x66e   : > { %v2116_v38 = vmax.f32 %v2111_v37, 0.0  ;;  %5493 = vmatpush3.bf16.msra.mxu0 %v6120_v26  ;;  %v6124_v37 = vld [vmem:[#allocation16 + $0x90] sm:$0xff]   ;;  %v6140_v25 = vld [vmem:[%s7735_s15 + $0x28] sm:$0xff]   ;;  %v6141_v26 = vld [vmem:[%s7735_s15 + $0x60] sm:$0xff]  }
 0x66f   : > { %5494 = vmatprep.subr.bf16.mxu0 %v6122_v35  ;;  %v6145_v35 = vld [vmem:[%s7735_s15 + $0x50] sm:$0xff]  }
 0x670   : > { %v7311_v40 = vpack.c.bf16 %v2116_v38, %v2116_v38  ;;  %v6125_v38 = vld [vmem:[#allocation16 + $0x58] sm:$0xff]  }
 0x672   : > { %2119 = vrot.lane.b32.xlu0 %v7311_v40, %s6822_s27  ;;  %5495 = vmatpush3.bf16.msra.mxu0 %v6123_v36  ;;  %v2809_v53 = vshrl.u32 %v7311_v40, 16  ;;  %v2812_v55 = vshll.u32 %v7311_v40, 16  ;;  %v6160_v36 = vld [vmem:[%s7733_s13 + $0x40] ss:$8 sps:$4 sm:$0xff]  }
 0x673   : > { %5496 = vmatprep.subr.bf16.mxu0 %v6125_v38  ;;  %v6147_v38 = vld [vmem:[%s7735_s15 + $0x48] sm:$0xff]  }
 0x674   : > { %v2811_v54 = vrot.slane %v2809_v53, 7  ;;  %v6175_v53 = vld [vmem:[%s7735_s15 + $0xf8] sm:$0xff]  }
 0x6e4   : > { %v2120_v41 = vpop.permute.xlu0 %2119 }
 0x6e5   : > { %v2122_v42 = vmax.bf16 %v2120_v41, %v7311_v40  ;;  %v6126_v41 = vld [vmem:[#allocation16 + $0x18] sm:$0xff]  }
 0x6e6   : > { %5497 = vmatpush3.bf16.msra.mxu0 %v6126_v41  ;;  %v6148_v41 = vld [vmem:[%s7735_s15 + $0x8] sm:$0xff]  }
 0x6e7   : > { %2126 = vrot.lane.b32.xlu0 %v2122_v42, %s6824_s5  ;;  %2124 = vrot.lane.b32.xlu1 %v2122_v42, %s6822_s27 }
 0x6e8   : > { %5498 = vmatprep.subr.bf16.mxu0 %v6128_v43  ;;  %v6150_v43 = vld [vmem:[%s7735_s15] sm:$0xff]  }
 0x6ea   : > { %5499 = vmatpush3.bf16.msra.mxu0 %v6129_v44  ;;  %v6165_v44 = vld [vmem:[%s7733_s13 + $0x34] ss:$8 sps:$4 sm:$0xff]  }
 0x6eb   : > { %2128 = vrot.lane.b32.xlu1 %v2122_v42, %s6825_s8  ;;  %5500 = vmatprep.subr.bf16.mxu0 %v6131_v46  ;;  %v6168_v46 = vld [vmem:[%s7733_s13 + $0x24] ss:$8 sps:$4 sm:$0xff]  }
 0x6ee   : > { %5501 = vmatpush3.bf16.msra.mxu0 %v6132_v47  ;;  %v6166_v47 = vld [vmem:[%s7733_s13 + $0x20] ss:$8 sps:$4 sm:$0xff]  }
 0x6ef   : > { %5502 = vmatprep.subr.bf16.mxu0 %v6135_v50  ;;  %v6169_v50 = vld [vmem:[%s7733_s13 + $0x10] ss:$8 sps:$4 sm:$0xff]  }
 0x6f2   : > { %5503 = vmatpush3.bf16.msra.mxu0 %v6136_v51  ;;  %v6174_v51 = vld [vmem:[%s7733_s13 + $0x4] ss:$8 sps:$4 sm:$0xff]  }
 0x6f3   : > { %2739 = vmatprep.subr.bf16.mxu0 %v6153_v52  ;;  %v6172_v52 = vld [vmem:[%s7733_s13] ss:$8 sps:$4 sm:$0xff]  }
 0x759   : > { %v2125_v56 = vpop.permute.xlu1 %2124  ;;  %v2127_v57 = vpop.permute.xlu0 %2126 }
 0x75a   : > { %v2132_v58 = vsel %vm1575_vm8, %v2122_v42, %v2125_v56  ;;  %v6127_v42 = vld [vmem:[#allocation16 + $0x88] sm:$0xff]   ;;  %v5194_v56 = vld [vmem:[#allocation15] ss:$0 sm:$0xff]  ;;  %vm7818_vm8 = vcmask 1046528  }
 0x75b   : > { %v2134_v59 = vsel %vm1581_vm10, %v2132_v58, %v2127_v57  ;;  %v2814_v57 = vor.u32 %v2812_v55, %v2811_v54  ;;  %v6179_v54 = vld [vmem:[%s7735_s15 + $0x178] sm:$0xff]   ;;  %vm7819_vm10 = vsmask.f32 7424  ;;  %vm7822_vm13 = vmmov %vm7818_vm8 }
 0x75c   : > { %v6180_v55 = vld [vmem:[%s7735_s15 + $0x138] sm:$0xff]   ;;  %vm7826_vm15 = vmmov %vm7819_vm10 }
 0x75d   : > { %v2129_v60 = vpop.permute.xlu1 %2128 }
 0x75e   : > { %v2136_v61 = vsel %vm1587_vm12, %v2134_v59, %v2129_v60 }
 0x75f   : > { %v2138_v62 = vshrl.u32 %v2136_v61, 16 }
 0x761   : > { %v2141_v63 = vmax.bf16 %v2138_v62, %v2136_v61  ;;  %v2816_v61 = vsel %vm7200_vm2, 0, %v2814_v57 }
 0x763   : > { %v2143_v1 = vshll.u32 %v2141_v63, 16  ;;  %v2148_v3 = vrot.slane %v2141_v63, 1 }
 0x765   : > { %v2145_v2 = vrot.slane %v2143_v1, 1  ;;  %v2149_v4 = vrot.slane %v2143_v1, 2 }
 0x767   : > { %v2151_v5 = vsel %vm7200_vm2, %v2141_v63, %v2145_v2  ;;  %v7367_v2 = vsel %vm7286_vm1, %v2816_v61, 0  ;;  %v5208_v61 = vld [vmem:[#allocation18] ss:$0 sm:$0xff] }
 0x768   : > { %v2154_v6 = vsel %vm7816_vm4, %v2151_v5, %v2148_v3  ;;  %v2831_v5 = vshll.u32 %v7367_v2, 16 }
 0x769   : > { %v2156_v8 = vsel %vm7266_vm9, %v2154_v6, %v2149_v4 }
 0x76a   : > { %v2158_v9 = vshrl.u32 %v2156_v8, 16  ;;  %v2161_v12 = vshll.u32 %v2156_v8, 16 }
 0x76c   : > { %v2160_v10 = vrot.slane %v2158_v9, 7  ;;  %v2833_v9 = vrot.slane %v2831_v5, 1 }
 0x76e   : > { %v2163_v13 = vor.u32 %v2161_v12, %v2160_v10 }
 0x770   : > { %v2165_v14 = vsel %vm7200_vm2, 0, %v2163_v13  ;;  %v6134_v13 = vld [vmem:[%s7735_s15 + $0x38] sm:$0xff]  }
 0x771   : > { %v2166_v15 = vsel %vm7274_vm3, %v2165_v14, 0  ;;  %v2829_v14 = vshrl.u32 %v7367_v2, 16 }
 0x772   : > { %v2177_v19 = vrot.slane %v2166_v15, 1  ;;  %v2170_v20 = vshll.u32 %v2166_v15, 16  ;;  %v2168_v21 = vshrl.u32 %v2166_v15, 16 }
 0x774   : > { %5207 = vmatprep.mubr.msk.bf16.mxu1 %vm1083_vm5, %v2177_v19  ;;  %v2172_v11 = vrot.slane %v2170_v20, 1  ;;  %v2834_v19 = vor.u32 %v2833_v9, %v2829_v14  ;;  %v6177_v9 = vld [vmem:[%s7735_s15 + $0xf0] sm:$0xff]  }
 0x776   : > { %v2173_v24 = vor.u32 %v2172_v11, %v2168_v21 }
 0x778   : > { %2174 = vrot.lane.b32.xlu0 %v2173_v24, %s6816_s28  ;;  %v6156_v24 = vld [vmem:[%s7733_s13 + $0x64] ss:$8 sps:$4 sm:$0xff]   ;;  %s5425_s28 = sshll.u32 %s7832_s4, 4 }
 0x779   : > { %s1039_s10 = scalar_lea.vmem %s7829_s3, %s5425_s28 }
 0x7ea   : > { %v2175_v28 = vpop.permute.xlu0 %2174 }
 0x7eb   : > { %v2179_v29 = vsel %vm1083_vm5, %v2166_v15, %v2175_v28  ;;  %v6159_v28 = vld [vmem:[%s7733_s13 + $0x54] ss:$8 sps:$4 sm:$0xff]   ;;  %vm2803_vm5 = vcmask 1045504  }
 0x7ec   : > { %2320 = vmatmul.mubr.bf16.vlgmr.msra.gmra.mxu1 %v2179_v29  ;;  %v6142_v29 = vld [vmem:[%s7735_s15 + $0x20] sm:$0xff]  }
 0x7ed   : > { %5763 = vmatpush3.bf16.msra.mxu1 %v6111_v27  ;;  %5778 = vmatprep.mubr.msk.bf16.mxu1 %vm6818_vm6, %v6817_v49  ;;  %v6154_v27 = vld [vmem:[%s7733_s13 + $0x60] ss:$8 sps:$4 sm:$0xff]  }
 0x7ee   : > { %5764 = vmatprep.subr.bf16.mxu1 %v6817_v49 }
 0x7f1   : > { %5765 = vmatpush3.bf16.msra.mxu1 %v6112_v31  ;;  %v6143_v31 = vld [vmem:[%s7735_s15 + $0x58] sm:$0xff]  }
 0x7f2   : > { %5766 = vmatprep.subr.bf16.mxu1 %v6817_v49 }
 0x7f5   : > { %5767 = vmatpush3.bf16.msra.mxu1 %v6115_v32  ;;  %v6157_v32 = vld [vmem:[%s7733_s13 + $0x50] ss:$8 sps:$4 sm:$0xff]  }
 0x7f6   : > { %5768 = vmatprep.subr.bf16.mxu1 %v6817_v49 }
 0x7f9   : > { %5769 = vmatpush3.bf16.msra.mxu1 %v6118_v33  ;;  %v6162_v33 = vld [vmem:[%s7733_s13 + $0x44] ss:$8 sps:$4 sm:$0xff]  }
 0x7fa   : > { %5770 = vmatprep.subr.bf16.mxu1 %v6817_v49 }
 0x7fd   : > { %5771 = vmatpush3.bf16.msra.mxu1 %v6121_v34  ;;  %v6144_v34 = vld [vmem:[%s7735_s15 + $0x18] sm:$0xff]  }
 0x7fe   : > { %5772 = vmatprep.subr.bf16.mxu1 %v6817_v49 }
 0x801   : > { %5773 = vmatpush3.bf16.msra.mxu1 %v6124_v37  ;;  %v6146_v37 = vld [vmem:[%s7735_s15 + $0x10] sm:$0xff]  }
 0x802   : > { %5774 = vmatprep.subr.bf16.mxu1 %v6817_v49 }
 0x805   : > { %5775 = vmatpush3.bf16.msra.mxu1 %v6127_v42  ;;  %v6149_v42 = vld [vmem:[%s7735_s15 + $0x40] sm:$0xff]  }
 0x806   : > { %5776 = vmatprep.subr.bf16.mxu1 %v6817_v49 }
 0x809   : > { %5777 = vmatpush3.bf16.msra.mxu1 %v6130_v45  ;;  %v6163_v45 = vld [vmem:[%s7733_s13 + $0x30] ss:$8 sps:$4 sm:$0xff]  }
 0x80a   : > { %5519 = vmatprep.subr.bf16.mxu1 %v6133_v48  ;;  %v6171_v48 = vld [vmem:[%s7733_s13 + $0x14] ss:$8 sps:$4 sm:$0xff]  }
 0x8ac   : > { %v2321_v58 = vpop.f32.mrf.mxu1 }
 0x8ad   : > { %v2322_v59 = vadd.f32 %v5194_v56, %v2321_v58 }
 0x8ae   : > { %v2323_v60 = vpop.f32.mrf.mxu1 }
 0x8af   : > { %v2327_v62 = vmax.f32 %v2322_v59, 0.0 }
 0x8b0   : > { %v2324_v63 = vpop.f32.mrf.mxu1 }
 0x8b1   : > { %v2328_v1 = vpack.c.bf16 %v2327_v62, %v2327_v62 }
 0x8b2   : > { %v2325_v3 = vpop.f32.mrf.mxu1 }
 0x8b3   : > { %v2330_v4 = vshrl.u32 %v2328_v1, 16  ;;  %v2333_v6 = vshll.u32 %v2328_v1, 16 }
 0x8b5   : > { %v2332_v40 = vrot.slane %v2330_v4, 7 }
 0x8b7   : > { %v2335_v8 = vor.u32 %v2333_v6, %v2332_v40  ;;  %v6176_v6 = vld [vmem:[%s7735_s15 + $0xb8] sm:$0xff]  }
 0x8b9   : > { %v2337_v10 = vsel %vm7200_vm2, 0, %v2335_v8 }
 0x8ba   : > { %v2338_v12 = vsel %vm7274_vm3, %v2337_v10, 0  ;;  %v6178_v10 = vld [vmem:[%s7735_s15 + $0xb0] sm:$0xff]   ;;  %vm7817_vm3 = vmmov %vm7816_vm4 }
 0x8bb   : > { %v2348_v15 = vrot.slane %v2338_v12, 1  ;;  %v2342_v18 = vshll.u32 %v2338_v12, 16  ;;  %v2340_v20 = vshrl.u32 %v2338_v12, 16  ;;  %vm7828_vm4 = vmmov %vm7819_vm10 }
 0x8bd   : > { %5779 = vmatmul.mubr.bf16.vlgmr.msra.gmra.mxu1 %v2348_v15  ;;  %v2344_v21 = vrot.slane %v2342_v18, 1  ;;  %v6181_v18 = vld [vmem:[%s7735_s15 + $0xe8] sm:$0xff]  }
 0x8be   : > { %5520 = vmatpush3.bf16.msra.mxu1 %v6134_v13  ;;  %3273 = vmatprep.mubr.bf16.mxu1 %v2834_v19  ;;  %v6182_v19 = vld [vmem:[%s7735_s15 + $0xa8] sm:$0xff]  }
 0x8bf   : > { %5521 = vmatprep.subr.bf16.mxu1 %v6137_v16  ;;  %v2345_v11 = vor.u32 %v2344_v21, %v2340_v20  ;;  %v6183_v20 = vld [vmem:[%s7735_s15 + $0x170] sm:$0xff]  }
 0x8c0   : > { %v6184_v21 = vld [vmem:[%s7735_s15 + $0x130] sm:$0xff]  }
 0x8c1   : > { %2581 = vmatprep.mubr.bf16.mxu0 %v2345_v11  ;;  %v6186_v11 = vld [vmem:[%s7735_s15 + $0xa0] sm:$0xff]  }
 0x8c2   : > { %5522 = vmatpush3.bf16.msra.mxu1 %v6138_v17  ;;  %2582 = vmatmul.mubr.bf16.vlgmr.msra.gmra.mxu0 %v2338_v12  ;;  %v6185_v17 = vld [vmem:[%s7735_s15 + $0xe0] sm:$0xff]  }
 0x8c3   : > { %5523 = vmatprep.subr.bf16.mxu1 %v6139_v22  ;;  %2740 = vmatpush1.bf16.msra.mxu0 %v6151_v23  ;;  %v6187_v22 = vld [vmem:[%s7735_s15 + $0x168] sm:$0xff]  }
 0x8c4   : > { %2741 = vmatprep.subr.bf16.mxu0 %v6156_v24  ;;  %2771 = vmatprep.mubr.bf16.mxu0 %v6815_v0  ;;  %v6188_v23 = vld [vmem:[%s7735_s15 + $0x128] sm:$0xff]   ;;  %v6189_v24 = vld [vmem:[%s7735_s15 + $0xd8] sm:$0xff]  }
 0x8c6   : > { %5524 = vmatpush3.bf16.msra.mxu1 %v6140_v25  ;;  %v6190_v25 = vld [vmem:[%s7735_s15 + $0x98] sm:$0xff]  }
 0x8c7   : > { %5525 = vmatprep.subr.bf16.mxu1 %v6141_v26  ;;  %2742 = vmatpush1.bf16.msra.mxu0 %v6154_v27  ;;  %v6191_v26 = vld [vmem:[%s7735_s15 + $0x160] sm:$0xff]  }
 0x8c8   : > { %2743 = vmatprep.subr.bf16.mxu0 %v6159_v28  ;;  %v6192_v27 = vld [vmem:[%s7735_s15 + $0x120] sm:$0xff]   ;;  %v6193_v28 = vld [vmem:[%s7735_s15 + $0xd0] sm:$0xff]  }
 0x8ca   : > { %5526 = vmatpush3.bf16.msra.mxu1 %v6142_v29  ;;  %v6194_v29 = vld [vmem:[%s7735_s15 + $0x90] sm:$0xff]  }
 0x8cb   : > { %5527 = vmatprep.subr.bf16.mxu1 %v6143_v31  ;;  %2744 = vmatpush1.bf16.msra.mxu0 %v6157_v32  ;;  %v6195_v31 = vld [vmem:[%s7735_s15 + $0x158] sm:$0xff]  }
 0x8cc   : > { %2745 = vmatprep.subr.bf16.mxu0 %v6162_v33  ;;  %v6196_v32 = vld [vmem:[%s7735_s15 + $0x118] sm:$0xff]   ;;  %v6197_v33 = vld [vmem:[%s7735_s15 + $0xc8] sm:$0xff]  }
 0x8ce   : > { %5528 = vmatpush3.bf16.msra.mxu1 %v6144_v34  ;;  %v6199_v34 = vld [vmem:[%s7735_s15 + $0x150] sm:$0xff]  }
 0x8cf   : > { %5529 = vmatprep.subr.bf16.mxu1 %v6145_v35  ;;  %2746 = vmatpush1.bf16.msra.mxu0 %v6160_v36  ;;  %v6198_v35 = vld [vmem:[%s7735_s15 + $0x88] sm:$0xff]   ;;  %v6200_v36 = vld [vmem:[%s7735_s15 + $0x110] sm:$0xff]  }
 0x8d0   : > { %2747 = vmatprep.subr.bf16.mxu0 %v6165_v44  ;;  %v6206_v44 = vld [vmem:[%s7735_s15 + $0x100] sm:$0xff]  }
 0x8d2   : > { %5530 = vmatpush3.bf16.msra.mxu1 %v6146_v37  ;;  %v6201_v37 = vld [vmem:[%s7735_s15 + $0xc0] sm:$0xff]  }
 0x8d3   : > { %5531 = vmatprep.subr.bf16.mxu1 %v6147_v38  ;;  %2748 = vmatpush1.bf16.msra.mxu0 %v6163_v45  ;;  %v6203_v38 = vld [vmem:[%s7735_s15 + $0x148] sm:$0xff]  }
 0x8d4   : > { %2749 = vmatprep.subr.bf16.mxu0 %v6168_v46  ;;  %v6209_v45 = vld [vmem:[#allocation21 + $0x78] sm:$0xff]   ;;  %v2649_v46 = vlaneseq }
 0x8d6   : > { %5532 = vmatpush3.bf16.msra.mxu1 %v6148_v41  ;;  %v6202_v41 = vld [vmem:[%s7735_s15 + $0x80] sm:$0xff]  }
 0x8d7   : > { %5533 = vmatprep.subr.bf16.mxu1 %v6149_v42  ;;  %2750 = vmatpush1.bf16.msra.mxu0 %v6166_v47  ;;  %v6204_v42 = vld [vmem:[%s7735_s15 + $0x108] sm:$0xff]   ;;  %v7566_v47 = vshrl.u32 %v2649_v46, 7 }
 0x8d8   : > { %2751 = vmatprep.subr.bf16.mxu0 %v6171_v48  ;;  %v6226_v46 = vld [vmem:[#allocation21 + $0x80] sm:$0xff]  }
 0x8d9   : > { %v2651_v48 = vsub.s32 0, %v7566_v47 }
 0x8da   : > { %5534 = vmatpush3.bf16.msra.mxu1 %v6150_v43  ;;  %v6205_v43 = vld [vmem:[%s7735_s15 + $0x140] sm:$0xff]  }
 0x8db   : > { %2752 = vmatpush1.bf16.msra.mxu0 %v6169_v50  ;;  %5563 = vmatprep.subr.bf16.mxu1 %v6179_v54  ;;  %v2647_v50 = vld [vmem:[%s7734_s14] sm:$0x3] }
 0x8dc   : > { %2753 = vmatprep.subr.bf16.mxu0 %v6174_v51  ;;  %v2655_v51 = vsub.s32 1, %v7566_v47 }
 0x8dd   : > { %3274 = vmatmul.mubr.bf16.vlgmr.msra.gmra.mxu1 %v7367_v2 }
 0x8de   : > { %5564 = vmatpush3.bf16.msra.mxu1 %v6180_v55 }
 0x8df   : > { %2754 = vmatpush1.bf16.msra.mxu0 %v6172_v52  ;;  %5565 = vmatprep.subr.bf16.mxu1 %v6183_v20  ;;  %v2652_v52 = vrot.slane %v2647_v50, %v2651_v48 }
 0x8e0   : > { %5541 = vmatprep.subr.bf16.mxu0 %v6175_v53  ;;  %v2656_v53 = vrot.slane %v2647_v50, %v2655_v51  ;;  %v6227_v50 = vld [vmem:[#allocation21 + $0x48] sm:$0xff]  }
 0x8e2   : > { %5566 = vmatpush3.bf16.msra.mxu1 %v6184_v21 }
 0x8e3   : > { %5567 = vmatprep.subr.bf16.mxu1 %v6187_v22 }
 0x8e6   : > { %5568 = vmatpush3.bf16.msra.mxu1 %v6188_v23 }
 0x8e7   : > { %5569 = vmatprep.subr.bf16.mxu1 %v6191_v26 }
 0x8ea   : > { %5570 = vmatpush3.bf16.msra.mxu1 %v6192_v27  ;;  %v6208_v27 = vld [vmem:[#allocation21 + $0xb0] sm:$0xff]  }
 0x8eb   : > { %5571 = vmatprep.subr.bf16.mxu1 %v6195_v31  ;;  %v6213_v31 = vld [vmem:[#allocation21 + $0x30] sm:$0xff]  }
 0x8ee   : > { %5572 = vmatpush3.bf16.msra.mxu1 %v6196_v32  ;;  %v6214_v32 = vld [vmem:[#allocation21 + $0xa0] sm:$0xff]  }
 0x8ef   : > { %5573 = vmatprep.subr.bf16.mxu1 %v6199_v34  ;;  %v6216_v34 = vld [vmem:[#allocation21 + $0x28] sm:$0xff]  }
 0x8f2   : > { %5574 = vmatpush3.bf16.msra.mxu1 %v6200_v36  ;;  %v6218_v36 = vld [vmem:[#allocation21 + $0x60] sm:$0xff]  }
 0x8f3   : > { %5575 = vmatprep.subr.bf16.mxu1 %v6203_v38  ;;  %v6220_v38 = vld [vmem:[#allocation21 + $0x90] sm:$0xff]  }
 0x8f6   : > { %5576 = vmatpush3.bf16.msra.mxu1 %v6204_v42  ;;  %v6222_v42 = vld [vmem:[#allocation21 + $0x18] sm:$0xff]  }
 0x8f7   : > { %5577 = vmatprep.subr.bf16.mxu1 %v6205_v43  ;;  %v6223_v43 = vld [vmem:[#allocation21 + $0x88] sm:$0xff]  }
 0x8fa   : > { %5578 = vmatpush3.bf16.msra.mxu1 %v6206_v44  ;;  %v6224_v44 = vld [vmem:[#allocation21 + $0x50] sm:$0xff]  }
 0x8fb   : > { %5782 = vmatprep.subr.bf16.mxu1 %v6817_v49 }
 0x97d   : > { %v2623_v56 = vpop.f32.mrf.mxu1 }
 0x97f   : > { %v5780_v57 = vpop.f32.mrf.mxu1 }
 0x981   : > { %v2626_v58 = vpop.f32.mrf.mxu1 }
 0x982   : > { %v5504_v59 = vpop.f32.mrf.mxu0 }
 0x983   : > { %v5781_v60 = vpop.f32.mrf.mxu1 }
 0x984   : > { %v5505_v62 = vpop.f32.mrf.mxu0 }
 0x985   : > { %v5506_v63 = vadd.f32 %v5505_v62, %v5504_v59 }
 0x986   : > { %v5507_v1 = vpop.f32.mrf.mxu0 }
 0x987   : > { %v2584_v3 = vadd.f32 %v5506_v63, %v5208_v61 }
 0x988   : > { %v5508_v4 = vpop.f32.mrf.mxu0 }
 0x989   : > { %v2624_v5 = vadd.f32 %v2623_v56, %v2584_v3 }
 0x98b   : > { %v2629_v40 = vmax.f32 %v2624_v5, 0.0 }
 0x98d   : > { %v2630_v8 = vpack.c.bf16 %v2629_v40, %v2629_v40 }
 0x98f   : > { %2772 = vmatmul.mubr.bf16.vlgmr.msra.gmra.mxu0 %v2630_v8 }
 0x990   : > { %5542 = vmatpush3.bf16.msra.mxu0 %v6176_v6 }
 0x991   : > { %5543 = vmatprep.subr.bf16.mxu0 %v6177_v9 }
 0x994   : > { %5544 = vmatpush3.bf16.msra.mxu0 %v6178_v10 }
 0x995   : > { %5545 = vmatprep.subr.bf16.mxu0 %v6181_v18 }
 0x998   : > { %5546 = vmatpush3.bf16.msra.mxu0 %v6182_v19 }
 0x999   : > { %5547 = vmatprep.subr.bf16.mxu0 %v6185_v17  ;;  %v2837_v17 = vrot.slane %v7367_v2, 1  ;;  %v6210_v2 = vld [vmem:[#allocation21 + $0x38] sm:$0xff]  }
 0x99c   : > { %5548 = vmatpush3.bf16.msra.mxu0 %v6186_v11 }
 0x99d   : > { %v5535_v12 = vpop.f32.mrf.mxu1  ;;  %5549 = vmatprep.subr.bf16.mxu0 %v6189_v24 }
 0x99f   : > { %v5536_v13 = vpop.f32.mrf.mxu1 }
 0x9a0   : > { %v7485_v14 = vadd.f32 %v5536_v13, %v5535_v12  ;;  %5550 = vmatpush3.bf16.msra.mxu0 %v6190_v25  ;;  %v6207_v25 = vld [vmem:[#allocation21 + $0xb8] sm:$0xff]  }
 0x9a1   : > { %v5538_v15 = vpop.f32.mrf.mxu1  ;;  %5551 = vmatprep.subr.bf16.mxu0 %v6193_v28  ;;  %v6211_v28 = vld [vmem:[#allocation21 + $0xa8] sm:$0xff]  }
 0x9a3   : > { %v5539_v16 = vpop.f32.mrf.mxu1 }
 0x9a4   : > { %5552 = vmatpush3.bf16.msra.mxu0 %v6194_v29  ;;  %v6212_v29 = vld [vmem:[#allocation21 + $0x70] sm:$0xff]  }
 0x9a5   : > { %5553 = vmatprep.subr.bf16.mxu0 %v6197_v33  ;;  %v6215_v33 = vld [vmem:[#allocation21 + $0x68] sm:$0xff]  }
 0x9a8   : > { %5554 = vmatpush3.bf16.msra.mxu0 %v6198_v35  ;;  %v6217_v35 = vld [vmem:[#allocation21 + $0x98] sm:$0xff]  }
 0x9a9   : > { %5555 = vmatprep.subr.bf16.mxu0 %v6201_v37  ;;  %v6219_v37 = vld [vmem:[#allocation21 + $0x20] sm:$0xff]  }
 0x9ac   : > { %5556 = vmatpush3.bf16.msra.mxu0 %v6202_v41  ;;  %v6221_v41 = vld [vmem:[#allocation21 + $0x58] sm:$0xff]  }
 0x9ad   : > { %5585 = vmatprep.subr.bf16.mxu0 %v6209_v45  ;;  %v6225_v45 = vld [vmem:[#allocation21 + $0x10] sm:$0xff]  }
 0xa4f   : > { %v2773_v54 = vpop.f32.mrf.mxu0 }
 0xa50   : > { %v2774_v55 = vadd.f32 %v2773_v54, %v2652_v52  ;;  %v6228_v52 = vld [vmem:[#allocation21 + $0x8] sm:$0xff]   ;;  %v6231_v54 = vld [vmem:[#allocation21 + $0x40] sm:$0xff]  }
 0xa51   : > { %v2775_v56 = vpop.f32.mrf.mxu0 }
 0xa52   : > { %v2776_v57 = vadd.f32 %v2775_v56, %v2656_v53  ;;  %v2784_v60 = vrot.slane %v2774_v55, 7  ;;  %v2788_v1 = vrot.slane %v2774_v55, 6  ;;  %v2792_v40 = vrot.slane %v2774_v55, 5  ;;  %v6229_v53 = vld [vmem:[#allocation24 + $0x78] sm:$0xff]  }
 0xa53   : > { %v2777_v58 = vpop.f32.mrf.mxu0  ;;  %v6249_v56 = vld [vmem:[#allocation22 + $0x74] ss:$8 sps:$4 sm:$0xff]  }
 0xa54   : > { %v2781_v59 = vrot.slane %v2776_v57, 7  ;;  %v2786_v62 = vrot.slane %v2776_v57, 6  ;;  %v2790_v4 = vrot.slane %v2776_v57, 5  ;;  %v2794_v8 = vrot.slane %v2776_v57, 4 }
 0xa55   : > { %v2778_v61 = vpop.f32.mrf.mxu0  ;;  %v3860_v57 = vshrl.u32 %v7243_v39, 16 }
 0xa56   : > { %v2796_v63 = vsel %vm7817_vm3, %v2774_v55, %v2781_v59  ;;  %v6232_v55 = vld [vmem:[#allocation21] sm:$0xff]  }
 0xa57   : > { %v2797_v3 = vsel %vm1619_vm14, %v2796_v63, %v2784_v60  ;;  %v5249_v60 = vld [vmem:[#allocation19] ss:$0 sm:$0xff]  ;;  %v3862_v61 = vrot.slane %v3860_v57, 7  ;;  %v6243_v57 = vld [vmem:[#allocation24 + $0x48] sm:$0xff]  }
 0xa58   : > { %v2798_v5 = vsel %vm1628_vm0, %v2797_v3, %v2786_v62 }
 0xa59   : > { %v2800_v6 = vsel %vm1637_vm11, %v2798_v5, %v2788_v1  ;;  %v3863_v1 = vshll.u32 %v7243_v39, 16 }
 0xa5a   : > { %v2802_v9 = vsel %vm1650_vm7, %v2800_v6, %v2790_v4  ;;  %v3276_v4 = vadd.f32 %v7485_v14, %v5249_v60  ;;  %v7608_v14 = vsel %vm7200_vm2, %v3862_v61, 0  ;;  %v6261_v60 = vld [vmem:[#allocation22 + $0x34] ss:$8 sps:$4 sm:$0xff]  }
 0xa5b   : > { %v2804_v10 = vsel %vm2803_vm5, %v2802_v9, %v2792_v40  ;;  %v3865_v6 = vor.u32 %v3863_v1, %v3862_v61  ;;  %v6259_v61 = vld [vmem:[#allocation22 + $0x30] ss:$8 sps:$4 sm:$0xff]   ;;  %v6267_v1 = vld [vmem:[#allocation22 + $0x14] ss:$8 sps:$4 sm:$0xff]  }
 0xa5c   : > { %v2806_v12 = vsel %vm7818_vm8, %v2804_v10, %v2794_v8 }
 0xa5d   : > { %v2807_v13 = vpack.c.bf16 %v2806_v12, %v2806_v12 }
 0xa5f   : > { %v2819_v15 = vshrl.u32 %v2807_v13, 16  ;;  %v2822_v18 = vshll.u32 %v2807_v13, 16 }
 0xa61   : > { %v2821_v16 = vrot.slane %v2819_v15, 7  ;;  %v7603_v15 = vsel %vm7200_vm2, 0, %v3865_v6  ;;  %v6275_v6 = vld [vmem:[#allocation24 + $0x178] sm:$0xff]  }
 0xa63   : > { %v2824_v19 = vor.u32 %v2822_v18, %v2821_v16 }
 0xa65   : > { %v2826_v20 = vsel %vm7200_vm2, 0, %v2824_v19  ;;  %v3884_v19 = vshll.u32 %v7603_v15, 16 }
 0xa66   : > { %v2827_v21 = vsel %vm7286_vm1, %v2826_v20, 0 }
 0xa67   : > { %v2842_v11 = vshll.u32 %v2827_v21, 16  ;;  %3313 = vmatprep.mubr.bf16.mxu0 %v2827_v21  ;;  %v2848_v22 = vrot.slane %v2827_v21, 1  ;;  %v2840_v23 = vshrl.u32 %v2827_v21, 16 }
 0xa68   : > { %3314 = vmatmul.mubr.bf16.vlgmr.msra.gmra.mxu0 %v2837_v17  ;;  %v3886_v17 = vrot.slane %v3884_v19, 1 }
 0xa69   : > { %v2844_v24 = vrot.slane %v2842_v11, 1  ;;  %3353 = vmatprep.mubr.bf16.mxu1 %v2848_v22  ;;  %5586 = vmatpush3.bf16.msra.mxu0 %v6210_v2  ;;  %v3882_v22 = vshrl.u32 %v7603_v15, 16 }
 0xa6a   : > { %5587 = vmatprep.subr.bf16.mxu0 %v6212_v29  ;;  %v6233_v29 = vld [vmem:[#allocation24 + $0x70] sm:$0xff]  }
 0xa6b   : > { %v2845_v26 = vor.u32 %v2844_v24, %v2840_v23  ;;  %v3889_v23 = vshll.u32 %v7608_v14, 16 }
 0xa6d   : > { %3354 = vmatmul.mubr.bf16.vlgmr.msra.gmra.mxu1 %v2845_v26  ;;  %5588 = vmatpush3.bf16.msra.mxu0 %v6213_v31 }
 0xa6e   : > { %5783 = vmatpush3.bf16.msra.mxu1 %v6207_v25  ;;  %5798 = vmatprep.mubr.msk.bf16.mxu1 %vm6818_vm6, %v6817_v49  ;;  %v3887_v25 = vor.u32 %v3886_v17, %v3882_v22 }
 0xa6f   : > { %5784 = vmatprep.subr.bf16.mxu1 %v6817_v49  ;;  %5589 = vmatprep.subr.bf16.mxu0 %v6215_v33 }
 0xa71   : > { %5590 = vmatpush3.bf16.msra.mxu0 %v6216_v34 }
 0xa72   : > { %5785 = vmatpush3.bf16.msra.mxu1 %v6208_v27  ;;  %5591 = vmatprep.subr.bf16.mxu0 %v6218_v36  ;;  %v6230_v27 = vld [vmem:[#allocation24 + $0x38] sm:$0xff]  }
 0xa73   : > { %5786 = vmatprep.subr.bf16.mxu1 %v6817_v49 }
 0xa75   : > { %5592 = vmatpush3.bf16.msra.mxu0 %v6219_v37  ;;  %v6235_v37 = vld [vmem:[#allocation24 + $0x68] sm:$0xff]  }
 0xa76   : > { %5787 = vmatpush3.bf16.msra.mxu1 %v6211_v28  ;;  %5593 = vmatprep.subr.bf16.mxu0 %v6221_v41  ;;  %v3891_v28 = vrot.slane %v3889_v23, 1  ;;  %v6252_v41 = vld [vmem:[#allocation22 + $0x64] ss:$8 sps:$4 sm:$0xff]   ;;  %v6272_v23 = vld [vmem:[#allocation24 + $0xb8] sm:$0xff]  }
 0xa77   : > { %5788 = vmatprep.subr.bf16.mxu1 %v6817_v49 }
 0xa79   : > { %5594 = vmatpush3.bf16.msra.mxu0 %v6222_v42  ;;  %v6237_v42 = vld [vmem:[#allocation24 + $0x60] sm:$0xff]  }
 0xa7a   : > { %5789 = vmatpush3.bf16.msra.mxu1 %v6214_v32  ;;  %5595 = vmatprep.subr.bf16.mxu0 %v6224_v44  ;;  %v3892_v32 = vsel %vm7819_vm10, %v3887_v25, %v3891_v28  ;;  %v6255_v44 = vld [vmem:[#allocation22 + $0x54] ss:$8 sps:$4 sm:$0xff]  }
 0xa7b   : > { %5790 = vmatprep.subr.bf16.mxu1 %v6817_v49  ;;  %v6273_v25 = vld [vmem:[#allocation24 + $0xf0] sm:$0xff]  }
 0xa7c   : > { %v6279_v28 = vld [vmem:[#allocation24 + $0x170] sm:$0xff]  }
 0xa7d   : > { %5596 = vmatpush3.bf16.msra.mxu0 %v6225_v45  ;;  %v6238_v45 = vld [vmem:[#allocation24 + $0x20] sm:$0xff]  }
 0xa7e   : > { %5791 = vmatpush3.bf16.msra.mxu1 %v6217_v35  ;;  %5597 = vmatprep.subr.bf16.mxu0 %v6227_v50  ;;  %v6234_v35 = vld [vmem:[#allocation24 + $0x30] sm:$0xff]  }
 0xa7f   : > { %5792 = vmatprep.subr.bf16.mxu1 %v6817_v49  ;;  %v6253_v50 = vld [vmem:[#allocation22 + $0x50] ss:$8 sps:$4 sm:$0xff]  }
 0xa81   : > { %5598 = vmatpush3.bf16.msra.mxu0 %v6228_v52  ;;  %v6258_v52 = vld [vmem:[#allocation22 + $0x44] ss:$8 sps:$4 sm:$0xff]  }
 0xa82   : > { %5793 = vmatpush3.bf16.msra.mxu1 %v6220_v38  ;;  %5599 = vmatprep.subr.bf16.mxu0 %v6231_v54  ;;  %v6247_v38 = vld [vmem:[#allocation22 + $0x70] ss:$8 sps:$4 sm:$0xff]  }
 0xa83   : > { %5794 = vmatprep.subr.bf16.mxu1 %v6817_v49  ;;  %v6241_v54 = vld [vmem:[#allocation24 + $0x50] sm:$0xff]  }
 0xa85   : > { %5600 = vmatpush3.bf16.msra.mxu0 %v6232_v55  ;;  %v6256_v55 = vld [vmem:[#allocation22 + $0x40] ss:$8 sps:$4 sm:$0xff]  }
 0xa86   : > { %5795 = vmatpush3.bf16.msra.mxu1 %v6223_v43  ;;  %3773 = vmatprep.subr.bf16.mxu0 %v6249_v56  ;;  %v6250_v43 = vld [vmem:[#allocation22 + $0x60] ss:$8 sps:$4 sm:$0xff]   ;;  %v6242_v56 = vld [vmem:[#allocation24 + $0x10] sm:$0xff]  }
 0xa87   : > { %5796 = vmatprep.subr.bf16.mxu1 %v6817_v49 }
 0xa8a   : > { %5797 = vmatpush3.bf16.msra.mxu1 %v6226_v46  ;;  %v6239_v46 = vld [vmem:[#allocation24 + $0x58] sm:$0xff]  }
 0xa8b   : > { %5616 = vmatprep.subr.bf16.mxu1 %v6229_v53  ;;  %v6240_v53 = vld [vmem:[#allocation24 + $0x18] sm:$0xff]  }
 0xb28   : > { %v5557_v58 = vpop.f32.mrf.mxu0 }
 0xb2a   : > { %v5558_v59 = vpop.f32.mrf.mxu0 }
 0xb2b   : > { %v5559_v62 = vadd.f32 %v5558_v59, %v5557_v58  ;;  %v6245_v58 = vld [vmem:[#allocation24 + $0x40] sm:$0xff]  }
 0xb2c   : > { %v5560_v63 = vpop.f32.mrf.mxu0  ;;  %v6246_v59 = vld [vmem:[#allocation24] sm:$0xff]  }
 0xb2d   : > { %v5579_v3 = vpop.f32.mrf.mxu1  ;;  %v3316_v8 = vadd.f32 %v5559_v62, %v3276_v4  ;;  %v6264_v62 = vld [vmem:[#allocation22 + $0x24] ss:$8 sps:$4 sm:$0xff]   ;;  %v6262_v63 = vld [vmem:[#allocation22 + $0x20] ss:$8 sps:$4 sm:$0xff]  }
 0xb2e   : > { %v5561_v5 = vpop.f32.mrf.mxu0  ;;  %v6270_v4 = vld [vmem:[#allocation22 + $0x4] ss:$8 sps:$4 sm:$0xff]  }
 0xb2f   : > { %v5580_v40 = vpop.f32.mrf.mxu1  ;;  %v6268_v5 = vld [vmem:[#allocation22] ss:$8 sps:$4 sm:$0xff]  }
 0xb30   : > { %v5581_v9 = vadd.f32 %v5580_v40, %v5579_v3  ;;  %v6265_v3 = vld [vmem:[#allocation22 + $0x10] ss:$8 sps:$4 sm:$0xff]  }
 0xb31   : > { %v5582_v10 = vpop.f32.mrf.mxu1  ;;  %v6271_v40 = vld [vmem:[#allocation24 + $0xf8] sm:$0xff]  }
 0xb32   : > { %v3356_v12 = vadd.f32 %v5581_v9, %v3316_v8  ;;  %v6276_v8 = vld [vmem:[#allocation24 + $0x138] sm:$0xff]  }
 0xb33   : > { %v5583_v13 = vpop.f32.mrf.mxu1 }
 0xb34   : > { %v3361_v16 = vmax.f32 %v3356_v12, 0.0 }
 0xb36   : > { %v3362_v18 = vpack.c.bf16 %v3361_v16, %v3361_v16 }
 0xb38   : > { %v3364_v39 = vshrl.u32 %v3362_v18, 16  ;;  %v3367_v21 = vshll.u32 %v3362_v18, 16  ;;  %v5298_v18 = vld [vmem:[%s7738_s18] ss:$0 sm:$0xff] }
 0xb3a   : > { %v3366_v20 = vrot.slane %v3364_v39, 7 }
 0xb3c   : > { %v3369_v11 = vor.u32 %v3367_v21, %v3366_v20 }
 0xb3e   : > { %v3371_v24 = vsel %vm7200_vm2, 0, %v3369_v11 }
 0xb3f   : > { %v3372_v26 = vsel %vm7286_vm1, %v3371_v24, 0  ;;  %vm7820_vm1 = vmmov %vm7817_vm3 }
 0xb40   : > { %v3382_v2 = vrot.slane %v3372_v26, 1  ;;  %v3376_v31 = vshll.u32 %v3372_v26, 16  ;;  %v3374_v33 = vshrl.u32 %v3372_v26, 16  ;;  %vm7821_vm9 = vmmov %vm7820_vm1 }
 0xb42   : > { %5799 = vmatmul.mubr.bf16.vlgmr.msra.gmra.mxu1 %v3382_v2  ;;  %v3378_v34 = vrot.slane %v3376_v31, 1  ;;  %v6278_v2 = vld [vmem:[#allocation24 + $0xa8] sm:$0xff]   ;;  %v6281_v31 = vld [vmem:[#allocation24 + $0xe0] sm:$0xff]  }
 0xb43   : > { %5617 = vmatpush3.bf16.msra.mxu1 %v6230_v27  ;;  %4342 = vmatprep.mubr.bf16.mxu1 %v3892_v32  ;;  %v6277_v27 = vld [vmem:[#allocation24 + $0xe8] sm:$0xff]   ;;  %v6282_v32 = vld [vmem:[#allocation24 + $0xa0] sm:$0xff]  }
 0xb44   : > { %5618 = vmatprep.subr.bf16.mxu1 %v6233_v29  ;;  %v3379_v36 = vor.u32 %v3378_v34, %v3374_v33  ;;  %v6280_v29 = vld [vmem:[#allocation24 + $0x130] sm:$0xff]   ;;  %v6283_v33 = vld [vmem:[#allocation24 + $0x168] sm:$0xff]  }
 0xb45   : > { %v6284_v34 = vld [vmem:[#allocation24 + $0x128] sm:$0xff]  }
 0xb46   : > { %3615 = vmatprep.mubr.bf16.mxu0 %v3379_v36  ;;  %v6286_v36 = vld [vmem:[#allocation24 + $0x98] sm:$0xff]  }
 0xb47   : > { %5619 = vmatpush3.bf16.msra.mxu1 %v6234_v35  ;;  %3616 = vmatmul.mubr.bf16.vlgmr.msra.gmra.mxu0 %v3372_v26  ;;  %v6274_v26 = vld [vmem:[#allocation24 + $0xb0] sm:$0xff]   ;;  %v6285_v35 = vld [vmem:[#allocation24 + $0xd8] sm:$0xff]  }
 0xb48   : > { %5620 = vmatprep.subr.bf16.mxu1 %v6235_v37  ;;  %3774 = vmatpush1.bf16.msra.mxu0 %v6247_v38  ;;  %v6287_v37 = vld [vmem:[#allocation24 + $0x160] sm:$0xff]   ;;  %v6289_v38 = vld [vmem:[#allocation24 + $0xd0] sm:$0xff]  }
 0xb49   : > { %3775 = vmatprep.subr.bf16.mxu0 %v6252_v41  ;;  %3805 = vmatprep.mubr.bf16.mxu0 %v6815_v0  ;;  %v6244_v0 = vld [vmem:[#allocation24 + $0x8] sm:$0xff]   ;;  %v6288_v41 = vld [vmem:[#allocation24 + $0x120] sm:$0xff]  }
 0xb4b   : > { %5621 = vmatpush3.bf16.msra.mxu1 %v6236_v30  ;;  %v6291_v30 = vld [vmem:[#allocation24 + $0x158] sm:$0xff]  }
 0xb4c   : > { %5622 = vmatprep.subr.bf16.mxu1 %v6237_v42  ;;  %3776 = vmatpush1.bf16.msra.mxu0 %v6250_v43  ;;  %v6290_v42 = vld [vmem:[#allocation24 + $0x90] sm:$0xff]   ;;  %v6293_v43 = vld [vmem:[#allocation24 + $0xc8] sm:$0xff]  }
 0xb4d   : > { %3777 = vmatprep.subr.bf16.mxu0 %v6255_v44  ;;  %v6292_v44 = vld [vmem:[#allocation24 + $0x118] sm:$0xff]  }
 0xb4f   : > { %5623 = vmatpush3.bf16.msra.mxu1 %v6238_v45  ;;  %v6295_v45 = vld [vmem:[#allocation24 + $0x150] sm:$0xff]  }
 0xb50   : > { %5624 = vmatprep.subr.bf16.mxu1 %v6239_v46  ;;  %3778 = vmatpush1.bf16.msra.mxu0 %v6253_v50  ;;  %v6294_v46 = vld [vmem:[#allocation24 + $0x88] sm:$0xff]   ;;  %v6297_v50 = vld [vmem:[#allocation24 + $0xc0] sm:$0xff]  }
 0xb51   : > { %3779 = vmatprep.subr.bf16.mxu0 %v6258_v52  ;;  %v6296_v52 = vld [vmem:[#allocation24 + $0x110] sm:$0xff]  }
 0xb53   : > { %5625 = vmatpush3.bf16.msra.mxu1 %v6240_v53  ;;  %v6299_v53 = vld [vmem:[#allocation24 + $0x148] sm:$0xff]  }
 0xb54   : > { %5626 = vmatprep.subr.bf16.mxu1 %v6241_v54  ;;  %3780 = vmatpush1.bf16.msra.mxu0 %v6256_v55  ;;  %v6298_v54 = vld [vmem:[#allocation24 + $0x80] sm:$0xff]   ;;  %v6300_v55 = vld [vmem:[#allocation24 + $0x108] sm:$0xff]  }
 0xb55   : > { %3781 = vmatprep.subr.bf16.mxu0 %v6261_v60 }
 0xb57   : > { %5627 = vmatpush3.bf16.msra.mxu1 %v6242_v56  ;;  %v6301_v56 = vld [vmem:[#allocation24 + $0x140] sm:$0xff]  }
 0xb58   : > { %5628 = vmatprep.subr.bf16.mxu1 %v6243_v57  ;;  %3782 = vmatpush1.bf16.msra.mxu0 %v6259_v61  ;;  %v6302_v57 = vld [vmem:[#allocation24 + $0x100] sm:$0xff]  }
 0xb59   : > { %3783 = vmatprep.subr.bf16.mxu0 %v6264_v62 }
 0xb5b   : > { %5629 = vmatpush3.bf16.msra.mxu1 %v6244_v0  ;;  %v3681_v0 = vld [vmem:[%s7740_s20] sm:$0x3] }
 0xb5c   : > { %5630 = vmatprep.subr.bf16.mxu1 %v6245_v58  ;;  %3784 = vmatpush1.bf16.msra.mxu0 %v6262_v63  ;;  %v3686_v58 = vrot.slane %v3681_v0, %v2651_v48 }
 0xb5d   : > { %3785 = vmatprep.subr.bf16.mxu0 %v6267_v1 }
 0xb5f   : > { %5631 = vmatpush3.bf16.msra.mxu1 %v6246_v59  ;;  %v3690_v59 = vrot.slane %v3681_v0, %v2655_v51  ;;  %v6308_v0 = vld [vmem:[#allocation25 + $0xa8] sm:$0xff]  }
 0xb60   : > { %3786 = vmatpush1.bf16.msra.mxu0 %v6265_v3  ;;  %5660 = vmatprep.subr.bf16.mxu1 %v6275_v6 }
 0xb61   : > { %3787 = vmatprep.subr.bf16.mxu0 %v6270_v4 }
 0xb62   : > { %4343 = vmatmul.mubr.bf16.vlgmr.msra.gmra.mxu1 %v7603_v15 }
 0xb63   : > { %5661 = vmatpush3.bf16.msra.mxu1 %v6276_v8 }
 0xb64   : > { %3788 = vmatpush1.bf16.msra.mxu0 %v6268_v5  ;;  %5662 = vmatprep.subr.bf16.mxu1 %v6279_v28 }
 0xb65   : > { %5638 = vmatprep.subr.bf16.mxu0 %v6271_v40 }
 0xb67   : > { %5663 = vmatpush3.bf16.msra.mxu1 %v6280_v29 }
 0xb68   : > { %5664 = vmatprep.subr.bf16.mxu1 %v6283_v33 }
 0xb6b   : > { %5665 = vmatpush3.bf16.msra.mxu1 %v6284_v34  ;;  %v3896_v34 = vrot.slane %v7603_v15, 1 }
 0xb6c   : > { %5666 = vmatprep.subr.bf16.mxu1 %v6287_v37 }
 0xb6f   : > { %5667 = vmatpush3.bf16.msra.mxu1 %v6288_v41 }
 0xb70   : > { %5668 = vmatprep.subr.bf16.mxu1 %v6291_v30 }
 0xb73   : > { %5669 = vmatpush3.bf16.msra.mxu1 %v6292_v44 }
 0xb74   : > { %5670 = vmatprep.subr.bf16.mxu1 %v6295_v45 }
 0xb77   : > { %5671 = vmatpush3.bf16.msra.mxu1 %v6296_v52 }
 0xb78   : > { %5672 = vmatprep.subr.bf16.mxu1 %v6299_v53  ;;  %v6303_v53 = vld [vmem:[#allocation25 + $0xb8] sm:$0xff]  }
 0xb7b   : > { %5673 = vmatpush3.bf16.msra.mxu1 %v6300_v55  ;;  %v6305_v55 = vld [vmem:[#allocation25 + $0xb0] sm:$0xff]  }
 0xb7c   : > { %5674 = vmatprep.subr.bf16.mxu1 %v6301_v56  ;;  %v6306_v56 = vld [vmem:[#allocation25 + $0x38] sm:$0xff]  }
 0xb7f   : > { %5675 = vmatpush3.bf16.msra.mxu1 %v6302_v57  ;;  %v6307_v57 = vld [vmem:[#allocation25 + $0x70] sm:$0xff]  }
 0xb80   : > { %5802 = vmatprep.subr.bf16.mxu1 %v6817_v49 }
 0xc02   : > { %v3657_v9 = vpop.f32.mrf.mxu1 }
 0xc04   : > { %v5800_v10 = vpop.f32.mrf.mxu1 }
 0xc06   : > { %v3660_v12 = vpop.f32.mrf.mxu1 }
 0xc07   : > { %v5601_v13 = vpop.f32.mrf.mxu0 }
 0xc08   : > { %v5801_v16 = vpop.f32.mrf.mxu1 }
 0xc09   : > { %v5602_v19 = vpop.f32.mrf.mxu0 }
 0xc0a   : > { %v5603_v39 = vadd.f32 %v5602_v19, %v5601_v13 }
 0xc0b   : > { %v5604_v20 = vpop.f32.mrf.mxu0 }
 0xc0c   : > { %v3618_v21 = vadd.f32 %v5603_v39, %v5298_v18 }
 0xc0d   : > { %v5605_v17 = vpop.f32.mrf.mxu0 }
 0xc0e   : > { %v3658_v11 = vadd.f32 %v3657_v9, %v3618_v21 }
 0xc10   : > { %v3663_v22 = vmax.f32 %v3658_v11, 0.0 }
 0xc12   : > { %v3664_v24 = vpack.c.bf16 %v3663_v22, %v3663_v22 }
 0xc14   : > { %3806 = vmatmul.mubr.bf16.vlgmr.msra.gmra.mxu0 %v3664_v24 }
 0xc15   : > { %5639 = vmatpush3.bf16.msra.mxu0 %v6272_v23 }
 0xc16   : > { %5640 = vmatprep.subr.bf16.mxu0 %v6273_v25 }
 0xc19   : > { %5641 = vmatpush3.bf16.msra.mxu0 %v6274_v26 }
 0xc1a   : > { %5642 = vmatprep.subr.bf16.mxu0 %v6277_v27 }
 0xc1d   : > { %5643 = vmatpush3.bf16.msra.mxu0 %v6278_v2 }
 0xc1e   : > { %5644 = vmatprep.subr.bf16.mxu0 %v6281_v31 }
 0xc21   : > { %5645 = vmatpush3.bf16.msra.mxu0 %v6282_v32 }
 0xc22   : > { %5646 = vmatprep.subr.bf16.mxu0 %v6285_v35 }
 0xc25   : > { %5647 = vmatpush3.bf16.msra.mxu0 %v6286_v36  ;;  %v3897_v36 = vrot.slane %v7608_v14, 1 }
 0xc26   : > { %5648 = vmatprep.subr.bf16.mxu0 %v6289_v38 }
 0xc29   : > { %5649 = vmatpush3.bf16.msra.mxu0 %v6290_v42 }
 0xc2a   : > { %5650 = vmatprep.subr.bf16.mxu0 %v6293_v43 }
 0xc2d   : > { %5651 = vmatpush3.bf16.msra.mxu0 %v6294_v46 }
 0xc2e   : > { %5652 = vmatprep.subr.bf16.mxu0 %v6297_v50 }
 0xc31   : > { %5653 = vmatpush3.bf16.msra.mxu0 %v6298_v54  ;;  %v6304_v54 = vld [vmem:[#allocation25 + $0x78] sm:$0xff]  }
 0xc32   : > { %5682 = vmatprep.subr.bf16.mxu0 %v6304_v54 }
 0xcd4   : > { %v3807_v60 = vpop.f32.mrf.mxu0 }
 0xcd5   : > { %v3808_v61 = vadd.f32 %v3807_v60, %v3686_v58  ;;  %v6309_v58 = vld [vmem:[#allocation25 + $0x30] sm:$0xff]   ;;  %v6311_v60 = vld [vmem:[#allocation25 + $0xa0] sm:$0xff]  }
 0xcd6   : > { %v3809_v62 = vpop.f32.mrf.mxu0 }
 0xcd7   : > { %v3810_v63 = vadd.f32 %v3809_v62, %v3690_v59  ;;  %v3818_v5 = vrot.slane %v3808_v61, 7  ;;  %v3830_v40 = vrot.slane %v3808_v61, 4  ;;  %v3834_v9 = vrot.slane %v3808_v61, 3  ;;  %v6310_v59 = vld [vmem:[#allocation25 + $0x68] sm:$0xff]   ;;  %v6313_v62 = vld [vmem:[#allocation25 + $0x60] sm:$0xff]  }
 0xcd8   : > { %v3811_v1 = vpop.f32.mrf.mxu0  ;;  %v3822_v12 = vrot.slane %v3808_v61, 6  ;;  %v3838_v16 = vrot.slane %v3808_v61, 2  ;;  %v3826_v39 = vrot.slane %v3808_v61, 5  ;;  %v3842_v22 = vrot.slane %v3808_v61, 1 }
 0xcd9   : > { %v3815_v3 = vrot.slane %v3810_v63, 7  ;;  %v3832_v6 = vrot.slane %v3810_v63, 3  ;;  %v3820_v8 = vrot.slane %v3810_v63, 6  ;;  %v3836_v13 = vrot.slane %v3810_v63, 2  ;;  %v6315_v1 = vld [vmem:[#allocation25 + $0x20] sm:$0xff]  }
 0xcda   : > { %v3812_v4 = vpop.f32.mrf.mxu0  ;;  %v3824_v51 = vrot.slane %v3810_v63, 5  ;;  %v3840_v20 = vrot.slane %v3810_v63, 1  ;;  %v3828_v11 = vrot.slane %v3810_v63, 4 }
 0xcdb   : > { %v3844_v10 = vsel %vm7820_vm1, %v3808_v61, %v3815_v3  ;;  %v3851_v47 = vsel %vm7821_vm9, %v3830_v40, %v3832_v6  ;;  %v6312_v61 = vld [vmem:[#allocation25 + $0x28] sm:$0xff]   ;;  %v6316_v3 = vld [vmem:[#allocation25 + $0x58] sm:$0xff]   ;;  %v6317_v4 = vld [vmem:[#allocation25 + $0x90] sm:$0xff]  }
 0xcdc   : > { %v3845_v48 = vsel %vm1619_vm14, %v3844_v10, %v3818_v5  ;;  %v3852_v19 = vsel %vm1619_vm14, %v3851_v47, %v3834_v9  ;;  %vm7823_vm14 = vmmov %vm7818_vm8  ;;  %v6318_v5 = vld [vmem:[#allocation25 + $0x18] sm:$0xff]   ;;  %v6319_v40 = vld [vmem:[#allocation25 + $0x50] sm:$0xff]   ;;  %v5632_v47 = vpop.f32.mrf.mxu1 }
 0xcdd   : > { %v3846_v18 = vsel %vm1628_vm0, %v3845_v48, %v3820_v8  ;;  %v3853_v17 = vsel %vm1628_vm0, %v3852_v19, %v3836_v13  ;;  %vm7824_vm0 = vmmov %vm7818_vm8  ;;  %v6320_v6 = vld [vmem:[#allocation25 + $0x88] sm:$0xff]   ;;  %v6321_v8 = vld [vmem:[#allocation25 + $0x10] sm:$0xff]  }
 0xcde   : > { %v3847_v21 = vsel %vm1637_vm11, %v3846_v18, %v3822_v12  ;;  %v3854_v24 = vsel %vm1637_vm11, %v3853_v17, %v3838_v16  ;;  %v3898_v41 = vsel %vm7824_vm0, %v3896_v34, %v3897_v36  ;;  %vm7825_vm11 = vmmov %vm7824_vm0  ;;  %v6322_v9 = vld [vmem:[#allocation25 + $0x48] sm:$0xff]   ;;  %v6323_v10 = vld [vmem:[#allocation25 + $0x80] sm:$0xff]  }
 0xcdf   : > { %v3848_v23 = vsel %vm1650_vm7, %v3847_v21, %v3824_v51  ;;  %v3855_v26 = vsel %vm1650_vm7, %v3854_v24, %v3840_v20  ;;  %v6324_v12 = vld [vmem:[#allocation25 + $0x8] sm:$0xff]   ;;  %v6325_v13 = vld [vmem:[#allocation25 + $0x40] sm:$0xff]   ;;  %v5633_v51 = vpop.f32.mrf.mxu1  ;;  %v5339_v17 = vld [vmem:[%s7742_s22] ss:$0 sm:$0xff] }
 0xce0   : > { %v3849_v25 = vsel %vm2803_vm5, %v3848_v23, %v3826_v39  ;;  %v3856_v2 = vsel %vm2803_vm5, %v3855_v26, %v3842_v22  ;;  %v6326_v48 = vld [vmem:[#allocation25] sm:$0xff]   ;;  %v5634_v21 = vadd.f32 %v5633_v51, %v5632_v47  ;;  %vm7827_vm7 = vmmov %vm7824_vm0 }
 0xce1   : > { %v3850_v27 = vsel %vm7822_vm13, %v3849_v25, %v3828_v11  ;;  %v3857_v28 = vsel %vm7823_vm14, %v3856_v2, %v3810_v63  ;;  %v6314_v63 = vld [vmem:[#allocation25 + $0x98] sm:$0xff]   ;;  %v5635_v16 = vpop.f32.mrf.mxu1 }
 0xce2   : > { %v3858_v29 = vpack.c.bf16 %v3857_v28, %v3850_v27  ;;  %v4345_v26 = vadd.f32 %v5634_v21, %v5339_v17 }
 0xce3   : > { %v5636_v39 = vpop.f32.mrf.mxu1 }
 0xce4   : > { %v3871_v31 = vshrl.u32 %v3858_v29, 16  ;;  %v3874_v33 = vshll.u32 %v3858_v29, 16  ;;  %v5637_v23 = vadd.f32 %v5636_v39, %v5635_v16 }
 0xce6   : > { %v3873_v32 = vrot.slane %v3871_v31, 7  ;;  %v4348_v29 = vadd.f32 %v5637_v23, %v5339_v17 }
 0xce8   : > { %v3876_v35 = vor.u32 %v3874_v33, %v3873_v32  ;;  %v3880_v37 = vsel %vm7200_vm2, %v3873_v32, 0 }
 0xce9   : > { %v3908_v42 = vshll.u32 %v3880_v37, 16  ;;  %v3916_v44 = vrot.slane %v3880_v37, 1 }
 0xcea   : > { %v3879_v38 = vsel %vm7200_vm2, 0, %v3876_v35 }
 0xceb   : > { %v3903_v30 = vshll.u32 %v3879_v38, 16  ;;  %4383 = vmatprep.mubr.bf16.mxu0 %v3879_v38  ;;  %v3915_v43 = vrot.slane %v3879_v38, 1  ;;  %v3901_v45 = vshrl.u32 %v3879_v38, 16  ;;  %v3910_v50 = vrot.slane %v3908_v42, 1 }
 0xcec   : > { %4384 = vmatmul.mubr.bf16.vlgmr.msra.gmra.mxu0 %v3898_v41 }
 0xced   : > { %v3905_v46 = vrot.slane %v3903_v30, 1  ;;  %v3917_v15 = vsel %vm7825_vm11, %v3915_v43, %v3916_v44  ;;  %5683 = vmatpush3.bf16.msra.mxu0 %v6306_v56 }
 0xcee   : > { %4424 = vmatprep.mubr.bf16.mxu1 %v3917_v15  ;;  %5684 = vmatprep.subr.bf16.mxu0 %v6307_v57 }
 0xcef   : > { %v3906_v14 = vor.u32 %v3905_v46, %v3901_v45 }
 0xcf1   : > { %v3911_v52 = vsel %vm7826_vm15, %v3906_v14, %v3910_v50  ;;  %5685 = vmatpush3.bf16.msra.mxu0 %v6309_v58 }
 0xcf2   : > { %4425 = vmatmul.mubr.bf16.vlgmr.msra.gmra.mxu1 %v3911_v52  ;;  %5686 = vmatprep.subr.bf16.mxu0 %v6310_v59  ;;  %v6329_v59 = vld [vmem:[%s7745_s25 + $0x28] sm:$0xff]  }
 0xcf3   : > { %5818 = vmatprep.mubr.msk.bf16.mxu1 %vm6818_vm6, %v6817_v49  ;;  %5803 = vmatpush3.bf16.msra.mxu1 %v6303_v53 }
 0xcf4   : > { %5804 = vmatprep.subr.bf16.mxu1 %v6817_v49 }
 0xcf5   : > { %5687 = vmatpush3.bf16.msra.mxu0 %v6312_v61  ;;  %v6331_v61 = vld [vmem:[%s7745_s25 + $0x18] sm:$0xff]  }
 0xcf6   : > { %5688 = vmatprep.subr.bf16.mxu0 %v6313_v62  ;;  %v6332_v62 = vld [vmem:[%s7745_s25 + $0x10] sm:$0xff]  }
 0xcf7   : > { %5805 = vmatpush3.bf16.msra.mxu1 %v6305_v55 }
 0xcf8   : > { %5806 = vmatprep.subr.bf16.mxu1 %v6817_v49 }
 0xcf9   : > { %5689 = vmatpush3.bf16.msra.mxu0 %v6315_v1  ;;  %v6334_v1 = vld [vmem:[%s7745_s25] sm:$0xff]  }
 0xcfa   : > { %5690 = vmatprep.subr.bf16.mxu0 %v6316_v3 }
 0xcfb   : > { %5807 = vmatpush3.bf16.msra.mxu1 %v6308_v0  ;;  %v6327_v0 = vld [vmem:[%s7745_s25 + $0x38] sm:$0xff]  }
 0xcfc   : > { %5808 = vmatprep.subr.bf16.mxu1 %v6817_v49 }
 0xcfd   : > { %5691 = vmatpush3.bf16.msra.mxu0 %v6318_v5 }
 0xcfe   : > { %5692 = vmatprep.subr.bf16.mxu0 %v6319_v40 }
 0xcff   : > { %5809 = vmatpush3.bf16.msra.mxu1 %v6311_v60  ;;  %v6330_v60 = vld [vmem:[%s7745_s25 + $0x20] sm:$0xff]  }
 0xd00   : > { %5810 = vmatprep.subr.bf16.mxu1 %v6817_v49 }
 0xd01   : > { %5693 = vmatpush3.bf16.msra.mxu0 %v6321_v8  ;;  %v5388_v8 = vld [vmem:[%s7744_s24] ss:$0 sm:$0xff] }
 0xd02   : > { %5694 = vmatprep.subr.bf16.mxu0 %v6322_v9 }
 0xd03   : > { %5811 = vmatpush3.bf16.msra.mxu1 %v6314_v63  ;;  %v6333_v63 = vld [vmem:[%s7745_s25 + $0x8] sm:$0xff]  }
 0xd04   : > { %5812 = vmatprep.subr.bf16.mxu1 %v6817_v49 }
 0xd05   : > { %5695 = vmatpush3.bf16.msra.mxu0 %v6324_v12 }
 0xd06   : > { %5696 = vmatprep.subr.bf16.mxu0 %v6325_v13 }
 0xd07   : > { %5813 = vmatpush3.bf16.msra.mxu1 %v6317_v4 }
 0xd08   : > { %5814 = vmatprep.subr.bf16.mxu1 %v6817_v49 }
 0xd09   : > { %5697 = vmatpush3.bf16.msra.mxu0 %v6326_v48 }
 0xd0a   : > { %5822 = vmatprep.subr.bf16.mxu0 %v6817_v49 }
 0xd0b   : > { %5815 = vmatpush3.bf16.msra.mxu1 %v6320_v6 }
 0xd0c   : > { %5816 = vmatprep.subr.bf16.mxu1 %v6817_v49 }
 0xd0f   : > { %5817 = vmatpush3.bf16.msra.mxu1 %v6323_v10 }
 0xdac   : > { %v5654_v18 = vpop.f32.mrf.mxu0 }
 0xdae   : > { %v5655_v19 = vpop.f32.mrf.mxu0 }
 0xdaf   : > { %v5656_v24 = vadd.f32 %v5655_v19, %v5654_v18 }
 0xdb0   : > { %v5657_v20 = vpop.f32.mrf.mxu0 }
 0xdb1   : > { %v4386_v31 = vadd.f32 %v5656_v24, %v4345_v26 }
 0xdb2   : > { %v5658_v11 = vpop.f32.mrf.mxu0  ;;  %v5676_v22 = vpop.f32.mrf.mxu1 }
 0xdb3   : > { %v5659_v27 = vadd.f32 %v5658_v11, %v5657_v20  ;;  %v5413_v20 = vld [vmem:[%s7746_s26] ss:$0 sm:$0xff] }
 0xdb4   : > { %v5677_v25 = vpop.f32.mrf.mxu1 }
 0xdb5   : > { %v5678_v2 = vadd.f32 %v5677_v25, %v5676_v22  ;;  %v4389_v33 = vadd.f32 %v5659_v27, %v4348_v29 }
 0xdb6   : > { %v5679_v28 = vpop.f32.mrf.mxu1 }
 0xdb7   : > { %v4427_v34 = vadd.f32 %v5678_v2, %v4386_v31 }
 0xdb8   : > { %v5680_v32 = vpop.f32.mrf.mxu1 }
 0xdb9   : > { %v5681_v35 = vadd.f32 %v5680_v32, %v5679_v28  ;;  %v4433_v37 = vmax.f32 %v4427_v34, 0.0 }
 0xdbb   : > { %v4430_v36 = vadd.f32 %v5681_v35, %v4389_v33 }
 0xdbd   : > { %v4434_v38 = vmax.f32 %v4430_v36, 0.0 }
 0xdbf   : > { %v4435_v41 = vpack.c.bf16 %v4434_v38, %v4433_v37 }
 0xdc1   : > { %v4437_v30 = vshrl.u32 %v4435_v41, 16  ;;  %v4440_v43 = vshll.u32 %v4435_v41, 16 }
 0xdc3   : > { %v4439_v42 = vrot.slane %v4437_v30, 7 }
 0xdc5   : > { %v4442_v44 = vor.u32 %v4440_v43, %v4439_v42  ;;  %v4446_v45 = vsel %vm7200_vm2, %v4439_v42, 0 }
 0xdc6   : > { %v4463_v14 = vrot.slane %v4446_v45, 1  ;;  %v4455_v52 = vshll.u32 %v4446_v45, 16 }
 0xdc7   : > { %v4445_v46 = vsel %vm7200_vm2, 0, %v4442_v44 }
 0xdc8   : > { %v4462_v15 = vrot.slane %v4445_v46, 1  ;;  %v4450_v50 = vshll.u32 %v4445_v46, 16  ;;  %v4448_v54 = vshrl.u32 %v4445_v46, 16  ;;  %v4457_v57 = vrot.slane %v4455_v52, 1 }
 0xdca   : > { %v4464_v53 = vsel %vm7827_vm7, %v4462_v15, %v4463_v14  ;;  %v4452_v55 = vrot.slane %v4450_v50, 1 }
 0xdcb   : > { %5819 = vmatmul.mubr.bf16.vlgmr.msra.gmra.mxu1 %v4464_v53 }
 0xdcc   : > { %v4453_v56 = vor.u32 %v4452_v55, %v4448_v54 }
 0xdce   : > { %v4458_v58 = vsel %vm7828_vm4, %v4453_v56, %v4457_v57 }
 0xdcf   : > { %4697 = vmatprep.mubr.bf16.mxu0 %v4458_v58 }
 0xdd0   : > { %4698 = vmatmul.mubr.bf16.vlgmr.msra.gmra.mxu0 %v4445_v46 }
 0xdd1   : > { %5823 = vmatpush3.bf16.msra.mxu0 %v6327_v0  ;;  %5838 = vmatprep.mubr.msk.bf16.mxu0 %vm6818_vm6, %v6817_v49 }
 0xdd2   : > { %5824 = vmatprep.subr.bf16.mxu0 %v6817_v49 }
 0xdd5   : > { %5825 = vmatpush3.bf16.msra.mxu0 %v6328_v7 }
 0xdd6   : > { %5826 = vmatprep.subr.bf16.mxu0 %v6817_v49 }
 0xdd9   : > { %5827 = vmatpush3.bf16.msra.mxu0 %v6329_v59 }
 0xdda   : > { %5828 = vmatprep.subr.bf16.mxu0 %v6817_v49 }
 0xddd   : > { %5829 = vmatpush3.bf16.msra.mxu0 %v6330_v60 }
 0xdde   : > { %5830 = vmatprep.subr.bf16.mxu0 %v6817_v49 }
 0xde1   : > { %5831 = vmatpush3.bf16.msra.mxu0 %v6331_v61 }
 0xde2   : > { %5832 = vmatprep.subr.bf16.mxu0 %v6817_v49 }
 0xde5   : > { %5833 = vmatpush3.bf16.msra.mxu0 %v6332_v62 }
 0xde6   : > { %5834 = vmatprep.subr.bf16.mxu0 %v6817_v49 }
 0xde9   : > { %5835 = vmatpush3.bf16.msra.mxu0 %v6333_v63 }
 0xdea   : > { %5836 = vmatprep.subr.bf16.mxu0 %v6817_v49 }
 0xded   : > { %5837 = vmatpush3.bf16.msra.mxu0 %v6334_v1 }
 0xe8b   : > { %v4740_v3 = vpop.f32.mrf.mxu1 }
 0xe8d   : > { %v5820_v4 = vpop.f32.mrf.mxu1 }
 0xe8f   : > { %v4743_v5 = vpop.f32.mrf.mxu1 }
 0xe90   : > { %v5698_v40 = vpop.f32.mrf.mxu0 }
 0xe91   : > { %v5821_v6 = vpop.f32.mrf.mxu1 }
 0xe92   : > { %v5699_v9 = vpop.f32.mrf.mxu0 }
 0xe93   : > { %v5700_v10 = vadd.f32 %v5699_v9, %v5698_v40 }
 0xe94   : > { %v5701_v12 = vpop.f32.mrf.mxu0 }
 0xe95   : > { %v4700_v13 = vadd.f32 %v5700_v10, %v5388_v8 }
 0xe96   : > { %v5702_v49 = vpop.f32.mrf.mxu0 }
 0xe97   : > { %v5703_v48 = vadd.f32 %v5702_v49, %v5701_v12  ;;  %v4741_v47 = vadd.f32 %v4740_v3, %v4700_v13 }
 0xe99   : > { %v4703_v51 = vadd.f32 %v5703_v48, %v5388_v8  ;;  %v4747_v18 = vmax.f32 %v4741_v47, 0.0 }
 0xe9b   : > { %v4744_v16 = vadd.f32 %v4743_v5, %v4703_v51 }
 0xe9d   : > { %v4748_v19 = vmax.f32 %v4744_v16, 0.0 }
 0xe9f   : > { %v4749_v39 = vpack.c.bf16 %v4748_v19, %v4747_v18 }
 0xea1   : > { %5839 = vmatmul.mubr.bf16.vlgmr.msra.gmra.mxu0 %v4749_v39 }
 0xf61   : > { %v4855_v21 = vpop.f32.mrf.mxu0 }
 0xf62   : > { %v4856_v17 = vadd.f32 %v5413_v20, %v4855_v21 }
 0xf63   : > { %v5840_v11 = vpop.f32.mrf.mxu0 }
 0xf64   : > { %4862 = vst.msk [vmem:[%s1039_s10] sm:$0xff] %vm1587_vm12, %v4856_v17 }
 0xf65   : > { %v4858_v22 = vpop.f32.mrf.mxu0 }
 0xf66   : > { %v4859_v23 = vadd.f32 %v5413_v20, %v4858_v22 }
 0xf67   : > { %v5841_v24 = vpop.f32.mrf.mxu0 }
 0xf68   : > { %4863 = vst.msk [vmem:[%s1039_s10 + $0x8] sm:$0xff] %vm1587_vm12, %v4859_v23 }
 0xf69 PF: > { %s7830_s4 = sld [smem:[#allocation36_spill]] }
 0xf6f   : > { %s46_s7 = sadd.s32 1, %s7830_s4  }
 0xf70   : > { %p43_p5 = scmp.ge.s32.totalorder %s46_s7, 4  }
 0xf72   :  { %45 = sbr.rel (!%p43_p5) target bundleno = 23 (0x17), region = 223 }
 0xf77   :  { %4885 = vsyncpa [#allocation3], 1 }
 0xf78   :  { %4887 = vsyncpa [#allocation3 + $0x1], 1 }
 0xf79   :  { %4888 = vsyncpa [#allocation5], 1 }
 0xf7a   :  { %4889 = vsyncpa [#allocation8], 1 }
 0xf7b   :  { %4890 = vsyncpa [#allocation11], 1 }
 0xf7c   :  { %4891 = vsyncpa [#allocation14], 1 }
 0xf7d   :  { %4892 = vsyncpa [#allocation17], 1 }
 0xf7e   :  { %4893 = vsyncpa [#allocation20], 1 }
 0xf7f   :  { %4894 = vsyncpa [#allocation23], 1 }
 0xf80   :  { %4895 = vsyncpa [#allocation26], 1 }

</bundles_post_ra>
